<compile_context>
chip_gen: v6e
topology: v6e:2x2x1
jax: 0.10.0
libtpu: 0.0.40
codegen_flags: <defaults>
</compile_context>

<pallas_src>
import functools

import jax
import jax.numpy as jnp
import numpy as np
from jax import lax
from jax.experimental import pallas as pl
from jax.experimental.pallas import tpu as pltpu

# Channel widths of the three conv layers (PyTorch: in_channels -> 32 -> 64 -> 128).
C1, C2, C3 = 32, 64, 128
FC_HIDDEN = 512
NPAD = 128            # logits padded to one full 128-lane register; sliced to 10 outside


# ----------------------------------------------------------------------------
# Stateless integer-threshold dropout mask (VPU only; no float convert)
# ----------------------------------------------------------------------------
def _keep_mask(shape, base_index, drop_rate):
    """P(keep) = 1 - drop_rate, unique bits per element and per grid step."""
    rows = lax.broadcasted_iota(jnp.int32, shape, 0)
    cols = lax.broadcasted_iota(jnp.int32, shape, 1)
    x = (rows * shape[1] + cols + base_index).astype(jnp.uint32)
    x = x ^ (x >> jnp.uint32(16))
    x = x * jnp.uint32(0x7FEB352D)
    x = x ^ (x >> jnp.uint32(15))
    x = x * jnp.uint32(0x846CA68B)
    x = x ^ (x >> jnp.uint32(16))
    thresh = int(round(drop_rate * (1 << 24)))          # top-24-bit integer threshold
    return (x >> jnp.uint32(8)).astype(jnp.int32) >= jnp.int32(thresh)


# ----------------------------------------------------------------------------
# 3x3 SAME conv over a padded VMEM scratch as ONE bf16 matmul (f32 accum)
# ----------------------------------------------------------------------------
def _conv3x3(xp_ref, w_ref):
    Hp, Wp, Cin = xp_ref.shape
    H, W = Hp - 2, Wp - 2
    taps = []
    for k in range(9):
        dh, dw = divmod(k, 3)
        taps.append(xp_ref[dh:dh + H, dw:dw + W, :])     # (H, W, Cin) static slices
    t = jnp.concatenate(taps, axis=-1).reshape(H * W, 9 * Cin)   # minor dim preserved
    return jnp.dot(t.astype(jnp.bfloat16), w_ref[...],
                   preferred_element_type=jnp.float32)    # (H*W, Cout) f32


# ----------------------------------------------------------------------------
# 2x2 max-pool of an (H*W, C) value using a single (H/2, W, C) scratch
# ----------------------------------------------------------------------------
def _pool2x2(a_flat, buf_ref, H, W, C):
    Ho, Wo = H // 2, W // 2
    a4 = a_flat.reshape(Ho, 2, W, C)                      # split-major reshape (free)
    buf_ref[...] = jnp.maximum(a4[:, 0], a4[:, 1])        # h-pool, one store
    return jnp.maximum(buf_ref[:, pl.ds(0, Wo, stride=2), :],
                       buf_ref[:, pl.ds(1, Wo, stride=2), :])   # (Ho, Wo, C)


# ----------------------------------------------------------------------------
# Fused whole-network kernel (one image per grid step)
# ----------------------------------------------------------------------------
def _dropout_cnn_kernel(x_ref, w1_ref, b1_ref, w2_ref, b2_ref, w3_ref, b3_ref,
                        fc1w_ref, fc1b_ref, fc2w_ref, fc2b_ref, o_ref,
                        xp1_ref, xp2_ref, xp3_ref, pb1_ref, pb2_ref, pb3_ref,
                        *, drop_rate, drop_seed):
    _, H1, W1, _ = x_ref.shape
    H2, W2 = H1 // 2, W1 // 2
    H3, W3 = H2 // 2, W2 // 2
    Hf, Wf = H3 // 2, W3 // 2
    n = pl.program_id(0)

    # ---- layer 1: pad(in-VMEM) -> conv -> bias -> relu -> pool --------------
    # Border is re-zeroed every step: scratch is per-core under megacore
    # sharding, so a "zero only on step 0" guard would be unsafe.
    xp1_ref[...] = jnp.zeros_like(xp1_ref)
    xp1_ref[1:H1 + 1, 1:W1 + 1, :] = x_ref[0]
    a1 = jnp.maximum(_conv3x3(xp1_ref, w1_ref) + b1_ref[...], 0.0)   # (H1*W1, 32)
    p1 = _pool2x2(a1, pb1_ref, H1, W1, C1)                           # (H2, W2, 32)

    # ---- layer 2: pad -> conv -> bias -> relu -> dropout -> pool ------------
    xp2_ref[...] = jnp.zeros_like(xp2_ref)
    xp2_ref[1:H2 + 1, 1:W2 + 1, :] = p1
    a2 = jnp.maximum(_conv3x3(xp2_ref, w2_ref) + b2_ref[...], 0.0)   # (H2*W2, 64)
    if drop_rate > 0.0:
        seed_mix = (int(drop_seed) * 0x9E3779B1) & 0x7FFFFFFF
        base = n * (H2 * W2 * C2) + seed_mix
        keep = _keep_mask((H2 * W2, C2), base, drop_rate)
        a2 = jnp.where(keep, a2 * jnp.float32(1.0 / (1.0 - drop_rate)),
                       jnp.float32(0.0))
    p2 = _pool2x2(a2, pb2_ref, H2, W2, C2)                           # (H3, W3, 64)

    # ---- layer 3: pad -> conv -> bias -> relu -> pool ------------------------
    # TODO(synk): self.activations / x.register_hook (gradient capture on the
    # conv3 activation) are backward-pass bookkeeping with no forward Pallas
    # equivalent.
    xp3_ref[...] = jnp.zeros_like(xp3_ref)
    xp3_ref[1:H3 + 1, 1:W3 + 1, :] = p2
    a3 = jnp.maximum(_conv3x3(xp3_ref, w3_ref) + b3_ref[...], 0.0)   # (H3*W3, 128)
    p3 = _pool2x2(a3, pb3_ref, H3, W3, C3)                           # (Hf, Wf, 128)

    # ---- FC head: fc1 + ReLU + fc2, weights resident in VMEM ----------------
    # fc1 rows were pre-permuted at init to HWC-flatten order and shaped
    # (Hf*Wf, 128, 512); the flatten is a minor-preserving reshape plus a short
    # unrolled loop of K=128 matmuls (no transpose in the kernel).
    pf = p3.reshape(Hf * Wf, C3).astype(jnp.bfloat16)
    h = jnp.zeros((1, FC_HIDDEN), jnp.float32)
    for s in range(Hf * Wf):
        h = h + jnp.dot(pf[s:s + 1, :], fc1w_ref[s],
                        preferred_element_type=jnp.float32)
    h = jnp.maximum(h + fc1b_ref[...], 0.0)
    logits = jnp.dot(h.astype(jnp.bfloat16), fc2w_ref[...],
                     preferred_element_type=jnp.float32) + fc2b_ref[...]
    o_ref[0] = logits.astype(o_ref.dtype)                            # (1, NPAD)


# ----------------------------------------------------------------------------
# Parameters
# ----------------------------------------------------------------------------
def init_params(key, in_channels=1, image_size=16):
    assert image_size % 8 == 0
    ks = jax.random.split(key, 5)

    def conv_w(k, cin, cout):
        w = jax.random.normal(k, (3, 3, cin, cout), jnp.float32) / np.sqrt(9 * cin)
        return w.reshape(9 * cin, cout).astype(jnp.bfloat16)   # rows: k*Cin + cin

    def lin_w(k, din, dout):
        return jax.random.normal(k, (din, dout), jnp.float32) / np.sqrt(din)

    hf = image_size // 8
    fc_in = C3 * hf * hf

    # fc1 rows in PyTorch NCHW-flatten order, permuted once to HWC-flatten
    # order (built from the REAL conv3 channel count, per review).
    fc1_w = lin_w(ks[3], fc_in, FC_HIDDEN)
    idx_chw = np.arange(fc_in).reshape(C3, hf, hf)
    perm = idx_chw.transpose(1, 2, 0).reshape(-1)           # perm[i_hwc] = i_chw
    fc1_w = fc1_w[perm, :].reshape(hf * hf, C3, FC_HIDDEN).astype(jnp.bfloat16)

    fc2_w = jnp.zeros((FC_HIDDEN, NPAD), jnp.float32)
    fc2_w = fc2_w.at[:, :10].set(lin_w(ks[4], FC_HIDDEN, 10)).astype(jnp.bfloat16)

    return {
        "w1": conv_w(ks[0], in_channels, C1), "b1": jnp.zeros((1, C1), jnp.float32),
        "w2": conv_w(ks[1], C1, C2),          "b2": jnp.zeros((1, C2), jnp.float32),
        "w3": conv_w(ks[2], C2, C3),          "b3": jnp.zeros((1, C3), jnp.float32),
        "fc1_w": fc1_w, "fc1_b": jnp.zeros((1, FC_HIDDEN), jnp.float32),
        "fc2_w": fc2_w, "fc2_b": jnp.zeros((1, NPAD), jnp.float32),
    }


# ----------------------------------------------------------------------------
# DropoutCNN forward (single fused pallas_call)
# ----------------------------------------------------------------------------
def dropout_cnn_forward(x_nchw, params, dropout_rate=0.5, dropout_seed=0,
                        training=True):
    N, Cin, H, W = x_nchw.shape
    assert H == W and H % 8 == 0
    H2, W2, H3, W3 = H // 2, W // 2, H // 4, W // 4
    Hf, Wf = H // 8, W // 8
    assert params["fc1_w"].shape == (Hf * Wf, C3, FC_HIDDEN)

    # One-time tiny NHWC relayout of the raw input (2 KB here).
    x = jnp.transpose(x_nchw, (0, 2, 3, 1)).astype(jnp.float32)
    rate = float(dropout_rate) if training else 0.0

    kernel = functools.partial(_dropout_cnn_kernel, drop_rate=rate,
                               drop_seed=int(dropout_seed))

    def full(*shape):
        return pl.BlockSpec(shape, lambda n, _s=len(shape): (0,) * _s)

    flops = 2 * N * (H * W * 9 * Cin * C1 + H2 * W2 * 9 * C1 * C2
                     + H3 * W3 * 9 * C2 * C3
                     + Hf * Wf * C3 * FC_HIDDEN + FC_HIDDEN * NPAD)
    weights = (params["w1"], params["b1"], params["w2"], params["b2"],
               params["w3"], params["b3"], params["fc1_w"], params["fc1_b"],
               params["fc2_w"], params["fc2_b"])
    bytes_accessed = (x.size * 4 + N * NPAD * 4
                      + sum(int(np.prod(a.shape)) * a.dtype.itemsize for a in weights))

    out = pl.pallas_call(
        kernel,
        out_shape=jax.ShapeDtypeStruct((N, 1, NPAD), jnp.float32),
        grid=(N,),
        in_specs=[
            pl.BlockSpec((1, H, W, Cin), lambda n: (n, 0, 0, 0)),
            full(9 * Cin, C1), full(1, C1),
            full(9 * C1, C2), full(1, C2),
            full(9 * C2, C3), full(1, C3),
            full(Hf * Wf, C3, FC_HIDDEN), full(1, FC_HIDDEN),
            full(FC_HIDDEN, NPAD), full(1, NPAD),
        ],
        out_specs=pl.BlockSpec((1, 1, NPAD), lambda n: (n, 0, 0)),
        scratch_shapes=[
            pltpu.VMEM((H + 2, W + 2, Cin), jnp.float32),    # padded conv1 input
            pltpu.VMEM((H2 + 2, W2 + 2, C1), jnp.float32),   # padded conv2 input
            pltpu.VMEM((H3 + 2, W3 + 2, C2), jnp.float32),   # padded conv3 input
            pltpu.VMEM((H2, W, C1), jnp.float32),            # pool scratch 1
            pltpu.VMEM((H3, W2, C2), jnp.float32),           # pool scratch 2
            pltpu.VMEM((Hf, W3, C3), jnp.float32),           # pool scratch 3
        ],
        compiler_params=pltpu.CompilerParams(
            dimension_semantics=("parallel",),
            # Actual footprint ~2 MiB (bf16 weights + double buffers + ~100 KB
            # scratch); 8 MiB leaves headroom and stays far under v7x's 64 MiB.
            vmem_limit_bytes=8 * 1024 * 1024,
        ),
        cost_estimate=pl.CostEstimate(flops=flops, transcendentals=0,
                                      bytes_accessed=bytes_accessed),
    )(x, *weights)

    return out[:, 0, :10]


if __name__ == "__main__":
    key = jax.random.PRNGKey(0)
    k_in, k_params = jax.random.split(key)

    batch, in_channels, image_size = 2, 1, 16
    params = init_params(k_params, in_channels=in_channels, image_size=image_size)
    x = jax.random.normal(
        k_in, (batch, in_channels, image_size, image_size), dtype=jnp.float32)

    fwd = jax.jit(functools.partial(dropout_cnn_forward, dropout_rate=0.5,
                                    dropout_seed=42, training=True))
    out = jax.block_until_ready(fwd(x, params))

    assert out.shape == (batch, 10), out.shape
    assert bool(jnp.all(jnp.isfinite(out)))
    print("KERNEL_OK")
</pallas_src>

<mosaic_0001>
module attributes {stable_mosaic.version = 11 : i64} {
  func.func @_dropout_cnn_kernel(%arg0: i32, %arg1: memref<1x16x16x1xf32, #tpu.memory_space<vmem>>, %arg2: memref<9x32xbf16, #tpu.memory_space<vmem>>, %arg3: memref<1x32xf32, #tpu.memory_space<vmem>>, %arg4: memref<288x64xbf16, #tpu.memory_space<vmem>>, %arg5: memref<1x64xf32, #tpu.memory_space<vmem>>, %arg6: memref<576x128xbf16, #tpu.memory_space<vmem>>, %arg7: memref<1x128xf32, #tpu.memory_space<vmem>>, %arg8: memref<4x128x512xbf16, #tpu.memory_space<vmem>>, %arg9: memref<1x512xf32, #tpu.memory_space<vmem>>, %arg10: memref<512x128xbf16, #tpu.memory_space<vmem>>, %arg11: memref<1x128xf32, #tpu.memory_space<vmem>>, %arg12: memref<1x1x128xf32, #tpu.memory_space<vmem>>, %arg13: memref<18x18x1xf32, #tpu.memory_space<vmem>>, %arg14: memref<10x10x32xf32, #tpu.memory_space<vmem>>, %arg15: memref<6x6x64xf32, #tpu.memory_space<vmem>>, %arg16: memref<8x16x32xf32, #tpu.memory_space<vmem>>, %arg17: memref<4x8x64xf32, #tpu.memory_space<vmem>>, %arg18: memref<2x4x128xf32, #tpu.memory_space<vmem>>) attributes {dimension_semantics = [#tpu.dimension_semantics<parallel>], iteration_bounds = array<i64: 2>, scalar_prefetch = 0 : i64, scratch_operands = 6 : i64, tpu.core_type = #tpu.core_type<tc>, window_params = [{transform_indices = @transform_0, window_bounds = array<i64: 1, 16, 16, 1>}, {pipeline_mode = #tpu.pipeline_mode<synchronous>, transform_indices = @transform_1, window_bounds = array<i64: 9, 32>}, {pipeline_mode = #tpu.pipeline_mode<synchronous>, transform_indices = @transform_2, window_bounds = array<i64: 1, 32>}, {pipeline_mode = #tpu.pipeline_mode<synchronous>, transform_indices = @transform_3, window_bounds = array<i64: 288, 64>}, {pipeline_mode = #tpu.pipeline_mode<synchronous>, transform_indices = @transform_4, window_bounds = array<i64: 1, 64>}, {pipeline_mode = #tpu.pipeline_mode<synchronous>, transform_indices = @transform_5, window_bounds = array<i64: 576, 128>}, {pipeline_mode = #tpu.pipeline_mode<synchronous>, transform_indices = @transform_6, window_bounds = array<i64: 1, 128>}, {pipeline_mode = #tpu.pipeline_mode<synchronous>, transform_indices = @transform_7, window_bounds = array<i64: 4, 128, 512>}, {pipeline_mode = #tpu.pipeline_mode<synchronous>, transform_indices = @transform_8, window_bounds = array<i64: 1, 512>}, {pipeline_mode = #tpu.pipeline_mode<synchronous>, transform_indices = @transform_9, window_bounds = array<i64: 512, 128>}, {pipeline_mode = #tpu.pipeline_mode<synchronous>, transform_indices = @transform_10, window_bounds = array<i64: 1, 128>}, {transform_indices = @transform_11, window_bounds = array<i64: 1, 1, 128>}]} {
    %cst = arith.constant 0.000000e+00 : f32
    %0 = vector.broadcast %cst : f32 to vector<18x18x1xf32>
    %c0 = arith.constant 0 : index
    %c0_0 = arith.constant 0 : index
    %c0_1 = arith.constant 0 : index
    %1 = vector.load %arg13[%c0, %c0_0, %c0_1] : memref<18x18x1xf32, #tpu.memory_space<vmem>>, vector<18x18x1xf32>
    tpu.vector_store %arg13[%c0, %c0_0, %c0_1], %0 {strides = array<i32>} : memref<18x18x1xf32, #tpu.memory_space<vmem>>, vector<18x18x1xf32>,
    %c0_2 = arith.constant 0 : index
    %c0_3 = arith.constant 0 : index
    %c0_4 = arith.constant 0 : index
    %c0_5 = arith.constant 0 : index
    %2 = vector.load %arg1[%c0_2, %c0_3, %c0_4, %c0_5] : memref<1x16x16x1xf32, #tpu.memory_space<vmem>>, vector<1x16x16x1xf32>
    %3 = vector.shape_cast %2 : vector<1x16x16x1xf32> to vector<16x16x1xf32>
    %c1 = arith.constant 1 : index
    %c1_6 = arith.constant 1 : index
    %c0_7 = arith.constant 0 : index
    %4 = vector.load %arg13[%c1, %c1_6, %c0_7] : memref<18x18x1xf32, #tpu.memory_space<vmem>>, vector<16x16x1xf32>
    tpu.vector_store %arg13[%c1, %c1_6, %c0_7], %3 {strides = array<i32>} : memref<18x18x1xf32, #tpu.memory_space<vmem>>, vector<16x16x1xf32>,
    %c0_8 = arith.constant 0 : index
    %c0_9 = arith.constant 0 : index
    %c0_10 = arith.constant 0 : index
    %5 = vector.load %arg13[%c0_8, %c0_9, %c0_10] : memref<18x18x1xf32, #tpu.memory_space<vmem>>, vector<16x16x1xf32>
    %c0_11 = arith.constant 0 : index
    %c1_12 = arith.constant 1 : index
    %c0_13 = arith.constant 0 : index
    %6 = vector.load %arg13[%c0_11, %c1_12, %c0_13] : memref<18x18x1xf32, #tpu.memory_space<vmem>>, vector<16x16x1xf32>
    %c0_14 = arith.constant 0 : index
    %c2 = arith.constant 2 : index
    %c0_15 = arith.constant 0 : index
    %7 = vector.load %arg13[%c0_14, %c2, %c0_15] : memref<18x18x1xf32, #tpu.memory_space<vmem>>, vector<16x16x1xf32>
    %c1_16 = arith.constant 1 : index
    %c0_17 = arith.constant 0 : index
    %c0_18 = arith.constant 0 : index
    %8 = vector.load %arg13[%c1_16, %c0_17, %c0_18] : memref<18x18x1xf32, #tpu.memory_space<vmem>>, vector<16x16x1xf32>
    %c1_19 = arith.constant 1 : index
    %c1_20 = arith.constant 1 : index
    %c0_21 = arith.constant 0 : index
    %9 = vector.load %arg13[%c1_19, %c1_20, %c0_21] : memref<18x18x1xf32, #tpu.memory_space<vmem>>, vector<16x16x1xf32>
    %c1_22 = arith.constant 1 : index
    %c2_23 = arith.constant 2 : index
    %c0_24 = arith.constant 0 : index
    %10 = vector.load %arg13[%c1_22, %c2_23, %c0_24] : memref<18x18x1xf32, #tpu.memory_space<vmem>>, vector<16x16x1xf32>
    %c2_25 = arith.constant 2 : index
    %c0_26 = arith.constant 0 : index
    %c0_27 = arith.constant 0 : index
    %11 = vector.load %arg13[%c2_25, %c0_26, %c0_27] : memref<18x18x1xf32, #tpu.memory_space<vmem>>, vector<16x16x1xf32>
    %c2_28 = arith.constant 2 : index
    %c1_29 = arith.constant 1 : index
    %c0_30 = arith.constant 0 : index
    %12 = vector.load %arg13[%c2_28, %c1_29, %c0_30] : memref<18x18x1xf32, #tpu.memory_space<vmem>>, vector<16x16x1xf32>
    %c2_31 = arith.constant 2 : index
    %c2_32 = arith.constant 2 : index
    %c0_33 = arith.constant 0 : index
    %13 = vector.load %arg13[%c2_31, %c2_32, %c0_33] : memref<18x18x1xf32, #tpu.memory_space<vmem>>, vector<16x16x1xf32>
    %14 = tpu.concatenate %5, %6, %7, %8, %9, %10, %11, %12, %13 in 2 : vector<16x16x1xf32>, vector<16x16x1xf32>, vector<16x16x1xf32>, vector<16x16x1xf32>, vector<16x16x1xf32>, vector<16x16x1xf32>, vector<16x16x1xf32>, vector<16x16x1xf32>, vector<16x16x1xf32> -> vector<16x16x9xf32>
    %15 = vector.shape_cast %14 : vector<16x16x9xf32> to vector<256x9xf32>
    %16 = arith.truncf %15 : vector<256x9xf32> to vector<256x9xbf16>
    %c0_34 = arith.constant 0 : index
    %c0_35 = arith.constant 0 : index
    %17 = vector.load %arg2[%c0_34, %c0_35] : memref<9x32xbf16, #tpu.memory_space<vmem>>, vector<9x32xbf16>
    %cst_36 = arith.constant dense<0.000000e+00> : vector<256x32xf32>
    %18 = tpu.matmul %16, %17, %cst_36 {dimension_numbers = #tpu.dot_dimension_numbers<[1], [0], [0], [1], [0, 0, 1, 1], [], []>} : vector<256x9xbf16>, vector<9x32xbf16>, vector<256x32xf32> -> vector<256x32xf32>
    %c0_37 = arith.constant 0 : index
    %c0_38 = arith.constant 0 : index
    %19 = vector.load %arg3[%c0_37, %c0_38] : memref<1x32xf32, #tpu.memory_space<vmem>>, vector<1x32xf32>
    %20 = vector.broadcast %19 : vector<1x32xf32> to vector<256x32xf32>
    %21 = arith.addf %18, %20 : vector<256x32xf32>
    %cst_39 = arith.constant 0.000000e+00 : f32
    %22 = vector.broadcast %cst_39 : f32 to vector<256x32xf32>
    %23 = arith.maximumf %21, %22 : vector<256x32xf32>
    %24 = vector.shape_cast %23 : vector<256x32xf32> to vector<8x2x16x32xf32>
    %25 = vector.extract_strided_slice %24 {offsets = [0, 0, 0, 0], sizes = [8, 1, 16, 32], strides = [1, 1, 1, 1]} : vector<8x2x16x32xf32> to vector<8x1x16x32xf32>
    %26 = vector.shape_cast %25 : vector<8x1x16x32xf32> to vector<8x16x32xf32>
    %27 = vector.extract_strided_slice %24 {offsets = [0, 1, 0, 0], sizes = [8, 1, 16, 32], strides = [1, 1, 1, 1]} : vector<8x2x16x32xf32> to vector<8x1x16x32xf32>
    %28 = vector.shape_cast %27 : vector<8x1x16x32xf32> to vector<8x16x32xf32>
    %29 = arith.maximumf %26, %28 : vector<8x16x32xf32>
    %c0_40 = arith.constant 0 : index
    %c0_41 = arith.constant 0 : index
    %c0_42 = arith.constant 0 : index
    %30 = vector.load %arg16[%c0_40, %c0_41, %c0_42] : memref<8x16x32xf32, #tpu.memory_space<vmem>>, vector<8x16x32xf32>
    tpu.vector_store %arg16[%c0_40, %c0_41, %c0_42], %29 {strides = array<i32>} : memref<8x16x32xf32, #tpu.memory_space<vmem>>, vector<8x16x32xf32>,
    %c0_43 = arith.constant 0 : index
    %c0_44 = arith.constant 0 : index
    %c0_45 = arith.constant 0 : index
    %31 = tpu.strided_load %arg16[%c0_43, %c0_44, %c0_45] {strides = array<i32: 1, 2, 1>} : memref<8x16x32xf32, #tpu.memory_space<vmem>>, vector<8x8x32xf32>
    %c0_46 = arith.constant 0 : index
    %c1_47 = arith.constant 1 : index
    %c0_48 = arith.constant 0 : index
    %32 = tpu.strided_load %arg16[%c0_46, %c1_47, %c0_48] {strides = array<i32: 1, 2, 1>} : memref<8x16x32xf32, #tpu.memory_space<vmem>>, vector<8x8x32xf32>
    %33 = arith.maximumf %31, %32 : vector<8x8x32xf32>
    %cst_49 = arith.constant 0.000000e+00 : f32
    %34 = vector.broadcast %cst_49 : f32 to vector<10x10x32xf32>
    %c0_50 = arith.constant 0 : index
    %c0_51 = arith.constant 0 : index
    %c0_52 = arith.constant 0 : index
    %35 = vector.load %arg14[%c0_50, %c0_51, %c0_52] : memref<10x10x32xf32, #tpu.memory_space<vmem>>, vector<10x10x32xf32>
    tpu.vector_store %arg14[%c0_50, %c0_51, %c0_52], %34 {strides = array<i32>} : memref<10x10x32xf32, #tpu.memory_space<vmem>>, vector<10x10x32xf32>,
    %c1_53 = arith.constant 1 : index
    %c1_54 = arith.constant 1 : index
    %c0_55 = arith.constant 0 : index
    %36 = vector.load %arg14[%c1_53, %c1_54, %c0_55] : memref<10x10x32xf32, #tpu.memory_space<vmem>>, vector<8x8x32xf32>
    tpu.vector_store %arg14[%c1_53, %c1_54, %c0_55], %33 {strides = array<i32>} : memref<10x10x32xf32, #tpu.memory_space<vmem>>, vector<8x8x32xf32>,
    %c0_56 = arith.constant 0 : index
    %c0_57 = arith.constant 0 : index
    %c0_58 = arith.constant 0 : index
    %37 = vector.load %arg14[%c0_56, %c0_57, %c0_58] : memref<10x10x32xf32, #tpu.memory_space<vmem>>, vector<8x8x32xf32>
    %c0_59 = arith.constant 0 : index
    %c1_60 = arith.constant 1 : index
    %c0_61 = arith.constant 0 : index
    %38 = vector.load %arg14[%c0_59, %c1_60, %c0_61] : memref<10x10x32xf32, #tpu.memory_space<vmem>>, vector<8x8x32xf32>
    %c0_62 = arith.constant 0 : index
    %c2_63 = arith.constant 2 : index
    %c0_64 = arith.constant 0 : index
    %39 = vector.load %arg14[%c0_62, %c2_63, %c0_64] : memref<10x10x32xf32, #tpu.memory_space<vmem>>, vector<8x8x32xf32>
    %c1_65 = arith.constant 1 : index
    %c0_66 = arith.constant 0 : index
    %c0_67 = arith.constant 0 : index
    %40 = vector.load %arg14[%c1_65, %c0_66, %c0_67] : memref<10x10x32xf32, #tpu.memory_space<vmem>>, vector<8x8x32xf32>
    %c1_68 = arith.constant 1 : index
    %c1_69 = arith.constant 1 : index
    %c0_70 = arith.constant 0 : index
    %41 = vector.load %arg14[%c1_68, %c1_69, %c0_70] : memref<10x10x32xf32, #tpu.memory_space<vmem>>, vector<8x8x32xf32>
    %c1_71 = arith.constant 1 : index
    %c2_72 = arith.constant 2 : index
    %c0_73 = arith.constant 0 : index
    %42 = vector.load %arg14[%c1_71, %c2_72, %c0_73] : memref<10x10x32xf32, #tpu.memory_space<vmem>>, vector<8x8x32xf32>
    %c2_74 = arith.constant 2 : index
    %c0_75 = arith.constant 0 : index
    %c0_76 = arith.constant 0 : index
    %43 = vector.load %arg14[%c2_74, %c0_75, %c0_76] : memref<10x10x32xf32, #tpu.memory_space<vmem>>, vector<8x8x32xf32>
    %c2_77 = arith.constant 2 : index
    %c1_78 = arith.constant 1 : index
    %c0_79 = arith.constant 0 : index
    %44 = vector.load %arg14[%c2_77, %c1_78, %c0_79] : memref<10x10x32xf32, #tpu.memory_space<vmem>>, vector<8x8x32xf32>
    %c2_80 = arith.constant 2 : index
    %c2_81 = arith.constant 2 : index
    %c0_82 = arith.constant 0 : index
    %45 = vector.load %arg14[%c2_80, %c2_81, %c0_82] : memref<10x10x32xf32, #tpu.memory_space<vmem>>, vector<8x8x32xf32>
    %46 = tpu.concatenate %37, %38, %39, %40, %41, %42, %43, %44, %45 in 2 : vector<8x8x32xf32>, vector<8x8x32xf32>, vector<8x8x32xf32>, vector<8x8x32xf32>, vector<8x8x32xf32>, vector<8x8x32xf32>, vector<8x8x32xf32>, vector<8x8x32xf32>, vector<8x8x32xf32> -> vector<8x8x288xf32>
    %47 = vector.shape_cast %46 : vector<8x8x288xf32> to vector<64x288xf32>
    %48 = arith.truncf %47 : vector<64x288xf32> to vector<64x288xbf16>
    %c0_83 = arith.constant 0 : index
    %c0_84 = arith.constant 0 : index
    %49 = vector.load %arg4[%c0_83, %c0_84] : memref<288x64xbf16, #tpu.memory_space<vmem>>, vector<288x64xbf16>
    %cst_85 = arith.constant dense<0.000000e+00> : vector<64x64xf32>
    %50 = tpu.matmul %48, %49, %cst_85 {dimension_numbers = #tpu.dot_dimension_numbers<[1], [0], [0], [1], [0, 0, 1, 1], [], []>} : vector<64x288xbf16>, vector<288x64xbf16>, vector<64x64xf32> -> vector<64x64xf32>
    %c0_86 = arith.constant 0 : index
    %c0_87 = arith.constant 0 : index
    %51 = vector.load %arg5[%c0_86, %c0_87] : memref<1x64xf32, #tpu.memory_space<vmem>>, vector<1x64xf32>
    %52 = vector.broadcast %51 : vector<1x64xf32> to vector<64x64xf32>
    %53 = arith.addf %50, %52 : vector<64x64xf32>
    %cst_88 = arith.constant 0.000000e+00 : f32
    %54 = vector.broadcast %cst_88 : f32 to vector<64x64xf32>
    %55 = arith.maximumf %53, %54 : vector<64x64xf32>
    %c4096_i32 = arith.constant 4096 : i32
    %56 = arith.muli %arg0, %c4096_i32 : i32
    %c1964635914_i32 = arith.constant 1964635914 : i32
    %57 = arith.addi %56, %c1964635914_i32 : i32
    %58 = tpu.iota {dimensions = array<i32: 0>} : vector<64x64xi32>
    %59 = tpu.iota {dimensions = array<i32: 1>} : vector<64x64xi32>
    %c64_i32 = arith.constant 64 : i32
    %60 = vector.broadcast %c64_i32 : i32 to vector<64x64xi32>
    %61 = arith.muli %58, %60 : vector<64x64xi32>
    %62 = arith.addi %61, %59 : vector<64x64xi32>
    %63 = vector.broadcast %57 : i32 to vector<64x64xi32>
    %64 = arith.addi %62, %63 : vector<64x64xi32>
    %c16_i32 = arith.constant 16 : i32
    %65 = vector.broadcast %c16_i32 : i32 to vector<64x64xi32>
    %66 = arith.shrui %64, %65 : vector<64x64xi32>
    %67 = arith.xori %64, %66 : vector<64x64xi32>
    %c2146121005_i32 = arith.constant 2146121005 : i32
    %68 = vector.broadcast %c2146121005_i32 : i32 to vector<64x64xi32>
    %69 = arith.muli %67, %68 : vector<64x64xi32>
    %c15_i32 = arith.constant 15 : i32
    %70 = vector.broadcast %c15_i32 : i32 to vector<64x64xi32>
    %71 = arith.shrui %69, %70 : vector<64x64xi32>
    %72 = arith.xori %69, %71 : vector<64x64xi32>
    %c-2073254261_i32 = arith.constant -2073254261 : i32
    %73 = vector.broadcast %c-2073254261_i32 : i32 to vector<64x64xi32>
    %74 = arith.muli %72, %73 : vector<64x64xi32>
    %c16_i32_89 = arith.constant 16 : i32
    %75 = vector.broadcast %c16_i32_89 : i32 to vector<64x64xi32>
    %76 = arith.shrui %74, %75 : vector<64x64xi32>
    %77 = arith.xori %74, %76 : vector<64x64xi32>
    %c8_i32 = arith.constant 8 : i32
    %78 = vector.broadcast %c8_i32 : i32 to vector<64x64xi32>
    %79 = arith.shrui %77, %78 : vector<64x64xi32>
    %c8388608_i32 = arith.constant 8388608 : i32
    %80 = vector.broadcast %c8388608_i32 : i32 to vector<64x64xi32>
    %81 = arith.cmpi sge, %79, %80 : vector<64x64xi32>
    %cst_90 = arith.constant 2.000000e+00 : f32
    %82 = vector.broadcast %cst_90 : f32 to vector<64x64xf32>
    %83 = arith.mulf %55, %82 : vector<64x64xf32>
    %cst_91 = arith.constant 0.000000e+00 : f32
    %84 = vector.broadcast %cst_91 : f32 to vector<64x64xf32>
    %85 = arith.select %81, %83, %84 : vector<64x64xi1>, vector<64x64xf32>
    %86 = vector.shape_cast %85 : vector<64x64xf32> to vector<4x2x8x64xf32>
    %87 = vector.extract_strided_slice %86 {offsets = [0, 0, 0, 0], sizes = [4, 1, 8, 64], strides = [1, 1, 1, 1]} : vector<4x2x8x64xf32> to vector<4x1x8x64xf32>
    %88 = vector.shape_cast %87 : vector<4x1x8x64xf32> to vector<4x8x64xf32>
    %89 = vector.extract_strided_slice %86 {offsets = [0, 1, 0, 0], sizes = [4, 1, 8, 64], strides = [1, 1, 1, 1]} : vector<4x2x8x64xf32> to vector<4x1x8x64xf32>
    %90 = vector.shape_cast %89 : vector<4x1x8x64xf32> to vector<4x8x64xf32>
    %91 = arith.maximumf %88, %90 : vector<4x8x64xf32>
    %c0_92 = arith.constant 0 : index
    %c0_93 = arith.constant 0 : index
    %c0_94 = arith.constant 0 : index
    %92 = vector.load %arg17[%c0_92, %c0_93, %c0_94] : memref<4x8x64xf32, #tpu.memory_space<vmem>>, vector<4x8x64xf32>
    tpu.vector_store %arg17[%c0_92, %c0_93, %c0_94], %91 {strides = array<i32>} : memref<4x8x64xf32, #tpu.memory_space<vmem>>, vector<4x8x64xf32>,
    %c0_95 = arith.constant 0 : index
    %c0_96 = arith.constant 0 : index
    %c0_97 = arith.constant 0 : index
    %93 = tpu.strided_load %arg17[%c0_95, %c0_96, %c0_97] {strides = array<i32: 1, 2, 1>} : memref<4x8x64xf32, #tpu.memory_space<vmem>>, vector<4x4x64xf32>
    %c0_98 = arith.constant 0 : index
    %c1_99 = arith.constant 1 : index
    %c0_100 = arith.constant 0 : index
    %94 = tpu.strided_load %arg17[%c0_98, %c1_99, %c0_100] {strides = array<i32: 1, 2, 1>} : memref<4x8x64xf32, #tpu.memory_space<vmem>>, vector<4x4x64xf32>
    %95 = arith.maximumf %93, %94 : vector<4x4x64xf32>
    %cst_101 = arith.constant 0.000000e+00 : f32
    %96 = vector.broadcast %cst_101 : f32 to vector<6x6x64xf32>
    %c0_102 = arith.constant 0 : index
    %c0_103 = arith.constant 0 : index
    %c0_104 = arith.constant 0 : index
    %97 = vector.load %arg15[%c0_102, %c0_103, %c0_104] : memref<6x6x64xf32, #tpu.memory_space<vmem>>, vector<6x6x64xf32>
    tpu.vector_store %arg15[%c0_102, %c0_103, %c0_104], %96 {strides = array<i32>} : memref<6x6x64xf32, #tpu.memory_space<vmem>>, vector<6x6x64xf32>,
    %c1_105 = arith.constant 1 : index
    %c1_106 = arith.constant 1 : index
    %c0_107 = arith.constant 0 : index
    %98 = vector.load %arg15[%c1_105, %c1_106, %c0_107] : memref<6x6x64xf32, #tpu.memory_space<vmem>>, vector<4x4x64xf32>
    tpu.vector_store %arg15[%c1_105, %c1_106, %c0_107], %95 {strides = array<i32>} : memref<6x6x64xf32, #tpu.memory_space<vmem>>, vector<4x4x64xf32>,
    %c0_108 = arith.constant 0 : index
    %c0_109 = arith.constant 0 : index
    %c0_110 = arith.constant 0 : index
    %99 = vector.load %arg15[%c0_108, %c0_109, %c0_110] : memref<6x6x64xf32, #tpu.memory_space<vmem>>, vector<4x4x64xf32>
    %c0_111 = arith.constant 0 : index
    %c1_112 = arith.constant 1 : index
    %c0_113 = arith.constant 0 : index
    %100 = vector.load %arg15[%c0_111, %c1_112, %c0_113] : memref<6x6x64xf32, #tpu.memory_space<vmem>>, vector<4x4x64xf32>
    %c0_114 = arith.constant 0 : index
    %c2_115 = arith.constant 2 : index
    %c0_116 = arith.constant 0 : index
    %101 = vector.load %arg15[%c0_114, %c2_115, %c0_116] : memref<6x6x64xf32, #tpu.memory_space<vmem>>, vector<4x4x64xf32>
    %c1_117 = arith.constant 1 : index
    %c0_118 = arith.constant 0 : index
    %c0_119 = arith.constant 0 : index
    %102 = vector.load %arg15[%c1_117, %c0_118, %c0_119] : memref<6x6x64xf32, #tpu.memory_space<vmem>>, vector<4x4x64xf32>
    %c1_120 = arith.constant 1 : index
    %c1_121 = arith.constant 1 : index
    %c0_122 = arith.constant 0 : index
    %103 = vector.load %arg15[%c1_120, %c1_121, %c0_122] : memref<6x6x64xf32, #tpu.memory_space<vmem>>, vector<4x4x64xf32>
    %c1_123 = arith.constant 1 : index
    %c2_124 = arith.constant 2 : index
    %c0_125 = arith.constant 0 : index
    %104 = vector.load %arg15[%c1_123, %c2_124, %c0_125] : memref<6x6x64xf32, #tpu.memory_space<vmem>>, vector<4x4x64xf32>
    %c2_126 = arith.constant 2 : index
    %c0_127 = arith.constant 0 : index
    %c0_128 = arith.constant 0 : index
    %105 = vector.load %arg15[%c2_126, %c0_127, %c0_128] : memref<6x6x64xf32, #tpu.memory_space<vmem>>, vector<4x4x64xf32>
    %c2_129 = arith.constant 2 : index
    %c1_130 = arith.constant 1 : index
    %c0_131 = arith.constant 0 : index
    %106 = vector.load %arg15[%c2_129, %c1_130, %c0_131] : memref<6x6x64xf32, #tpu.memory_space<vmem>>, vector<4x4x64xf32>
    %c2_132 = arith.constant 2 : index
    %c2_133 = arith.constant 2 : index
    %c0_134 = arith.constant 0 : index
    %107 = vector.load %arg15[%c2_132, %c2_133, %c0_134] : memref<6x6x64xf32, #tpu.memory_space<vmem>>, vector<4x4x64xf32>
    %108 = tpu.concatenate %99, %100, %101, %102, %103, %104, %105, %106, %107 in 2 : vector<4x4x64xf32>, vector<4x4x64xf32>, vector<4x4x64xf32>, vector<4x4x64xf32>, vector<4x4x64xf32>, vector<4x4x64xf32>, vector<4x4x64xf32>, vector<4x4x64xf32>, vector<4x4x64xf32> -> vector<4x4x576xf32>
    %109 = vector.shape_cast %108 : vector<4x4x576xf32> to vector<16x576xf32>
    %110 = arith.truncf %109 : vector<16x576xf32> to vector<16x576xbf16>
    %c0_135 = arith.constant 0 : index
    %c0_136 = arith.constant 0 : index
    %111 = vector.load %arg6[%c0_135, %c0_136] : memref<576x128xbf16, #tpu.memory_space<vmem>>, vector<576x128xbf16>
    %cst_137 = arith.constant dense<0.000000e+00> : vector<16x128xf32>
    %112 = tpu.matmul %110, %111, %cst_137 {dimension_numbers = #tpu.dot_dimension_numbers<[1], [0], [0], [1], [0, 0, 1, 1], [], []>} : vector<16x576xbf16>, vector<576x128xbf16>, vector<16x128xf32> -> vector<16x128xf32>
    %c0_138 = arith.constant 0 : index
    %c0_139 = arith.constant 0 : index
    %113 = vector.load %arg7[%c0_138, %c0_139] : memref<1x128xf32, #tpu.memory_space<vmem>>, vector<1x128xf32>
    %114 = vector.broadcast %113 : vector<1x128xf32> to vector<16x128xf32>
    %115 = arith.addf %112, %114 : vector<16x128xf32>
    %cst_140 = arith.constant 0.000000e+00 : f32
    %116 = vector.broadcast %cst_140 : f32 to vector<16x128xf32>
    %117 = arith.maximumf %115, %116 : vector<16x128xf32>
    %118 = vector.shape_cast %117 : vector<16x128xf32> to vector<2x2x4x128xf32>
    %119 = vector.extract_strided_slice %118 {offsets = [0, 0, 0, 0], sizes = [2, 1, 4, 128], strides = [1, 1, 1, 1]} : vector<2x2x4x128xf32> to vector<2x1x4x128xf32>
    %120 = vector.shape_cast %119 : vector<2x1x4x128xf32> to vector<2x4x128xf32>
    %121 = vector.extract_strided_slice %118 {offsets = [0, 1, 0, 0], sizes = [2, 1, 4, 128], strides = [1, 1, 1, 1]} : vector<2x2x4x128xf32> to vector<2x1x4x128xf32>
    %122 = vector.shape_cast %121 : vector<2x1x4x128xf32> to vector<2x4x128xf32>
    %123 = arith.maximumf %120, %122 : vector<2x4x128xf32>
    %c0_141 = arith.constant 0 : index
    %c0_142 = arith.constant 0 : index
    %c0_143 = arith.constant 0 : index
    %124 = vector.load %arg18[%c0_141, %c0_142, %c0_143] : memref<2x4x128xf32, #tpu.memory_space<vmem>>, vector<2x4x128xf32>
    tpu.vector_store %arg18[%c0_141, %c0_142, %c0_143], %123 {strides = array<i32>} : memref<2x4x128xf32, #tpu.memory_space<vmem>>, vector<2x4x128xf32>,
    %c0_144 = arith.constant 0 : index
    %c0_145 = arith.constant 0 : index
    %c0_146 = arith.constant 0 : index
    %125 = tpu.strided_load %arg18[%c0_144, %c0_145, %c0_146] {strides = array<i32: 1, 2, 1>} : memref<2x4x128xf32, #tpu.memory_space<vmem>>, vector<2x2x128xf32>
    %c0_147 = arith.constant 0 : index
    %c1_148 = arith.constant 1 : index
    %c0_149 = arith.constant 0 : index
    %126 = tpu.strided_load %arg18[%c0_147, %c1_148, %c0_149] {strides = array<i32: 1, 2, 1>} : memref<2x4x128xf32, #tpu.memory_space<vmem>>, vector<2x2x128xf32>
    %127 = arith.maximumf %125, %126 : vector<2x2x128xf32>
    %128 = vector.shape_cast %127 : vector<2x2x128xf32> to vector<4x128xf32>
    %129 = arith.truncf %128 : vector<4x128xf32> to vector<4x128xbf16>
    %cst_150 = arith.constant 0.000000e+00 : f32
    %130 = vector.broadcast %cst_150 : f32 to vector<1x512xf32>
    %131 = vector.extract_strided_slice %129 {offsets = [0, 0], sizes = [1, 128], strides = [1, 1]} : vector<4x128xbf16> to vector<1x128xbf16>
    %c0_151 = arith.constant 0 : index
    %c0_152 = arith.constant 0 : index
    %c0_153 = arith.constant 0 : index
    %132 = vector.load %arg8[%c0_151, %c0_152, %c0_153] : memref<4x128x512xbf16, #tpu.memory_space<vmem>>, vector<1x128x512xbf16>
    %133 = vector.shape_cast %132 : vector<1x128x512xbf16> to vector<128x512xbf16>
    %cst_154 = arith.constant dense<0.000000e+00> : vector<1x512xf32>
    %134 = tpu.matmul %131, %133, %cst_154 {dimension_numbers = #tpu.dot_dimension_numbers<[1], [0], [0], [1], [0, 0, 1, 1], [], []>} : vector<1x128xbf16>, vector<128x512xbf16>, vector<1x512xf32> -> vector<1x512xf32>
    %135 = arith.addf %130, %134 : vector<1x512xf32>
    %136 = vector.extract_strided_slice %129 {offsets = [1, 0], sizes = [1, 128], strides = [1, 1]} : vector<4x128xbf16> to vector<1x128xbf16>
    %c1_155 = arith.constant 1 : index
    %c0_156 = arith.constant 0 : index
    %c0_157 = arith.constant 0 : index
    %137 = vector.load %arg8[%c1_155, %c0_156, %c0_157] : memref<4x128x512xbf16, #tpu.memory_space<vmem>>, vector<1x128x512xbf16>
    %138 = vector.shape_cast %137 : vector<1x128x512xbf16> to vector<128x512xbf16>
    %cst_158 = arith.constant dense<0.000000e+00> : vector<1x512xf32>
    %139 = tpu.matmul %136, %138, %cst_158 {dimension_numbers = #tpu.dot_dimension_numbers<[1], [0], [0], [1], [0, 0, 1, 1], [], []>} : vector<1x128xbf16>, vector<128x512xbf16>, vector<1x512xf32> -> vector<1x512xf32>
    %140 = arith.addf %135, %139 : vector<1x512xf32>
    %141 = vector.extract_strided_slice %129 {offsets = [2, 0], sizes = [1, 128], strides = [1, 1]} : vector<4x128xbf16> to vector<1x128xbf16>
    %c2_159 = arith.constant 2 : index
    %c0_160 = arith.constant 0 : index
    %c0_161 = arith.constant 0 : index
    %142 = vector.load %arg8[%c2_159, %c0_160, %c0_161] : memref<4x128x512xbf16, #tpu.memory_space<vmem>>, vector<1x128x512xbf16>
    %143 = vector.shape_cast %142 : vector<1x128x512xbf16> to vector<128x512xbf16>
    %cst_162 = arith.constant dense<0.000000e+00> : vector<1x512xf32>
    %144 = tpu.matmul %141, %143, %cst_162 {dimension_numbers = #tpu.dot_dimension_numbers<[1], [0], [0], [1], [0, 0, 1, 1], [], []>} : vector<1x128xbf16>, vector<128x512xbf16>, vector<1x512xf32> -> vector<1x512xf32>
    %145 = arith.addf %140, %144 : vector<1x512xf32>
    %146 = vector.extract_strided_slice %129 {offsets = [3, 0], sizes = [1, 128], strides = [1, 1]} : vector<4x128xbf16> to vector<1x128xbf16>
    %c3 = arith.constant 3 : index
    %c0_163 = arith.constant 0 : index
    %c0_164 = arith.constant 0 : index
    %147 = vector.load %arg8[%c3, %c0_163, %c0_164] : memref<4x128x512xbf16, #tpu.memory_space<vmem>>, vector<1x128x512xbf16>
    %148 = vector.shape_cast %147 : vector<1x128x512xbf16> to vector<128x512xbf16>
    %cst_165 = arith.constant dense<0.000000e+00> : vector<1x512xf32>
    %149 = tpu.matmul %146, %148, %cst_165 {dimension_numbers = #tpu.dot_dimension_numbers<[1], [0], [0], [1], [0, 0, 1, 1], [], []>} : vector<1x128xbf16>, vector<128x512xbf16>, vector<1x512xf32> -> vector<1x512xf32>
    %150 = arith.addf %145, %149 : vector<1x512xf32>
    %c0_166 = arith.constant 0 : index
    %c0_167 = arith.constant 0 : index
    %151 = vector.load %arg9[%c0_166, %c0_167] : memref<1x512xf32, #tpu.memory_space<vmem>>, vector<1x512xf32>
    %152 = arith.addf %150, %151 : vector<1x512xf32>
    %cst_168 = arith.constant 0.000000e+00 : f32
    %153 = vector.broadcast %cst_168 : f32 to vector<1x512xf32>
    %154 = arith.maximumf %152, %153 : vector<1x512xf32>
    %155 = arith.truncf %154 : vector<1x512xf32> to vector<1x512xbf16>
    %c0_169 = arith.constant 0 : index
    %c0_170 = arith.constant 0 : index
    %156 = vector.load %arg10[%c0_169, %c0_170] : memref<512x128xbf16, #tpu.memory_space<vmem>>, vector<512x128xbf16>
    %cst_171 = arith.constant dense<0.000000e+00> : vector<1x128xf32>
    %157 = tpu.matmul %155, %156, %cst_171 {dimension_numbers = #tpu.dot_dimension_numbers<[1], [0], [0], [1], [0, 0, 1, 1], [], []>} : vector<1x512xbf16>, vector<512x128xbf16>, vector<1x128xf32> -> vector<1x128xf32>
    %c0_172 = arith.constant 0 : index
    %c0_173 = arith.constant 0 : index
    %158 = vector.load %arg11[%c0_172, %c0_173] : memref<1x128xf32, #tpu.memory_space<vmem>>, vector<1x128xf32>
    %159 = arith.addf %157, %158 : vector<1x128xf32>
    %c0_174 = arith.constant 0 : index
    %c0_175 = arith.constant 0 : index
    %c0_176 = arith.constant 0 : index
    %160 = vector.load %arg12[%c0_174, %c0_175, %c0_176] : memref<1x1x128xf32, #tpu.memory_space<vmem>>, vector<1x1x128xf32>
    %161 = vector.shape_cast %160 : vector<1x1x128xf32> to vector<1x128xf32>
    %162 = vector.shape_cast %159 : vector<1x128xf32> to vector<1x1x128xf32>
    tpu.vector_store %arg12[%c0_174, %c0_175, %c0_176], %162 {strides = array<i32>} : memref<1x1x128xf32, #tpu.memory_space<vmem>>, vector<1x1x128xf32>,
    return
  }
  func.func @transform_0(%arg0: i32) -> (i32, i32, i32, i32) {
    %c0_i32 = arith.constant 0 : i32
    %c0_i32_0 = arith.constant 0 : i32
    %c0_i32_1 = arith.constant 0 : i32
    %c0_i32_2 = arith.constant 0 : i32
    return %arg0, %c0_i32, %c0_i32_0, %c0_i32_1 : i32, i32, i32, i32
  }
  func.func @transform_1(%arg0: i32) -> (i32, i32) {
    %c0_i32 = arith.constant 0 : i32
    %c0_i32_0 = arith.constant 0 : i32
    %c0_i32_1 = arith.constant 0 : i32
    return %c0_i32, %c0_i32_0 : i32, i32
  }
  func.func @transform_2(%arg0: i32) -> (i32, i32) {
    %c0_i32 = arith.constant 0 : i32
    %c0_i32_0 = arith.constant 0 : i32
    %c0_i32_1 = arith.constant 0 : i32
    return %c0_i32, %c0_i32_0 : i32, i32
  }
  func.func @transform_3(%arg0: i32) -> (i32, i32) {
    %c0_i32 = arith.constant 0 : i32
    %c0_i32_0 = arith.constant 0 : i32
    %c0_i32_1 = arith.constant 0 : i32
    return %c0_i32, %c0_i32_0 : i32, i32
  }
  func.func @transform_4(%arg0: i32) -> (i32, i32) {
    %c0_i32 = arith.constant 0 : i32
    %c0_i32_0 = arith.constant 0 : i32
    %c0_i32_1 = arith.constant 0 : i32
    return %c0_i32, %c0_i32_0 : i32, i32
  }
  func.func @transform_5(%arg0: i32) -> (i32, i32) {
    %c0_i32 = arith.constant 0 : i32
    %c0_i32_0 = arith.constant 0 : i32
    %c0_i32_1 = arith.constant 0 : i32
    return %c0_i32, %c0_i32_0 : i32, i32
  }
  func.func @transform_6(%arg0: i32) -> (i32, i32) {
    %c0_i32 = arith.constant 0 : i32
    %c0_i32_0 = arith.constant 0 : i32
    %c0_i32_1 = arith.constant 0 : i32
    return %c0_i32, %c0_i32_0 : i32, i32
  }
  func.func @transform_7(%arg0: i32) -> (i32, i32, i32) {
    %c0_i32 = arith.constant 0 : i32
    %c0_i32_0 = arith.constant 0 : i32
    %c0_i32_1 = arith.constant 0 : i32
    %c0_i32_2 = arith.constant 0 : i32
    return %c0_i32, %c0_i32_0, %c0_i32_1 : i32, i32, i32
  }
  func.func @transform_8(%arg0: i32) -> (i32, i32) {
    %c0_i32 = arith.constant 0 : i32
    %c0_i32_0 = arith.constant 0 : i32
    %c0_i32_1 = arith.constant 0 : i32
    return %c0_i32, %c0_i32_0 : i32, i32
  }
  func.func @transform_9(%arg0: i32) -> (i32, i32) {
    %c0_i32 = arith.constant 0 : i32
    %c0_i32_0 = arith.constant 0 : i32
    %c0_i32_1 = arith.constant 0 : i32
    return %c0_i32, %c0_i32_0 : i32, i32
  }
  func.func @transform_10(%arg0: i32) -> (i32, i32) {
    %c0_i32 = arith.constant 0 : i32
    %c0_i32_0 = arith.constant 0 : i32
    %c0_i32_1 = arith.constant 0 : i32
    return %c0_i32, %c0_i32_0 : i32, i32
  }
  func.func @transform_11(%arg0: i32) -> (i32, i32, i32) {
    %c0_i32 = arith.constant 0 : i32
    %c0_i32_0 = arith.constant 0 : i32
    %c0_i32_1 = arith.constant 0 : i32
    return %arg0, %c0_i32, %c0_i32_0 : i32, i32, i32
  }
}

</mosaic_0001>

<bundles_post_ra>
// kernel: dropout_cnn_forward.1
= control target key start
LH: loop header
LB: loop body
LE: loop exit
PB: predicated region body
PF: predicated region fallthrough
CT: control target
= control target key end

     0   :  { %s8960_s0 = inlined_call_operand.vmem [shape: f32[2,16,16,1], index: 0, kind: input, shape index: {}]   ;;  %s8961_s1 = inlined_call_operand.vmem [shape: bf16[9,32], index: 1, kind: input, shape index: {}]   ;;  %s8962_s2 = inlined_call_operand.vmem [shape: f32[1,32], index: 2, kind: input, shape index: {}]   ;;  %s8963_s3 = inlined_call_operand.vmem [shape: bf16[288,64], index: 3, kind: input, shape index: {}]   ;;  %s8964_s4 = inlined_call_operand.vmem [shape: f32[1,64], index: 4, kind: input, shape index: {}]   ;;  %s8965_s5 = inlined_call_operand.vmem [shape: bf16[576,128], index: 5, kind: input, shape index: {}]   ;;  %s8966_s6 = inlined_call_operand.vmem [shape: f32[1,128], index: 6, kind: input, shape index: {}]   ;;  %s8967_s7 = inlined_call_operand.hbm [shape: bf16[4,128,512], index: 7, kind: input, shape index: {}]   ;;  %s8968_s8 = inlined_call_operand.vmem [shape: f32[1,512], index: 8, kind: input, shape index: {}]   ;;  %s8969_s9 = inlined_call_operand.vmem [shape: bf16[512,128], index: 9, kind: input, shape index: {}]   ;;  %s8970_s10 = inlined_call_operand.vmem [shape: f32[1,128], index: 10, kind: input, shape index: {}]   ;;  %s8971_s11 = inlined_call_operand.hbm [shape: f32[2,1,128], index: 11, kind: output, shape index: {}]  }
   0x1   :  { %8976 = sst [smem:[#allocation14_spill]] %s8960_s0 }
   0x2   :  { %8977 = sst [smem:[#allocation15_spill]] %s8961_s1 }
   0x3   :  { %16 = vsyncpa [#allocation9], 0 }
   0x4   :  { %17 = vsyncpa [#allocation10], 0 }
   0x5   :  { %19 = vsyncpa [#allocation10 + $0x1], 0  ;;  %s7241_s17 = smov 0   ;;  %s7243_s18 = smov 0  }
   0x6   :  { %s7245_s19 = smov 0   ;;  %s7247_s20 = smov 0  }
   0x7 LB: > { %s7262_s21 = sadd.s32 4294967295, %s7159_s20   ;;  %s5472_s22 = sadd.s32 4294967294, %s7159_s20   ;;  %s7159_s20 = sphi %s7247_s20, %s9001_s20   ;;  %s7155_s19 = sphi %s7245_s19, %s9000_s19   ;;  %s7151_s18 = sphi %s7243_s18, %s8999_s18   ;;  %s7147_s17 = sphi %s7241_s17, %s8998_s17  }
   0x8   : > { %s7266_s23 = sadd.s32 1, %s7159_s20   ;;  %s268_s24 = sadd.s32 1, %s7155_s19 }
   0x9   : > { %s265_s25 = ssub.s32 %s7159_s20, %s7266_s23  ;;  %p278_p0 = scmp.ne.s32.totalorder %s7155_s19, %s7151_s18 }
   0xa   : > { %p266_p1 = scmp.eq.s32.totalorder %s265_s25, 0  ;;  %p279_p2 = scmp.eq.s32.totalorder %s7262_s21, 1 }
   0xb   : > { %p284_p3 = scmp.ne.s32.totalorder %s7151_s18, %s7147_s17  ;;  %p285_p4 = scmp.eq.s32.totalorder %s5472_s22, 1 }
   0xc   : > { %s7277_s26 = scalar_select %p266_p1, %s7155_s19, %s268_s24  }
   0xd   : > { %p7279_p5 = por %p279_p2, %p278_p0  ;;  %p7283_p6 = por %p285_p4, %p284_p3 }
   0xe   : > { %p5473_p7 = scmp.ge.s32.totalorder %s7159_s20, 1  ;;  %p292_p8 = scmp.lt.s32.totalorder %s7159_s20, 3 }
   0xf   : > { %s8979_s28 = scalar_select %p7283_p6, 1, 0 }
  0x10   : > { %p5960_p9 = scmp.eq.s32.totalorder %s7262_s21, 0  ;;  %p7290_p10 = pnand %p5473_p7, %p292_p8 }
  0x11   : > { %s7161_s30 = smov [#allocation8]  }
  0x12   : > { %s322_s12 = sshll.u32 %s7161_s30, 4  ;;  %p5952_p11 = pneg %p7290_p10  ;;  %s323_s12 = int_to_ptr.vmem [resolvable:$true] %s322_s12 }
  0x13   : > { %s7080_s13 = scalar_lea.vmem %s323_s12, 16384  ;;  %p7088_p3 = scmp.lt.s32.totalorder %s323_s12, %s323_s12 }
  0x14   : > { %p5953_p12 = pnand %p5960_p9, %p5952_p11  ;;  %p7081_p0 = scmp.ne.s32.totalorder %s323_s12, %s7080_s13 }
  0x15   : > { %p7089_p4 = scmp.lt.s32.totalorder %s7080_s13, %s7080_s13 }
  0x16   : > { %p7071_p13 = pneg %p5953_p12 }
  0x17   : > { %p7090_p6 = por %p7089_p4, %p7088_p3 }
  0x18   : > { %p7083_p1 = pnand %p7081_p0, %p7071_p13 }
  0x1a   : > { %p7084_p2 = pneg %p7083_p1 }
  0x1c   : > { %p7091_p7 = pnand %p7090_p6, %p7084_p2 }
  0x1e   : > { %7094 = shalt.err (!%p7091_p7)
}
  0x1f   : > { %s7162_s14 = smov 256   ;;  %s7163_s15 = smov 16  }
  0x20   : > { %5955 = dma.hbm_to_vmem [thread:$0]  (!%p5953_p12), %s8967_s7, 16384, %s323_s12, [#allocation9], %s7162_s14, %s7162_s14, %s7163_s15  }
  0x21   : > { %355 = sbr.rel (%p7290_p10) target bundleno = 1925 (0x785), region = 64 }
  0x26   : > { %7138 = dma.done.wait (%p5960_p9), [#allocation9], 16384  }
  0x27   : > { %7140 = vsyncadd (%p5960_p9), [#allocation9], 4294950912  ;;  %vm400_vm0 = vcmask 7168   ;;  %vm403_vm1 = vcmask 1024   ;;  %v7164_v0 = vmov 0.0   ;;  %p394_p6 = scmp.lt.s32.totalorder %s7262_s21, 1 }
  0x28   : > { %401 = vst.msk [vmem:[#allocation2] sm:$0xff] %vm400_vm0, %v7164_v0  ;;  %402 = vst.msk [vmem:[#allocation2 + $0x8] sm:$0xff] %vm400_vm0, %v7164_v0  ;;  %s8981_s0 = sld [smem:[#allocation14_spill]]  ;;  %s7165_s13 = smov 2   ;;  %vm2176_vm2 = vcmask 1043456   ;;  %vm2177_vm3 = vcmask 1044480  }
  0x29   : > { %404 = vst.msk [vmem:[#allocation2 + $0x10] sm:$0x3] %vm403_vm1, %v7164_v0  ;;  %407 = vst.msk [vmem:[#allocation2 + $0x28] sm:$0x3] %vm403_vm1, %v7164_v0  ;;  %s395_s24 = scalar_select %p394_p6, %s7262_s21, 1  ;;  %v7170_v48 = vmov 65535  }
  0x2a   : > { %405 = vst.msk [vmem:[#allocation2 + $0x18] sm:$0xff] %vm400_vm0, %v7164_v0  ;;  %406 = vst.msk [vmem:[#allocation2 + $0x20] sm:$0xff] %vm400_vm0, %v7164_v0  ;;  %s7166_s14 = smov 1   ;;  %s7167_s15 = smov 3   ;;  %v2178_v49 = vsel %vm2176_vm2, 4294967295, %v7170_v48  ;;  %vm1866_vm4 = vcmask 15360  }
  0x2b   : > { %408 = vst.msk [vmem:[#allocation2 + $0x30] sm:$0xff] %vm400_vm0, %v7164_v0  ;;  %409 = vst.msk [vmem:[#allocation2 + $0x38] sm:$0xff] %vm400_vm0, %v7164_v0  ;;  %s5731_s25 = sshll.u32 %s395_s24, 8  ;;  %s7168_s16 = smov 4   ;;  %v2179_v52 = vsel %vm2177_vm3, %v2178_v49, 0  ;;  %vm1899_vm5 = vcmask 23552  }
  0x2c   : > { %410 = vst.msk [vmem:[#allocation2 + $0x40] sm:$0x3] %vm403_vm1, %v7164_v0  ;;  %413 = vst.msk [vmem:[#allocation2 + $0x58] sm:$0x3] %vm403_vm1, %v7164_v0  ;;  %s7169_s22 = smov 5   ;;  %s7171_s24 = smov 6  }
  0x2d   : > { %411 = vst.msk [vmem:[#allocation2 + $0x48] sm:$0xff] %vm400_vm0, %v7164_v0  ;;  %412 = vst.msk [vmem:[#allocation2 + $0x50] sm:$0xff] %vm400_vm0, %v7164_v0  ;;  %s8982_s1 = sld [smem:[#allocation15_spill]]  ;;  %s7172_s30 = smov 7   ;;  %vm1932_vm6 = vcmask 31744   ;;  %vm1965_vm7 = vcmask 39936  }
  0x2e   : > { %414 = vst.msk [vmem:[#allocation2 + $0x60] sm:$0xff] %vm400_vm0, %v7164_v0  ;;  %415 = vst.msk [vmem:[#allocation2 + $0x68] sm:$0xff] %vm400_vm0, %v7164_v0  ;;  %s7420_s12 = scalar_lea.vmem %s8981_s0, %s5731_s25  ;;  %s7173_s25 = smov 8   ;;  %vm1998_vm8 = vcmask 48128   ;;  %vm2031_vm9 = vcmask 56320   ;;  %vm2064_vm10 = vcmask 64512  }
  0x2f   : > { %416 = vst.msk [vmem:[#allocation2 + $0x70] sm:$0x3] %vm403_vm1, %v7164_v0  ;;  %419 = vst.msk [vmem:[#allocation2 + $0x88] sm:$0x3] %vm403_vm1, %v7164_v0  ;;  %v456_v1 = vld [vmem:[%s7420_s12] sm:$0xff]  ;;  %v457_v2 = vld [vmem:[%s7420_s12 + $0x8] sm:$0xff] }
  0x30   : > { %417 = vst.msk [vmem:[#allocation2 + $0x78] sm:$0xff] %vm400_vm0, %v7164_v0  ;;  %418 = vst.msk [vmem:[#allocation2 + $0x80] sm:$0xff] %vm400_vm0, %v7164_v0  ;;  %v458_v3 = vld [vmem:[%s7420_s12 + $0x10] sm:$0xff]  ;;  %v585_v4 = vld [vmem:[#allocation2 + $0x2] sm:$0xff]  ;;  %vm2127_vm11 = vcmask 72704   ;;  %vm2392_vm12 = vcmask 261120  }
  0x31   : > { %420 = vst.msk [vmem:[#allocation2 + $0x90] sm:$0xff] %vm400_vm0, %v7164_v0  ;;  %421 = vst.msk [vmem:[#allocation2 + $0x98] sm:$0xff] %vm400_vm0, %v7164_v0  ;;  %v586_v5 = vld [vmem:[#allocation2 + $0xa] sm:$0xff]  ;;  %v553_v6 = vld [vmem:[#allocation2 + $0x1] sm:$0xff]  ;;  %vm2449_vm13 = vcmask 254976   ;;  %vm2751_vm14 = vcmask 523264  }
  0x32   : > { %422 = vst.msk [vmem:[#allocation2 + $0xa0] sm:$0x3] %vm403_vm1, %v7164_v0  ;;  %425 = vst.msk [vmem:[#allocation2 + $0xb8] sm:$0x3] %vm403_vm1, %v7164_v0  ;;  %v6019_v7 = vpack.i.bf16 %v586_v5, %v585_v4  ;;  %v554_v8 = vld [vmem:[#allocation2 + $0x9] sm:$0xff]  ;;  %v459_v9 = vld [vmem:[%s7420_s12 + $0x18] sm:$0xff] }
  0x33   : > { %423 = vst.msk [vmem:[#allocation2 + $0xa8] sm:$0xff] %vm400_vm0, %v7164_v0  ;;  %424 = vst.msk [vmem:[#allocation2 + $0xb0] sm:$0xff] %vm400_vm0, %v7164_v0  ;;  %v460_v10 = vld [vmem:[%s7420_s12 + $0x20] sm:$0xff]  ;;  %v6014_v11 = vpack.i.bf16 %v554_v8, %v553_v6  ;;  %v461_v12 = vld [vmem:[%s7420_s12 + $0x28] sm:$0xff]  ;;  %vm2760_vm15 = vcmask 785408   ;;  %s5728_s29 = sshll.u32 %s7262_s21, 4 }
  0x34   : > { %426 = vst.msk [vmem:[#allocation2 + $0xc0] sm:$0xff] %vm400_vm0, %v7164_v0  ;;  %427 = vst.msk [vmem:[#allocation2 + $0xc8] sm:$0xff] %vm400_vm0, %v7164_v0  ;;  %v462_v13 = vld [vmem:[%s7420_s12 + $0x30] sm:$0xff]  ;;  %v463_v14 = vld [vmem:[%s7420_s12 + $0x38] sm:$0xff]  ;;  %6020 = vrot.lane.b32.xlu1 %v6019_v7, %s7165_s13  ;;  %s5403_s0 = scalar_lea.hbm %s8971_s11, %s5728_s29 }
  0x35   : > { %428 = vst.msk [vmem:[#allocation2 + $0xd0] sm:$0x3] %vm403_vm1, %v7164_v0  ;;  %431 = vst.msk [vmem:[#allocation2 + $0xe8] sm:$0x3] %vm403_vm1, %v7164_v0  ;;  %v464_v15 = vld [vmem:[%s7420_s12 + $0x40] sm:$0xff]  ;;  %v465_v16 = vld [vmem:[%s7420_s12 + $0x48] sm:$0xff]  ;;  %6015 = vrot.lane.b32.xlu0 %v6014_v11, %s7166_s14 }
  0x36   : > { %429 = vst.msk [vmem:[#allocation2 + $0xd8] sm:$0xff] %vm400_vm0, %v7164_v0  ;;  %430 = vst.msk [vmem:[#allocation2 + $0xe0] sm:$0xff] %vm400_vm0, %v7164_v0  ;;  %v466_v17 = vld [vmem:[%s7420_s12 + $0x50] sm:$0xff]  ;;  %v467_v18 = vld [vmem:[%s7420_s12 + $0x58] sm:$0xff] }
  0x37   : > { %432 = vst.msk [vmem:[#allocation2 + $0xf0] sm:$0xff] %vm400_vm0, %v7164_v0  ;;  %433 = vst.msk [vmem:[#allocation2 + $0xf8] sm:$0xff] %vm400_vm0, %v7164_v0  ;;  %v468_v19 = vld [vmem:[%s7420_s12 + $0x60] sm:$0xff]  ;;  %v469_v20 = vld [vmem:[%s7420_s12 + $0x68] sm:$0xff] }
  0x38   : > { %434 = vst.msk [vmem:[#allocation2 + $0x100] sm:$0x3] %vm403_vm1, %v7164_v0  ;;  %437 = vst.msk [vmem:[#allocation2 + $0x118] sm:$0x3] %vm403_vm1, %v7164_v0  ;;  %v470_v21 = vld [vmem:[%s7420_s12 + $0x70] sm:$0xff]  ;;  %v471_v22 = vld [vmem:[%s7420_s12 + $0x78] sm:$0xff] }
  0x39   : > { %435 = vst.msk [vmem:[#allocation2 + $0x108] sm:$0xff] %vm400_vm0, %v7164_v0  ;;  %436 = vst.msk [vmem:[#allocation2 + $0x110] sm:$0xff] %vm400_vm0, %v7164_v0  ;;  %v472_v23 = vld [vmem:[%s7420_s12 + $0x80] sm:$0xff]  ;;  %v473_v24 = vld [vmem:[%s7420_s12 + $0x88] sm:$0xff] }
  0x3a   : > { %438 = vst.msk [vmem:[#allocation2 + $0x120] sm:$0xff] %vm400_vm0, %v7164_v0  ;;  %439 = vst.msk [vmem:[#allocation2 + $0x128] sm:$0xff] %vm400_vm0, %v7164_v0  ;;  %v474_v50 = vld [vmem:[%s7420_s12 + $0x90] sm:$0xff]  ;;  %v475_v51 = vld [vmem:[%s7420_s12 + $0x98] sm:$0xff] }
  0x3b   : > { %440 = vst.msk [vmem:[#allocation2 + $0x130] sm:$0x3] %vm403_vm1, %v7164_v0  ;;  %443 = vst.msk [vmem:[#allocation2 + $0x148] sm:$0x3] %vm403_vm1, %v7164_v0  ;;  %v6774_v54 = vld [vmem:[%s8982_s1] sm:$0x1f]  }
  0x3c   : > { %441 = vst.msk [vmem:[#allocation2 + $0x138] sm:$0xff] %vm400_vm0, %v7164_v0  ;;  %442 = vst.msk [vmem:[#allocation2 + $0x140] sm:$0xff] %vm400_vm0, %v7164_v0  ;;  %v476_v55 = vld [vmem:[%s7420_s12 + $0xa0] sm:$0xff]  ;;  %v477_v56 = vld [vmem:[%s7420_s12 + $0xa8] sm:$0xff]  ;;  %v2181_v57 = vand.u32 %v6774_v54, %v2179_v52  ;;  %s392_s1 = sand.u32 1, %s7151_s18  }
  0x3d   : > { %444 = vst.msk [vmem:[#allocation2 + $0x150] sm:$0xff] %vm400_vm0, %v7164_v0  ;;  %445 = vst.msk [vmem:[#allocation2 + $0x158] sm:$0xff] %vm400_vm0, %v7164_v0  ;;  %v478_v63 = vld [vmem:[%s7420_s12 + $0xb0] sm:$0xff]  ;;  %v480_v8 = vld [vmem:[%s7420_s12 + $0xc0] sm:$0xff] }
  0x3e   : > { %446 = vst.msk [vmem:[#allocation2 + $0x160] sm:$0x3] %vm403_vm1, %v7164_v0  ;;  %449 = vst.msk [vmem:[#allocation2 + $0x178] sm:$0x3] %vm403_vm1, %v7164_v0  ;;  %5888 = vmatprep.subr.bf16.mxu0 %v2181_v57  ;;  %v481_v11 = vld [vmem:[%s7420_s12 + $0xc8] sm:$0xff] }
  0x3f   : > { %447 = vst.msk [vmem:[#allocation2 + $0x168] sm:$0xff] %vm400_vm0, %v7164_v0  ;;  %448 = vst.msk [vmem:[#allocation2 + $0x170] sm:$0xff] %vm400_vm0, %v7164_v0  ;;  %5889 = vmatpush3.bf16.msra.mxu0 %v2181_v57 }
  0x40   : > { %450 = vst.msk [vmem:[#allocation2 + $0x180] sm:$0xff] %vm400_vm0, %v7164_v0  ;;  %451 = vst.msk [vmem:[#allocation2 + $0x188] sm:$0xff] %vm400_vm0, %v7164_v0 }
  0x41   : > { %452 = vst.msk [vmem:[#allocation2 + $0x190] sm:$0x3] %vm403_vm1, %v7164_v0  ;;  %455 = vst.msk [vmem:[#allocation2 + $0x1a8] sm:$0x3] %vm403_vm1, %v7164_v0 }
  0x42   : > { %453 = vst.msk [vmem:[#allocation2 + $0x198] sm:$0xff] %vm400_vm0, %v7164_v0  ;;  %454 = vst.msk [vmem:[#allocation2 + $0x1a0] sm:$0xff] %vm400_vm0, %v7164_v0 }
  0x43   : > { %489 = vst.msk [vmem:[#allocation2 + $0x19] sm:$0xff] %vm400_vm0, %v456_v1  ;;  %490 = vst.msk [vmem:[#allocation2 + $0x21] sm:$0xff] %vm400_vm0, %v457_v2  ;;  %v479_v1 = vld [vmem:[%s7420_s12 + $0xb8] sm:$0xff] }
  0x44   : > { %491 = vst.msk [vmem:[#allocation2 + $0x31] sm:$0xff] %vm400_vm0, %v458_v3  ;;  %492 = vst.msk [vmem:[#allocation2 + $0x39] sm:$0xff] %vm400_vm0, %v459_v9 }
  0x45   : > { %493 = vst.msk [vmem:[#allocation2 + $0x49] sm:$0xff] %vm400_vm0, %v460_v10  ;;  %494 = vst.msk [vmem:[#allocation2 + $0x51] sm:$0xff] %vm400_vm0, %v461_v12 }
  0x46   : > { %495 = vst.msk [vmem:[#allocation2 + $0x61] sm:$0xff] %vm400_vm0, %v462_v13  ;;  %496 = vst.msk [vmem:[#allocation2 + $0x69] sm:$0xff] %vm400_vm0, %v463_v14 }
  0x47   : > { %497 = vst.msk [vmem:[#allocation2 + $0x79] sm:$0xff] %vm400_vm0, %v464_v15  ;;  %498 = vst.msk [vmem:[#allocation2 + $0x81] sm:$0xff] %vm400_vm0, %v465_v16 }
  0x48   : > { %499 = vst.msk [vmem:[#allocation2 + $0x91] sm:$0xff] %vm400_vm0, %v466_v17  ;;  %500 = vst.msk [vmem:[#allocation2 + $0x99] sm:$0xff] %vm400_vm0, %v467_v18 }
  0x49   : > { %501 = vst.msk [vmem:[#allocation2 + $0xa9] sm:$0xff] %vm400_vm0, %v468_v19  ;;  %502 = vst.msk [vmem:[#allocation2 + $0xb1] sm:$0xff] %vm400_vm0, %v469_v20  ;;  %v482_v20 = vld [vmem:[%s7420_s12 + $0xd0] sm:$0xff] }
  0x4a   : > { %503 = vst.msk [vmem:[#allocation2 + $0xc1] sm:$0xff] %vm400_vm0, %v470_v21  ;;  %504 = vst.msk [vmem:[#allocation2 + $0xc9] sm:$0xff] %vm400_vm0, %v471_v22  ;;  %v587_v25 = vld [vmem:[#allocation2 + $0x1a] sm:$0xff]  ;;  %v588_v26 = vld [vmem:[#allocation2 + $0x22] sm:$0xff] }
  0x4b   : > { %v555_v27 = vld [vmem:[#allocation2 + $0x19] sm:$0xff]  ;;  %505 = vst.msk [vmem:[#allocation2 + $0xd9] sm:$0xff] %vm400_vm0, %v472_v23  ;;  %506 = vst.msk [vmem:[#allocation2 + $0xe1] sm:$0xff] %vm400_vm0, %v473_v24  ;;  %v6029_v28 = vpack.i.bf16 %v588_v26, %v587_v25  ;;  %v556_v29 = vld [vmem:[#allocation2 + $0x21] sm:$0xff] }
  0x4c   : > { %v619_v30 = vld [vmem:[#allocation2 + $0x30] sm:$0xff]  ;;  %v7460_v31 = vld [vmem:[#allocation2 + $0x18] sm:$0xff]  ;;  %v6024_v32 = vpack.i.bf16 %v556_v29, %v555_v27  ;;  %v7462_v34 = vld [vmem:[#allocation2 + $0x20] sm:$0xff]  ;;  %507 = vst.msk [vmem:[#allocation2 + $0xf1] sm:$0xff] %vm400_vm0, %v474_v50 }
  0x4d   : > { %v620_v33 = vld [vmem:[#allocation2 + $0x38] sm:$0xff]  ;;  %6030 = vrot.lane.b32.xlu1 %v6029_v28, %s7165_s13  ;;  %v6034_v36 = vpack.i.bf16 %v7462_v34, %v7460_v31  ;;  %v716_v43 = vld [vmem:[#allocation2 + $0x48] sm:$0xff]  ;;  %v717_v44 = vld [vmem:[#allocation2 + $0x50] sm:$0xff]  ;;  %508 = vst.msk [vmem:[#allocation2 + $0xf9] sm:$0xff] %vm400_vm0, %v475_v51 }
  0x4e   : > { %v6039_v35 = vpack.i.bf16 %v620_v33, %v619_v30  ;;  %6025 = vrot.lane.b32.xlu0 %v6024_v32, %s7166_s14  ;;  %v651_v37 = vld [vmem:[#allocation2 + $0x31] sm:$0xff]  ;;  %v652_v38 = vld [vmem:[#allocation2 + $0x39] sm:$0xff]  ;;  %v6069_v45 = vpack.i.bf16 %v717_v44, %v716_v43  ;;  %v748_v46 = vld [vmem:[#allocation2 + $0x49] sm:$0xff]  ;;  %509 = vst.msk [vmem:[#allocation2 + $0x109] sm:$0xff] %vm400_vm0, %v476_v55 }
  0x4f   : > { %v6049_v39 = vpack.i.bf16 %v652_v38, %v651_v37  ;;  %v683_v40 = vld [vmem:[#allocation2 + $0x32] sm:$0xff]  ;;  %v684_v41 = vld [vmem:[#allocation2 + $0x3a] sm:$0xff]  ;;  %510 = vst.msk [vmem:[#allocation2 + $0x111] sm:$0xff] %vm400_vm0, %v477_v56  ;;  %v780_v58 = vld [vmem:[#allocation2 + $0x4a] sm:$0xff] }
  0x50   : > { %v6059_v42 = vpack.i.bf16 %v684_v41, %v683_v40  ;;  %v749_v47 = vld [vmem:[#allocation2 + $0x51] sm:$0xff]  ;;  %v623_v61 = vld [vmem:[#allocation2 + $0x60] sm:$0xff]  ;;  %v624_v62 = vld [vmem:[#allocation2 + $0x68] sm:$0xff]  ;;  %511 = vst.msk [vmem:[#allocation2 + $0x121] sm:$0xff] %vm400_vm0, %v478_v63 }
  0x51   : > { %6040 = vrot.lane.b32.xlu1 %v6039_v35, %s7167_s15  ;;  %v6079_v53 = vpack.i.bf16 %v749_v47, %v748_v46  ;;  %v781_v59 = vld [vmem:[#allocation2 + $0x52] sm:$0xff]  ;;  %512 = vst.msk [vmem:[#allocation2 + $0x129] sm:$0xff] %vm400_vm0, %v479_v1  ;;  %v655_v2 = vld [vmem:[#allocation2 + $0x61] sm:$0xff]  ;;  %v656_v3 = vld [vmem:[#allocation2 + $0x69] sm:$0xff]  ;;  %v6119_v4 = vpack.i.bf16 %v624_v62, %v623_v61 }
  0x52   : > { %6035 = vrot.lane.b32.xlu0 %v6034_v36, %s7167_s15  ;;  %v6094_v60 = vpack.i.bf16 %v781_v59, %v780_v58  ;;  %v687_v5 = vld [vmem:[#allocation2 + $0x62] sm:$0xff]  ;;  %v688_v6 = vld [vmem:[#allocation2 + $0x6a] sm:$0xff]  ;;  %v6129_v7 = vpack.i.bf16 %v656_v3, %v655_v2  ;;  %v720_v9 = vld [vmem:[#allocation2 + $0x78] sm:$0xff]  ;;  %513 = vst.msk [vmem:[#allocation2 + $0x139] sm:$0xff] %vm400_vm0, %v480_v8 }
  0x53   : > { %v721_v10 = vld [vmem:[#allocation2 + $0x80] sm:$0xff]  ;;  %v6139_v12 = vpack.i.bf16 %v688_v6, %v687_v5  ;;  %514 = vst.msk [vmem:[#allocation2 + $0x141] sm:$0xff] %vm400_vm0, %v481_v11  ;;  %v627_v21 = vld [vmem:[#allocation2 + $0x90] sm:$0xff]  ;;  %v628_v22 = vld [vmem:[#allocation2 + $0x98] sm:$0xff] }
  0x54   : > { %v752_v13 = vld [vmem:[#allocation2 + $0x79] sm:$0xff]  ;;  %v753_v14 = vld [vmem:[#allocation2 + $0x81] sm:$0xff]  ;;  %v6149_v15 = vpack.i.bf16 %v721_v10, %v720_v9  ;;  %515 = vst.msk [vmem:[#allocation2 + $0x151] sm:$0xff] %vm400_vm0, %v482_v20  ;;  %v659_v24 = vld [vmem:[#allocation2 + $0x91] sm:$0xff]  ;;  %v6199_v26 = vpack.i.bf16 %v628_v22, %v627_v21 }
  0x55   : > { %6050 = vrot.lane.b32.xlu1 %v6049_v39, %s7168_s16  ;;  %v6159_v16 = vpack.i.bf16 %v753_v14, %v752_v13  ;;  %v784_v17 = vld [vmem:[#allocation2 + $0x7a] sm:$0xff]  ;;  %v785_v18 = vld [vmem:[#allocation2 + $0x82] sm:$0xff]  ;;  %v691_v27 = vld [vmem:[#allocation2 + $0x92] sm:$0xff]  ;;  %2448 = vst.msk [vmem:[#allocation3] sm:$0xff] %vm2392_vm12, %v7164_v0 }
  0x56   : > { %6045 = vrot.lane.b32.xlu0 %v6024_v32, %s7168_s16  ;;  %v6174_v19 = vpack.i.bf16 %v785_v18, %v784_v17  ;;  %v483_v23 = vld [vmem:[%s7420_s12 + $0xd8] sm:$0xff]  ;;  %v484_v30 = vld [vmem:[%s7420_s12 + $0xe0] sm:$0xff]  ;;  %v724_v32 = vld [vmem:[#allocation2 + $0xa8] sm:$0xff]  ;;  %2451 = vst.msk [vmem:[#allocation3 + $0x10] sm:$0xff] %vm2392_vm12, %v7164_v0 }
  0x57   : > { %516 = vst.msk [vmem:[#allocation2 + $0x159] sm:$0xff] %vm400_vm0, %v483_v23  ;;  %v660_v25 = vld [vmem:[#allocation2 + $0x99] sm:$0xff]  ;;  %v725_v33 = vld [vmem:[#allocation2 + $0xb0] sm:$0xff]  ;;  %517 = vst.msk [vmem:[#allocation2 + $0x169] sm:$0xff] %vm400_vm0, %v484_v30 }
  0x58   : > { %v6209_v29 = vpack.i.bf16 %v660_v25, %v659_v24  ;;  %v756_v37 = vld [vmem:[#allocation2 + $0xa9] sm:$0xff]  ;;  %v757_v38 = vld [vmem:[#allocation2 + $0xb1] sm:$0xff]  ;;  %v663_v48 = vld [vmem:[#allocation2 + $0xc1] sm:$0xff]  ;;  %2453 = vst.msk [vmem:[#allocation3 + $0x20] sm:$0xff] %vm2392_vm12, %v7164_v0 }
  0x59   : > { %6060 = vrot.lane.b32.xlu1 %v6059_v42, %s7169_s22  ;;  %v6239_v40 = vpack.i.bf16 %v757_v38, %v756_v37  ;;  %v788_v41 = vld [vmem:[#allocation2 + $0xaa] sm:$0xff]  ;;  %v487_v47 = vld [vmem:[%s7420_s12 + $0xf8] sm:$0xff]  ;;  %v695_v51 = vld [vmem:[#allocation2 + $0xc2] sm:$0xff]  ;;  %2455 = vst.msk [vmem:[#allocation3 + $0x30] sm:$0xff] %vm2392_vm12, %v7164_v0 }
  0x5a   : > { %6055 = vrot.lane.b32.xlu0 %v6029_v28, %s7169_s22  ;;  %v692_v28 = vld [vmem:[#allocation2 + $0x9a] sm:$0xff]  ;;  %v486_v44 = vld [vmem:[%s7420_s12 + $0xf0] sm:$0xff]  ;;  %v632_v46 = vld [vmem:[#allocation2 + $0xc8] sm:$0xff]  ;;  %520 = vst.msk [vmem:[#allocation2 + $0x189] sm:$0xff] %vm400_vm0, %v487_v47 }
  0x5b   : > { %v6219_v36 = vpack.i.bf16 %v692_v28, %v691_v27  ;;  %519 = vst.msk [vmem:[#allocation2 + $0x181] sm:$0xff] %vm400_vm0, %v486_v44  ;;  %v664_v49 = vld [vmem:[#allocation2 + $0xc9] sm:$0xff]  ;;  %v728_v54 = vld [vmem:[#allocation2 + $0xd8] sm:$0xff]  ;;  %v729_v55 = vld [vmem:[#allocation2 + $0xe0] sm:$0xff] }
  0x5c   : > { %v696_v52 = vld [vmem:[#allocation2 + $0xca] sm:$0xff]  ;;  %v760_v57 = vld [vmem:[#allocation2 + $0xd9] sm:$0xff]  ;;  %v761_v58 = vld [vmem:[#allocation2 + $0xe1] sm:$0xff]  ;;  %2457 = vst.msk [vmem:[#allocation3 + $0x40] sm:$0xff] %vm2392_vm12, %v7164_v0 }
  0x5d   : > { %6070 = vrot.lane.b32.xlu1 %v6069_v45, %s7171_s24  ;;  %v6299_v56 = vpack.i.bf16 %v696_v52, %v695_v51  ;;  %v7559_v62 = vpack.i.bf16 %v761_v58, %v760_v57  ;;  %v792_v3 = vld [vmem:[#allocation2 + $0xda] sm:$0xff]  ;;  %v635_v9 = vld [vmem:[#allocation2 + $0xf0] sm:$0xff]  ;;  %v522_v11 = vld [vmem:[#allocation2 + $0x8] sm:$0xff]  ;;  %2459 = vst.msk [vmem:[#allocation3 + $0x50] sm:$0xff] %vm2392_vm12, %v7164_v0 }
  0x5e   : > { %6065 = vrot.lane.b32.xlu0 %v6039_v35, %s7171_s24  ;;  %v485_v35 = vld [vmem:[%s7420_s12 + $0xe8] sm:$0xff]  ;;  %v636_v10 = vld [vmem:[#allocation2 + $0xf8] sm:$0xff]  ;;  %v733_v25 = vld [vmem:[#allocation2 + $0x110] sm:$0xff]  ;;  %2461 = vst.msk [vmem:[#allocation3 + $0x60] sm:$0xff] %vm2392_vm12, %v7164_v0  ;;  %s5393_s12 = scalar_lea.sflag [#allocation10], %s392_s1 }
  0x5f   : > { %518 = vst.msk [vmem:[#allocation2 + $0x171] sm:$0xff] %vm400_vm0, %v485_v35  ;;  %v668_v20 = vld [vmem:[#allocation2 + $0xf9] sm:$0xff]  ;;  %v7589_v21 = vpack.i.bf16 %v636_v10, %v635_v9  ;;  %v732_v24 = vld [vmem:[#allocation2 + $0x108] sm:$0xff] }
  0x60   : > { %v699_v22 = vld [vmem:[#allocation2 + $0xf2] sm:$0xff]  ;;  %v700_v23 = vld [vmem:[#allocation2 + $0xfa] sm:$0xff]  ;;  %v7618_v44 = vpack.i.bf16 %v733_v25, %v732_v24  ;;  %2463 = vst.msk [vmem:[#allocation3 + $0x70] sm:$0xff] %vm2392_vm12, %v7164_v0  ;;  %2465 = vst.msk [vmem:[#allocation3 + $0x80] sm:$0xff] %vm2392_vm12, %v7164_v0 }
  0x61   : > { %6080 = vrot.lane.b32.xlu1 %v6079_v53, %s7172_s30  ;;  %2467 = vst.msk [vmem:[#allocation3 + $0x90] sm:$0xff] %vm2392_vm12, %v7164_v0 }
  0x62   : > { %6075 = vrot.lane.b32.xlu0 %v6049_v39, %s7172_s30  ;;  %2450 = vst.msk [vmem:[#allocation3 + $0x8] sm:$0x3] %vm2449_vm13, %v7164_v0  ;;  %2452 = vst.msk [vmem:[#allocation3 + $0x18] sm:$0x3] %vm2449_vm13, %v7164_v0 }
  0x63   : > { %2454 = vst.msk [vmem:[#allocation3 + $0x28] sm:$0x3] %vm2449_vm13, %v7164_v0  ;;  %2456 = vst.msk [vmem:[#allocation3 + $0x38] sm:$0x3] %vm2449_vm13, %v7164_v0 }
  0x64   : > { %2458 = vst.msk [vmem:[#allocation3 + $0x48] sm:$0x3] %vm2449_vm13, %v7164_v0  ;;  %2460 = vst.msk [vmem:[#allocation3 + $0x58] sm:$0x3] %vm2449_vm13, %v7164_v0 }
  0x65   : > { %6090 = vrot.lane.b32.xlu1 %v6049_v39, %s7166_s14  ;;  %v6229_v39 = vpack.i.bf16 %v725_v33, %v724_v32  ;;  %2462 = vst.msk [vmem:[#allocation3 + $0x68] sm:$0x3] %vm2449_vm13, %v7164_v0  ;;  %2464 = vst.msk [vmem:[#allocation3 + $0x78] sm:$0x3] %vm2449_vm13, %v7164_v0 }
  0x66   : > { %6085 = vrot.lane.b32.xlu0 %v6059_v42, %s7173_s25  ;;  %2466 = vst.msk [vmem:[#allocation3 + $0x88] sm:$0x3] %vm2449_vm13, %v7164_v0  ;;  %2468 = vst.msk [vmem:[#allocation3 + $0x98] sm:$0x3] %vm2449_vm13, %v7164_v0 }
  0x69   : > { %6100 = vrot.lane.b32.xlu1 %v6079_v53, %s7166_s14 }
  0x6a   : > { %6095 = vrot.lane.b32.xlu0 %v6094_v60, %s7173_s25 }
  0x6d   : > { %6110 = vrot.lane.b32.xlu1 %v6094_v60, %s7165_s13 }
  0x6e   : > { %6105 = vrot.lane.b32.xlu0 %v6059_v42, %s7165_s13  ;;  %v789_v42 = vld [vmem:[#allocation2 + $0xb2] sm:$0xff] }
  0x6f   : > { %v6254_v43 = vpack.i.bf16 %v789_v42, %v788_v41 }
  0x71   : > { %6120 = vrot.lane.b32.xlu1 %v6119_v4, %s7167_s15 }
  0x72   : > { %6115 = vrot.lane.b32.xlu0 %v6069_v45, %s7167_s15  ;;  %v631_v45 = vld [vmem:[#allocation2 + $0xc0] sm:$0xff] }
  0x73   : > { %v6279_v50 = vpack.i.bf16 %v632_v46, %v631_v45 }
  0x75   : > { %6130 = vrot.lane.b32.xlu1 %v6129_v7, %s7168_s16 }
  0x76   : > { %6125 = vrot.lane.b32.xlu0 %v6079_v53, %s7168_s16  ;;  %v6289_v53 = vpack.i.bf16 %v664_v49, %v663_v48 }
  0x79   : > { %6140 = vrot.lane.b32.xlu1 %v6139_v12, %s7169_s22 }
  0x7a   : > { %6135 = vrot.lane.b32.xlu0 %v6094_v60, %s7169_s22  ;;  %v7554_v60 = vpack.i.bf16 %v729_v55, %v728_v54 }
  0x7d   : > { %6150 = vrot.lane.b32.xlu1 %v6149_v15, %s7171_s24 }
  0x7e   : > { %6145 = vrot.lane.b32.xlu0 %v6119_v4, %s7171_s24  ;;  %v793_v4 = vld [vmem:[#allocation2 + $0xe2] sm:$0xff] }
  0x7f   : > { %v7573_v6 = vpack.i.bf16 %v793_v4, %v792_v3 }
  0x81   : > { %6160 = vrot.lane.b32.xlu1 %v6159_v16, %s7172_s30 }
  0x82   : > { %6155 = vrot.lane.b32.xlu0 %v6129_v7, %s7172_s30 }
  0x85   : > { %6170 = vrot.lane.b32.xlu1 %v6129_v7, %s7166_s14 }
  0x86   : > { %6165 = vrot.lane.b32.xlu0 %v6139_v12, %s7173_s25 }
  0x89   : > { %6180 = vrot.lane.b32.xlu1 %v6159_v16, %s7166_s14 }
  0x8a   : > { %6175 = vrot.lane.b32.xlu0 %v6174_v19, %s7173_s25 }
  0x8d   : > { %6190 = vrot.lane.b32.xlu1 %v6174_v19, %s7165_s13 }
  0x8e   : > { %6185 = vrot.lane.b32.xlu0 %v6139_v12, %s7165_s13  ;;  %v521_v12 = vld [vmem:[#allocation2] sm:$0xff] }
  0x91   : > { %6200 = vrot.lane.b32.xlu1 %v6199_v26, %s7167_s15 }
  0x92   : > { %6195 = vrot.lane.b32.xlu0 %v6149_v15, %s7167_s15 }
  0x95   : > { %6210 = vrot.lane.b32.xlu1 %v6209_v29, %s7168_s16 }
  0x96   : > { %6205 = vrot.lane.b32.xlu0 %v6159_v16, %s7168_s16 }
  0x99   : > { %6220 = vrot.lane.b32.xlu1 %v6219_v36, %s7169_s22 }
  0x9a   : > { %6215 = vrot.lane.b32.xlu0 %v6174_v19, %s7169_s22  ;;  %v667_v19 = vld [vmem:[#allocation2 + $0xf1] sm:$0xff] }
  0x9b   : > { %v7610_v42 = vpack.i.bf16 %v668_v20, %v667_v19 }
  0x9d   : > { %6230 = vrot.lane.b32.xlu1 %v6229_v39, %s7171_s24 }
  0x9e   : > { %6225 = vrot.lane.b32.xlu0 %v6199_v26, %s7171_s24 }
  0xa1   : > { %6240 = vrot.lane.b32.xlu1 %v6239_v40, %s7172_s30 }
  0xa2   : > { %6235 = vrot.lane.b32.xlu0 %v6209_v29, %s7172_s30 }
  0xa5   : > { %6250 = vrot.lane.b32.xlu1 %v6209_v29, %s7166_s14 }
  0xa6   : > { %6245 = vrot.lane.b32.xlu0 %v6219_v36, %s7173_s25  ;;  %v7552_v59 = vpop.permute.xlu1 %6020 }
  0xa7   : > { %v6016_v61 = vpop.permute.xlu0 %6015  ;;  %v6023_v26 = vunpack.i.h.bf16 %v7552_v59  ;;  %v6022_v27 = vunpack.i.l.bf16 %v7552_v59 }
  0xa8   : > { %v6018_v13 = vunpack.i.h.bf16 %v6016_v61  ;;  %v6017_v14 = vunpack.i.l.bf16 %v6016_v61 }
  0xa9   : > { %6260 = vrot.lane.b32.xlu1 %v6239_v40, %s7166_s14 }
  0xaa   : > { %6255 = vrot.lane.b32.xlu0 %v6254_v43, %s7173_s25  ;;  %v1835_v28 = vsel %vm400_vm0, %v522_v11, %v6018_v13  ;;  %v1834_v29 = vsel %vm400_vm0, %v521_v12, %v6017_v14 }
  0xad   : > { %6270 = vrot.lane.b32.xlu1 %v6254_v43, %s7165_s13 }
  0xae   : > { %6265 = vrot.lane.b32.xlu0 %v6219_v36, %s7165_s13 }
  0xb1   : > { %6280 = vrot.lane.b32.xlu1 %v6279_v50, %s7167_s15 }
  0xb2   : > { %6275 = vrot.lane.b32.xlu0 %v6229_v39, %s7167_s15 }
  0xb5   : > { %6290 = vrot.lane.b32.xlu1 %v6289_v53, %s7168_s16 }
  0xb6   : > { %6285 = vrot.lane.b32.xlu0 %v6239_v40, %s7168_s16 }
  0xb9   : > { %6300 = vrot.lane.b32.xlu1 %v6299_v56, %s7169_s22 }
  0xba   : > { %6295 = vrot.lane.b32.xlu0 %v6254_v43, %s7169_s22  ;;  %v1868_v43 = vsel %vm1866_vm4, %v1835_v28, %v6023_v26 }
  0xbd   : > { %6310 = vrot.lane.b32.xlu1 %v7554_v60, %s7171_s24 }
  0xbe   : > { %6305 = vrot.lane.b32.xlu0 %v6279_v50, %s7171_s24 }
  0xbf   : > { %v7562_v63 = vpop.permute.xlu1 %6030 }
  0xc0   : > { %v6026_v1 = vpop.permute.xlu0 %6025  ;;  %v6033_v30 = vunpack.i.h.bf16 %v7562_v63  ;;  %v6032_v32 = vunpack.i.l.bf16 %v7562_v63 }
  0xc1   : > { %6320 = vrot.lane.b32.xlu1 %v7559_v62, %s7172_s30  ;;  %v6028_v16 = vunpack.i.h.bf16 %v6026_v1  ;;  %v6027_v17 = vunpack.i.l.bf16 %v6026_v1 }
  0xc2   : > { %6315 = vrot.lane.b32.xlu0 %v6289_v53, %s7172_s30 }
  0xc3   : > { %v7567_v2 = vpop.permute.xlu1 %6040  ;;  %v1837_v35 = vsel %vm400_vm0, %v7462_v34, %v6028_v16  ;;  %v1836_v36 = vsel %vm400_vm0, %v7460_v31, %v6027_v17  ;;  %v1867_v34 = vsel %vm1866_vm4, %v1834_v29, %v6022_v27  ;;  %v7616_v31 = vpack.i.bf16 %v700_v23, %v699_v22  ;;  %v765_v16 = vld [vmem:[#allocation2 + $0x111] sm:$0xff] }
  0xc4   : > { %v7569_v5 = vpop.permute.xlu0 %6035  ;;  %v6043_v37 = vunpack.i.h.bf16 %v7567_v2  ;;  %v6042_v38 = vunpack.i.l.bf16 %v7567_v2  ;;  %v1869_v45 = vsel %vm1866_vm4, %v1836_v36, %v6032_v32  ;;  %v1870_v46 = vsel %vm1866_vm4, %v1837_v35, %v6033_v30 }
  0xc5   : > { %6330 = vrot.lane.b32.xlu1 %v6289_v53, %s7166_s14  ;;  %v6038_v40 = vunpack.i.h.bf16 %v7569_v5  ;;  %v6037_v41 = vunpack.i.l.bf16 %v7569_v5 }
  0xc6   : > { %6325 = vrot.lane.b32.xlu0 %v6299_v56, %s7173_s25  ;;  %v1902_v50 = vsel %vm1899_vm5, %v1869_v45, %v6042_v38  ;;  %v1903_v51 = vsel %vm1899_vm5, %v1870_v46, %v6043_v37  ;;  %v796_v46 = vld [vmem:[#allocation2 + $0x10a] sm:$0xff] }
  0xc7   : > { %v7575_v7 = vpop.permute.xlu1 %6050  ;;  %v1900_v55 = vsel %vm1899_vm5, %v1867_v34, %v6037_v41 }
  0xc8   : > { %v7577_v8 = vpop.permute.xlu0 %6045  ;;  %v6053_v59 = vunpack.i.h.bf16 %v7575_v7 }
  0xc9   : > { %6340 = vrot.lane.b32.xlu1 %v7559_v62, %s7166_s14  ;;  %v6048_v47 = vunpack.i.h.bf16 %v7577_v8  ;;  %v6047_v48 = vunpack.i.l.bf16 %v7577_v8 }
  0xca   : > { %6335 = vrot.lane.b32.xlu0 %v7573_v6, %s7173_s25  ;;  %v1936_v23 = vsel %vm1932_vm6, %v1903_v51, %v6053_v59  ;;  %v639_v51 = vld [vmem:[#allocation2 + $0x120] sm:$0xff] }
  0xcb   : > { %v7583_v15 = vpop.permute.xlu1 %6060  ;;  %v1933_v1 = vsel %vm1932_vm6, %v1900_v55, %v6047_v48  ;;  %v672_v55 = vld [vmem:[#allocation2 + $0x129] sm:$0xff] }
  0xcc   : > { %v7585_v18 = vpop.permute.xlu0 %6055  ;;  %v6063_v3 = vunpack.i.h.bf16 %v7583_v15  ;;  %v6062_v4 = vunpack.i.l.bf16 %v7583_v15  ;;  %v764_v15 = vld [vmem:[#allocation2 + $0x109] sm:$0xff] }
  0xcd   : > { %6350 = vrot.lane.b32.xlu1 %v7573_v6, %s7165_s13  ;;  %v6058_v52 = vunpack.i.h.bf16 %v7585_v18  ;;  %v6057_v53 = vunpack.i.l.bf16 %v7585_v18  ;;  %v7662_v30 = vpack.i.bf16 %v765_v16, %v764_v15  ;;  %v7055_v15 = vld [vmem:[#allocation2 + $0x50] sm:$0xff]  ;;  %v7056_v16 = vld [vmem:[#allocation2 + $0x48] sm:$0xff] }
  0xce   : > { %6345 = vrot.lane.b32.xlu0 %v6299_v56, %s7165_s13  ;;  %v1901_v56 = vsel %vm1899_vm5, %v1868_v43, %v6038_v40  ;;  %v1969_v28 = vsel %vm1965_vm7, %v1936_v23, %v6063_v3 }
  0xcf   : > { %v7598_v33 = vpop.permute.xlu1 %6070  ;;  %v1934_v2 = vsel %vm1932_vm6, %v1901_v56, %v6048_v47  ;;  %v1966_v8 = vsel %vm1965_vm7, %v1933_v1, %v6057_v53  ;;  %v703_v56 = vld [vmem:[#allocation2 + $0x122] sm:$0xff] }
  0xd0   : > { %v6066_v39 = vpop.permute.xlu0 %6065  ;;  %v1967_v9 = vsel %vm1965_vm7, %v1934_v2, %v6058_v52  ;;  %v6072_v10 = vunpack.i.l.bf16 %v7598_v33  ;;  %v640_v52 = vld [vmem:[#allocation2 + $0x128] sm:$0xff] }
  0xd1   : > { %6360 = vrot.lane.b32.xlu1 %v7589_v21, %s7167_s15  ;;  %v6068_v57 = vunpack.i.h.bf16 %v6066_v39  ;;  %v6067_v58 = vunpack.i.l.bf16 %v6066_v39  ;;  %v7704_v59 = vpack.i.bf16 %v640_v52, %v639_v51 }
  0xd2   : > { %6355 = vrot.lane.b32.xlu0 %v7554_v60, %s7167_s15  ;;  %v6052_v60 = vunpack.i.l.bf16 %v7575_v7  ;;  %v6073_v7 = vunpack.i.h.bf16 %v7598_v33 }
  0xd3   : > { %v6081_v49 = vpop.permute.xlu1 %6080  ;;  %v1999_v13 = vsel %vm1998_vm8, %v1966_v8, %v6067_v58  ;;  %v2000_v14 = vsel %vm1998_vm8, %v1967_v9, %v6068_v57 }
  0xd4   : > { %v6076_v54 = vpop.permute.xlu0 %6075  ;;  %v6083_v17 = vunpack.i.h.bf16 %v6081_v49  ;;  %v6082_v18 = vunpack.i.l.bf16 %v6081_v49  ;;  %v1935_v22 = vsel %vm1932_vm6, %v1902_v50, %v6052_v60  ;;  %v2002_v33 = vsel %vm1998_vm8, %v1969_v28, %v6073_v7  ;;  %v704_v60 = vld [vmem:[#allocation2 + $0x12a] sm:$0xff] }
  0xd5   : > { %6370 = vrot.lane.b32.xlu1 %v7610_v42, %s7168_s16  ;;  %v6078_v61 = vunpack.i.h.bf16 %v6076_v54  ;;  %v6077_v63 = vunpack.i.l.bf16 %v6076_v54  ;;  %v1968_v27 = vsel %vm1965_vm7, %v1935_v22, %v6062_v4  ;;  %v671_v54 = vld [vmem:[#allocation2 + $0x121] sm:$0xff]  ;;  %v7058_v22 = vld [vmem:[#allocation2 + $0x30] sm:$0xff] }
  0xd6   : > { %6365 = vrot.lane.b32.xlu0 %v7559_v62, %s7168_s16  ;;  %v2001_v32 = vsel %vm1998_vm8, %v1968_v27, %v6072_v10  ;;  %v2035_v38 = vsel %vm2031_vm9, %v2002_v33, %v6083_v17  ;;  %v7712_v10 = vpack.i.bf16 %v672_v55, %v671_v54 }
  0xd7   : > { %v7640_v5 = vpop.permute.xlu1 %6090  ;;  %v2032_v19 = vsel %vm2031_vm9, %v1999_v13, %v6077_v63  ;;  %v2033_v20 = vsel %vm2031_vm9, %v2000_v14, %v6078_v61  ;;  %v2034_v37 = vsel %vm2031_vm9, %v2001_v32, %v6082_v18  ;;  %v736_v61 = vld [vmem:[#allocation2 + $0x138] sm:$0xff]  ;;  %v737_v63 = vld [vmem:[#allocation2 + $0x140] sm:$0xff]  ;;  %v7714_v13 = vpack.i.bf16 %v704_v60, %v703_v56 }
  0xd8   : > { %v6086_v11 = vpop.permute.xlu0 %6085  ;;  %v6093_v1 = vunpack.i.h.bf16 %v7640_v5  ;;  %v6092_v2 = vunpack.i.l.bf16 %v7640_v5  ;;  %v7716_v14 = vpack.i.bf16 %v737_v63, %v736_v61  ;;  %v769_v60 = vld [vmem:[#allocation2 + $0x141] sm:$0xff] }
  0xd9   : > { %v6088_v62 = vunpack.i.h.bf16 %v6086_v11  ;;  %v6087_v12 = vunpack.i.l.bf16 %v6086_v11  ;;  %6380 = vrot.lane.b32.xlu1 %v7616_v31, %s7169_s22 }
  0xda   : > { %6375 = vrot.lane.b32.xlu0 %v7573_v6, %s7169_s22  ;;  %v1838_v23 = vsel %vm400_vm0, %v7058_v22, %v6092_v2 }
  0xdb   : > { %v7656_v24 = vpop.permute.xlu1 %6100  ;;  %v2065_v25 = vsel %vm2064_vm10, %v2032_v19, %v6087_v12  ;;  %v2066_v26 = vsel %vm2064_vm10, %v2033_v20, %v6088_v62  ;;  %v7057_v19 = vld [vmem:[#allocation2 + $0x38] sm:$0xff] }
  0xdc   : > { %v6096_v29 = vpop.permute.xlu0 %6095  ;;  %v2097_v6 = vpack.c.bf16 %v2066_v26, %v2065_v25  ;;  %v6103_v57 = vunpack.i.h.bf16 %v7656_v24  ;;  %v6102_v58 = vunpack.i.l.bf16 %v7656_v24  ;;  %v1839_v20 = vsel %vm400_vm0, %v7057_v19, %v6093_v1 }
  0xdd   : > { %v6098_v35 = vunpack.i.h.bf16 %v6096_v29  ;;  %v6097_v36 = vunpack.i.l.bf16 %v6096_v29  ;;  %6390 = vrot.lane.b32.xlu1 %v7618_v44, %s7171_s24 }
  0xde   : > { %6385 = vrot.lane.b32.xlu0 %v7589_v21, %s7171_s24  ;;  %5890 = vmatprep.mubr.msk.bf16.mxu0 %vm2127_vm11, %v2097_v6  ;;  %v797_v21 = vld [vmem:[#allocation2 + $0x112] sm:$0xff]  ;;  %v1841_v5 = vsel %vm400_vm0, %v7055_v15, %v6103_v57  ;;  %v1840_v17 = vsel %vm400_vm0, %v7056_v16, %v6102_v58 }
  0xdf   : > { %v2067_v39 = vsel %vm2064_vm10, %v2034_v37, %v6097_v36  ;;  %v2068_v40 = vsel %vm2064_vm10, %v2035_v38, %v6098_v35  ;;  %v6111_v41 = vpop.permute.xlu1 %6110  ;;  %v7686_v48 = vpack.i.bf16 %v797_v21, %v796_v46 }
  0xe0   : > { %v6106_v34 = vpop.permute.xlu0 %6105  ;;  %v2098_v43 = vpack.c.bf16 %v2068_v40, %v2067_v39  ;;  %v6113_v3 = vunpack.i.h.bf16 %v6111_v41  ;;  %v6112_v4 = vunpack.i.l.bf16 %v6111_v41 }
  0xe1   : > { %6400 = vrot.lane.b32.xlu1 %v7662_v30, %s7172_s30  ;;  %v6108_v8 = vunpack.i.h.bf16 %v6106_v34  ;;  %v6107_v9 = vunpack.i.l.bf16 %v6106_v34 }
  0xe2   : > { %6395 = vrot.lane.b32.xlu0 %v7610_v42, %s7172_s30  ;;  %5891 = vmatmul.mubr.msk.bf16.vlgmr.msra.gmra.mxu0 %vm2127_vm11, %v2098_v43  ;;  %v1873_v24 = vsel %vm1866_vm4, %v1840_v17, %v6112_v4  ;;  %v1874_v25 = vsel %vm1866_vm4, %v1841_v5, %v6113_v3 }
  0xe3   : > { %v6121_v45 = vpop.permute.xlu1 %6120  ;;  %v1872_v26 = vsel %vm1866_vm4, %v1839_v20, %v6108_v8  ;;  %v1871_v27 = vsel %vm1866_vm4, %v1838_v23, %v6107_v9 }
  0xe4   : > { %v7680_v47 = vpop.permute.xlu0 %6115  ;;  %v6123_v11 = vunpack.i.h.bf16 %v6121_v45  ;;  %v6122_v62 = vunpack.i.l.bf16 %v6121_v45 }
  0xe5   : > { %6410 = vrot.lane.b32.xlu1 %v7610_v42, %s7166_s14  ;;  %v6117_v18 = vunpack.i.l.bf16 %v7680_v47 }
  0xe6   : > { %6405 = vrot.lane.b32.xlu0 %v7616_v31, %s7173_s25  ;;  %v1906_v32 = vsel %vm1899_vm5, %v1873_v24, %v6122_v62  ;;  %v1907_v33 = vsel %vm1899_vm5, %v1874_v25, %v6123_v11 }
  0xe7   : > { %v7688_v49 = vpop.permute.xlu1 %6130 }
  0xe8   : > { %v7690_v50 = vpop.permute.xlu0 %6125  ;;  %v6133_v41 = vunpack.i.h.bf16 %v7688_v49  ;;  %v6132_v34 = vunpack.i.l.bf16 %v7688_v49 }
  0xe9   : > { %6420 = vrot.lane.b32.xlu1 %v7662_v30, %s7166_s14  ;;  %v6128_v28 = vunpack.i.h.bf16 %v7690_v50  ;;  %v6127_v29 = vunpack.i.l.bf16 %v7690_v50 }
  0xea   : > { %6415 = vrot.lane.b32.xlu0 %v7686_v48, %s7173_s25  ;;  %v1939_v3 = vsel %vm1932_vm6, %v1906_v32, %v6132_v34  ;;  %v1940_v4 = vsel %vm1932_vm6, %v1907_v33, %v6133_v41  ;;  %v643_v33 = vld [vmem:[#allocation2 + $0x150] sm:$0xff]  ;;  %v708_v34 = vld [vmem:[#allocation2 + $0x15a] sm:$0xff] }
  0xeb   : > { %v7696_v53 = vpop.permute.xlu1 %6140 }
  0xec   : > { %v7698_v42 = vpop.permute.xlu0 %6135  ;;  %v6142_v50 = vunpack.i.l.bf16 %v7696_v53 }
  0xed   : > { %6430 = vrot.lane.b32.xlu1 %v7686_v48, %s7165_s13  ;;  %v6138_v35 = vunpack.i.h.bf16 %v7698_v42  ;;  %v6137_v36 = vunpack.i.l.bf16 %v7698_v42 }
  0xee   : > { %6425 = vrot.lane.b32.xlu0 %v7616_v31, %s7165_s13  ;;  %v6118_v31 = vunpack.i.h.bf16 %v7680_v47  ;;  %v6143_v47 = vunpack.i.h.bf16 %v7696_v53  ;;  %v768_v53 = vld [vmem:[#allocation2 + $0x139] sm:$0xff]  ;;  %v1972_v11 = vsel %vm1965_vm7, %v1939_v3, %v6142_v50 }
  0xef   : > { %v7710_v7 = vpop.permute.xlu1 %6150  ;;  %v7772_v5 = vpack.i.bf16 %v769_v60, %v768_v53  ;;  %v7059_v53 = vld [vmem:[#allocation2 + $0x80] sm:$0xff]  ;;  %v7060_v60 = vld [vmem:[#allocation2 + $0x78] sm:$0xff] }
  0xf0   : > { %v6146_v12 = vpop.permute.xlu0 %6145  ;;  %v1905_v38 = vsel %vm1899_vm5, %v1872_v26, %v6118_v31  ;;  %v6153_v49 = vunpack.i.h.bf16 %v7710_v7  ;;  %v6152_v54 = vunpack.i.l.bf16 %v7710_v7  ;;  %v1973_v62 = vsel %vm1965_vm7, %v1940_v4, %v6143_v47  ;;  %v7062_v3 = vld [vmem:[#allocation2 + $0x60] sm:$0xff] }
  0xf1   : > { %6440 = vrot.lane.b32.xlu1 %v7704_v59, %s7167_s15  ;;  %v6148_v39 = vunpack.i.h.bf16 %v6146_v12  ;;  %v6147_v40 = vunpack.i.l.bf16 %v6146_v12  ;;  %v1938_v21 = vsel %vm1932_vm6, %v1905_v38, %v6128_v28  ;;  %v707_v38 = vld [vmem:[#allocation2 + $0x152] sm:$0xff] }
  0xf2   : > { %6435 = vrot.lane.b32.xlu0 %v7618_v44, %s7167_s15  ;;  %v1904_v44 = vsel %vm1899_vm5, %v1871_v27, %v6117_v18  ;;  %v1971_v42 = vsel %vm1965_vm7, %v1938_v21, %v6138_v35  ;;  %v2006_v16 = vsel %vm1998_vm8, %v1973_v62, %v6153_v49  ;;  %v800_v27 = vld [vmem:[#allocation2 + $0x13a] sm:$0xff] }
  0xf3   : > { %v6161_v6 = vpop.permute.xlu1 %6160  ;;  %v1937_v46 = vsel %vm1932_vm6, %v1904_v44, %v6127_v29  ;;  %v2004_v56 = vsel %vm1998_vm8, %v1971_v42, %v6148_v39  ;;  %v644_v35 = vld [vmem:[#allocation2 + $0x158] sm:$0xff] }
  0xf4   : > { %v6156_v37 = vpop.permute.xlu0 %6155  ;;  %v1970_v52 = vsel %vm1965_vm7, %v1937_v46, %v6137_v36  ;;  %v6163_v61 = vunpack.i.h.bf16 %v6161_v6  ;;  %v6162_v63 = vunpack.i.l.bf16 %v6161_v6  ;;  %v676_v44 = vld [vmem:[#allocation2 + $0x159] sm:$0xff]  ;;  %v7814_v41 = vpack.i.bf16 %v644_v35, %v643_v33 }
  0xf5   : > { %6450 = vrot.lane.b32.xlu1 %v7712_v10, %s7168_s16  ;;  %v6158_v43 = vunpack.i.h.bf16 %v6156_v37  ;;  %v6157_v45 = vunpack.i.l.bf16 %v6156_v37  ;;  %v675_v37 = vld [vmem:[#allocation2 + $0x151] sm:$0xff] }
  0xf6   : > { %6445 = vrot.lane.b32.xlu0 %v7662_v30, %s7168_s16  ;;  %v2003_v30 = vsel %vm1998_vm8, %v1970_v52, %v6147_v40  ;;  %v2039_v19 = vsel %vm2031_vm9, %v2006_v16, %v6163_v61 }
  0xf7   : > { %v7750_v51 = vpop.permute.xlu1 %6170  ;;  %v2036_v1 = vsel %vm2031_vm9, %v2003_v30, %v6157_v45  ;;  %v2037_v2 = vsel %vm2031_vm9, %v2004_v56, %v6158_v43  ;;  %v740_v43 = vld [vmem:[#allocation2 + $0x168] sm:$0xff]  ;;  %v741_v45 = vld [vmem:[#allocation2 + $0x170] sm:$0xff] }
  0xf8   : > { %v6166_v55 = vpop.permute.xlu0 %6165  ;;  %v6173_v46 = vunpack.i.h.bf16 %v7750_v51  ;;  %v6172_v21 = vunpack.i.l.bf16 %v7750_v51 }
  0xf9   : > { %v6168_v57 = vunpack.i.h.bf16 %v6166_v55  ;;  %v6167_v58 = vunpack.i.l.bf16 %v6166_v55  ;;  %6460 = vrot.lane.b32.xlu1 %v7714_v13, %s7169_s22 }
  0xfa   : > { %6455 = vrot.lane.b32.xlu0 %v7686_v48, %s7169_s22  ;;  %v2005_v48 = vsel %vm1998_vm8, %v1972_v11, %v6152_v54  ;;  %v7822_v54 = vpack.i.bf16 %v676_v44, %v675_v37  ;;  %v1842_v4 = vsel %vm400_vm0, %v7062_v3, %v6172_v21 }
  0xfb   : > { %v2069_v8 = vsel %vm2064_vm10, %v2036_v1, %v6167_v58  ;;  %v2070_v9 = vsel %vm2064_vm10, %v2037_v2, %v6168_v57  ;;  %v7768_v7 = vpop.permute.xlu1 %6180  ;;  %v2038_v18 = vsel %vm2031_vm9, %v2005_v48, %v6162_v63  ;;  %v7824_v57 = vpack.i.bf16 %v708_v34, %v707_v38  ;;  %v7061_v1 = vld [vmem:[#allocation2 + $0x68] sm:$0xff]  ;;  %v773_v34 = vld [vmem:[#allocation2 + $0x171] sm:$0xff] }
  0xfc   : > { %v6176_v12 = vpop.permute.xlu0 %6175  ;;  %v2099_v15 = vpack.c.bf16 %v2070_v9, %v2069_v8  ;;  %v6183_v39 = vunpack.i.h.bf16 %v7768_v7  ;;  %v6182_v40 = vunpack.i.l.bf16 %v7768_v7  ;;  %v7826_v58 = vpack.i.bf16 %v741_v45, %v740_v43 }
  0xfd   : > { %v6178_v17 = vunpack.i.h.bf16 %v6176_v12  ;;  %v6177_v31 = vunpack.i.l.bf16 %v6176_v12  ;;  %6470 = vrot.lane.b32.xlu1 %v7716_v14, %s7171_s24  ;;  %v1843_v2 = vsel %vm400_vm0, %v7061_v1, %v6173_v46 }
  0xfe   : > { %6465 = vrot.lane.b32.xlu0 %v7704_v59, %s7171_s24  ;;  %5894 = vmatprep.mubr.msk.bf16.mxu0 %vm2127_vm11, %v2099_v15  ;;  %v801_v59 = vld [vmem:[#allocation2 + $0x142] sm:$0xff]  ;;  %v1845_v51 = vsel %vm400_vm0, %v7059_v53, %v6183_v39  ;;  %v1844_v61 = vsel %vm400_vm0, %v7060_v60, %v6182_v40 }
  0xff   : > { %v2072_v20 = vsel %vm2064_vm10, %v2039_v19, %v6178_v17  ;;  %v2071_v22 = vsel %vm2064_vm10, %v2038_v18, %v6177_v31  ;;  %v6191_v23 = vpop.permute.xlu1 %6190  ;;  %v7796_v29 = vpack.i.bf16 %v801_v59, %v800_v27 }
 0x100   : > { %v6186_v24 = vpop.permute.xlu0 %6185  ;;  %v2100_v25 = vpack.c.bf16 %v2072_v20, %v2071_v22  ;;  %v6193_v47 = vunpack.i.h.bf16 %v6191_v23  ;;  %v6192_v50 = vunpack.i.l.bf16 %v6191_v23 }
 0x101   : > { %6480 = vrot.lane.b32.xlu1 %v7772_v5, %s7172_s30  ;;  %v6188_v52 = vunpack.i.h.bf16 %v6186_v24  ;;  %v6187_v42 = vunpack.i.l.bf16 %v6186_v24 }
 0x102   : > { %6475 = vrot.lane.b32.xlu0 %v7712_v10, %s7172_s30  ;;  %5895 = vmatmul.mubr.msk.bf16.gmra.mxu0 %vm2127_vm11, %v2100_v25  ;;  %v1877_v8 = vsel %vm1866_vm4, %v1844_v61, %v6192_v50  ;;  %v1878_v9 = vsel %vm1866_vm4, %v1845_v51, %v6193_v47 }
 0x103   : > { %v6201_v26 = vpop.permute.xlu1 %6200  ;;  %v1876_v7 = vsel %vm1866_vm4, %v1843_v2, %v6188_v52  ;;  %v1875_v11 = vsel %vm1866_vm4, %v1842_v4, %v6187_v42 }
 0x104   : > { %v7790_v28 = vpop.permute.xlu0 %6195  ;;  %v6203_v55 = vunpack.i.h.bf16 %v6201_v26  ;;  %v6202_v30 = vunpack.i.l.bf16 %v6201_v26 }
 0x105   : > { %6490 = vrot.lane.b32.xlu1 %v7712_v10, %s7166_s14  ;;  %v6197_v63 = vunpack.i.l.bf16 %v7790_v28 }
 0x106   : > { %6485 = vrot.lane.b32.xlu0 %v7714_v13, %s7173_s25  ;;  %v1910_v48 = vsel %vm1899_vm5, %v1877_v8, %v6202_v30  ;;  %v1911_v16 = vsel %vm1899_vm5, %v1878_v9, %v6203_v55 }
 0x107   : > { %v7798_v6 = vpop.permute.xlu1 %6210 }
 0x108   : > { %v7800_v32 = vpop.permute.xlu0 %6205  ;;  %v6213_v23 = vunpack.i.h.bf16 %v7798_v6  ;;  %v6212_v24 = vunpack.i.l.bf16 %v7798_v6 }
 0x109   : > { %6500 = vrot.lane.b32.xlu1 %v7772_v5, %s7166_s14  ;;  %v6208_v62 = vunpack.i.h.bf16 %v7800_v32  ;;  %v6207_v12 = vunpack.i.l.bf16 %v7800_v32 }
 0x10a   : > { %6495 = vrot.lane.b32.xlu0 %v7796_v29, %s7173_s25  ;;  %v1943_v47 = vsel %vm1932_vm6, %v1910_v48, %v6212_v24  ;;  %v1944_v50 = vsel %vm1932_vm6, %v1911_v16, %v6213_v23  ;;  %v647_v16 = vld [vmem:[#allocation2 + $0x180] sm:$0xff] }
 0x10b   : > { %v7806_v36 = vpop.permute.xlu1 %6220 }
 0x10c   : > { %v7808_v10 = vpop.permute.xlu0 %6215  ;;  %v6222_v32 = vunpack.i.l.bf16 %v7806_v36 }
 0x10d   : > { %6510 = vrot.lane.b32.xlu1 %v7796_v29, %s7165_s13  ;;  %v6218_v17 = vunpack.i.h.bf16 %v7808_v10  ;;  %v6217_v31 = vunpack.i.l.bf16 %v7808_v10 }
 0x10e   : > { %6505 = vrot.lane.b32.xlu0 %v7714_v13, %s7165_s13  ;;  %v6198_v13 = vunpack.i.h.bf16 %v7790_v28  ;;  %v6223_v28 = vunpack.i.h.bf16 %v7806_v36  ;;  %v772_v36 = vld [vmem:[#allocation2 + $0x169] sm:$0xff]  ;;  %v1976_v55 = vsel %vm1965_vm7, %v1943_v47, %v6222_v32 }
 0x10f   : > { %v7820_v49 = vpop.permute.xlu1 %6230  ;;  %v7882_v51 = vpack.i.bf16 %v773_v34, %v772_v36  ;;  %v535_v32 = vld [vmem:[#allocation2 + $0xa8] sm:$0xff] }
 0x110   : > { %v6226_v56 = vpop.permute.xlu0 %6225  ;;  %v1909_v19 = vsel %vm1899_vm5, %v1876_v7, %v6198_v13  ;;  %v6233_v6 = vunpack.i.h.bf16 %v7820_v49  ;;  %v6232_v37 = vunpack.i.l.bf16 %v7820_v49  ;;  %v1977_v30 = vsel %vm1965_vm7, %v1944_v50, %v6223_v28  ;;  %v804_v7 = vld [vmem:[#allocation2 + $0x16a] sm:$0xff] }
 0x111   : > { %6520 = vrot.lane.b32.xlu1 %v7814_v41, %s7167_s15  ;;  %v6228_v20 = vunpack.i.h.bf16 %v6226_v56  ;;  %v6227_v22 = vunpack.i.l.bf16 %v6226_v56  ;;  %v1942_v59 = vsel %vm1932_vm6, %v1909_v19, %v6208_v62  ;;  %v711_v19 = vld [vmem:[#allocation2 + $0x182] sm:$0xff] }
 0x112   : > { %6515 = vrot.lane.b32.xlu0 %v7716_v14, %s7167_s15  ;;  %v1908_v14 = vsel %vm1899_vm5, %v1875_v11, %v6197_v63  ;;  %v1975_v10 = vsel %vm1965_vm7, %v1942_v59, %v6218_v17  ;;  %v2010_v60 = vsel %vm1998_vm8, %v1977_v30, %v6233_v6  ;;  %v805_v11 = vld [vmem:[#allocation2 + $0x172] sm:$0xff]  ;;  %v648_v17 = vld [vmem:[#allocation2 + $0x188] sm:$0xff] }
 0x113   : > { %v6241_v15 = vpop.permute.xlu1 %6240  ;;  %v1941_v27 = vsel %vm1932_vm6, %v1908_v14, %v6207_v12  ;;  %v2008_v38 = vsel %vm1998_vm8, %v1975_v10, %v6228_v20  ;;  %v7912_v12 = vpack.i.bf16 %v805_v11, %v804_v7  ;;  %v680_v14 = vld [vmem:[#allocation2 + $0x189] sm:$0xff]  ;;  %v534_v59 = vld [vmem:[#allocation2 + $0x98] sm:$0xff] }
 0x114   : > { %v6236_v18 = vpop.permute.xlu0 %6235  ;;  %v1974_v35 = vsel %vm1965_vm7, %v1941_v27, %v6217_v31  ;;  %v6243_v43 = vunpack.i.h.bf16 %v6241_v15  ;;  %v6242_v45 = vunpack.i.l.bf16 %v6241_v15  ;;  %v679_v31 = vld [vmem:[#allocation2 + $0x181] sm:$0xff]  ;;  %v712_v20 = vld [vmem:[#allocation2 + $0x18a] sm:$0xff] }
 0x115   : > { %6530 = vrot.lane.b32.xlu1 %v7822_v54, %s7168_s16  ;;  %v6238_v25 = vunpack.i.h.bf16 %v6236_v18  ;;  %v6237_v26 = vunpack.i.l.bf16 %v6236_v18  ;;  %v7955_v27 = vld [vmem:[#allocation2 + $0x1a0] sm:$0xff] }
 0x116   : > { %6525 = vrot.lane.b32.xlu0 %v7772_v5, %s7168_s16  ;;  %v2007_v5 = vsel %vm1998_vm8, %v1974_v35, %v6227_v22  ;;  %v2043_v1 = vsel %vm2031_vm9, %v2010_v60, %v6243_v43  ;;  %v536_v35 = vld [vmem:[#allocation2 + $0xb0] sm:$0xff] }
 0x117   : > { %v7860_v33 = vpop.permute.xlu1 %6250  ;;  %v2040_v46 = vsel %vm2031_vm9, %v2007_v5, %v6237_v26  ;;  %v2041_v21 = vsel %vm2031_vm9, %v2008_v38, %v6238_v25  ;;  %v7951_v25 = vpack.i.bf16 %v648_v17, %v647_v16  ;;  %v7953_v26 = vld [vmem:[#allocation2 + $0x198] sm:$0xff] }
 0x118   : > { %v6246_v44 = vpop.permute.xlu0 %6245  ;;  %v6253_v22 = vunpack.i.h.bf16 %v7860_v33  ;;  %v6252_v28 = vunpack.i.l.bf16 %v7860_v33 }
 0x119   : > { %v6248_v39 = vunpack.i.h.bf16 %v6246_v44  ;;  %v6247_v40 = vunpack.i.l.bf16 %v6246_v44  ;;  %6540 = vrot.lane.b32.xlu1 %v7824_v57, %s7169_s22 }
 0x11a   : > { %6535 = vrot.lane.b32.xlu0 %v7796_v29, %s7169_s22  ;;  %v2009_v29 = vsel %vm1998_vm8, %v1976_v55, %v6232_v37  ;;  %v533_v37 = vld [vmem:[#allocation2 + $0x90] sm:$0xff] }
 0x11b   : > { %v2073_v52 = vsel %vm2064_vm10, %v2040_v46, %v6247_v40  ;;  %v2074_v42 = vsel %vm2064_vm10, %v2041_v21, %v6248_v39  ;;  %v7878_v49 = vpop.permute.xlu1 %6260  ;;  %v2042_v63 = vsel %vm2031_vm9, %v2009_v29, %v6242_v45  ;;  %v7966_v39 = vpack.i.bf16 %v680_v14, %v679_v31 }
 0x11c   : > { %v6256_v56 = vpop.permute.xlu0 %6255  ;;  %v2101_v53 = vpack.c.bf16 %v2074_v42, %v2073_v52  ;;  %v6263_v23 = vunpack.i.h.bf16 %v7878_v49  ;;  %v6262_v24 = vunpack.i.l.bf16 %v7878_v49  ;;  %v7968_v40 = vpack.i.bf16 %v712_v20, %v711_v19 }
 0x11d   : > { %v6258_v61 = vunpack.i.h.bf16 %v6256_v56  ;;  %v6257_v13 = vunpack.i.l.bf16 %v6256_v56  ;;  %6550 = vrot.lane.b32.xlu1 %v7826_v58, %s7171_s24  ;;  %v1847_v45 = vsel %vm400_vm0, %v534_v59, %v6253_v22  ;;  %v1846_v50 = vsel %vm400_vm0, %v533_v37, %v6252_v28 }
 0x11e   : > { %6545 = vrot.lane.b32.xlu0 %v7814_v41, %s7171_s24  ;;  %5898 = vmatprep.mubr.msk.bf16.mxu0 %vm2127_vm11, %v2101_v53  ;;  %v1849_v46 = vsel %vm400_vm0, %v536_v35, %v6263_v23  ;;  %v1848_v21 = vsel %vm400_vm0, %v535_v32, %v6262_v24  ;;  %v777_v23 = vld [vmem:[#allocation2 + $0x1a1] sm:$0xff] }
 0x11f   : > { %v2076_v2 = vsel %vm2064_vm10, %v2043_v1, %v6258_v61  ;;  %v2075_v3 = vsel %vm2064_vm10, %v2042_v63, %v6257_v13  ;;  %v7895_v4 = vpop.permute.xlu1 %6270 }
 0x120   : > { %v7897_v8 = vpop.permute.xlu0 %6265  ;;  %v2102_v9 = vpack.c.bf16 %v2076_v2, %v2075_v3  ;;  %v6273_v10 = vunpack.i.h.bf16 %v7895_v4  ;;  %v6272_v6 = vunpack.i.l.bf16 %v7895_v4 }
 0x121   : > { %6560 = vrot.lane.b32.xlu1 %v7882_v51, %s7172_s30  ;;  %v6268_v44 = vunpack.i.h.bf16 %v7897_v8  ;;  %v6267_v5 = vunpack.i.l.bf16 %v7897_v8 }
 0x122   : > { %6555 = vrot.lane.b32.xlu0 %v7822_v54, %s7172_s30  ;;  %5899 = vmatmul.mubr.msk.bf16.gmra.mxu0 %vm2127_vm11, %v2102_v9  ;;  %v1881_v52 = vsel %vm1866_vm4, %v1848_v21, %v6272_v6  ;;  %v1882_v42 = vsel %vm1866_vm4, %v1849_v46, %v6273_v10 }
 0x123   : > { %v7904_v41 = vpop.permute.xlu1 %6280  ;;  %v1880_v55 = vsel %vm1866_vm4, %v1847_v45, %v6268_v44  ;;  %v1879_v30 = vsel %vm1866_vm4, %v1846_v50, %v6267_v5  ;;  %v808_v50 = vld [vmem:[#allocation2 + $0x19a] sm:$0xff] }
 0x124   : > { %v7906_v62 = vpop.permute.xlu0 %6275  ;;  %v6283_v33 = vunpack.i.h.bf16 %v7904_v41  ;;  %v6282_v36 = vunpack.i.l.bf16 %v7904_v41 }
 0x125   : > { %6570 = vrot.lane.b32.xlu1 %v7822_v54, %s7166_s14  ;;  %v6277_v34 = vunpack.i.l.bf16 %v7906_v62  ;;  %v6278_v47 = vunpack.i.h.bf16 %v7906_v62 }
 0x126   : > { %6565 = vrot.lane.b32.xlu0 %v7824_v57, %s7173_s25  ;;  %v1914_v60 = vsel %vm1899_vm5, %v1881_v52, %v6282_v36  ;;  %v1915_v61 = vsel %vm1899_vm5, %v1882_v42, %v6283_v33  ;;  %v809_v52 = vld [vmem:[#allocation2 + $0x1a2] sm:$0xff] }
 0x127   : > { %v7914_v15 = vpop.permute.xlu1 %6290  ;;  %v1912_v13 = vsel %vm1899_vm5, %v1879_v30, %v6277_v34 }
 0x128   : > { %v7916_v48 = vpop.permute.xlu0 %6285  ;;  %v6293_v2 = vunpack.i.h.bf16 %v7914_v15  ;;  %v6292_v8 = vunpack.i.l.bf16 %v7914_v15 }
 0x129   : > { %6580 = vrot.lane.b32.xlu1 %v7882_v51, %s7166_s14  ;;  %v6287_v49 = vunpack.i.l.bf16 %v7916_v48  ;;  %v6288_v56 = vunpack.i.h.bf16 %v7916_v48  ;;  %s7174_s14 = smov 32  }
 0x12a   : > { %6575 = vrot.lane.b32.xlu0 %v7912_v12, %s7173_s25  ;;  %v1947_v35 = vsel %vm1932_vm6, %v1914_v60, %v6292_v8  ;;  %v1948_v10 = vsel %vm1932_vm6, %v1915_v61, %v6293_v2  ;;  %v538_v8 = vld [vmem:[#allocation2 + $0xc8] sm:$0xff] }
 0x12b   : > { %v7942_v54 = vpop.permute.xlu1 %6300  ;;  %v1945_v9 = vsel %vm1932_vm6, %v1912_v13, %v6287_v49 }
 0x12c   : > { %v7944_v18 = vpop.permute.xlu0 %6295  ;;  %v6303_v62 = vunpack.i.h.bf16 %v7942_v54  ;;  %v6302_v48 = vunpack.i.l.bf16 %v7942_v54  ;;  %v776_v54 = vld [vmem:[#allocation2 + $0x199] sm:$0xff] }
 0x12d   : > { %6590 = vrot.lane.b32.xlu1 %v7912_v12, %s7165_s13  ;;  %v6297_v53 = vunpack.i.l.bf16 %v7944_v18  ;;  %v6298_v63 = vunpack.i.h.bf16 %v7944_v18  ;;  %v6639_v34 = vpack.i.bf16 %v777_v23, %v776_v54 }
 0x12e   : > { %6585 = vrot.lane.b32.xlu0 %v7824_v57, %s7165_s13  ;;  %v6629_v57 = vpack.i.bf16 %v7955_v27, %v7953_v26  ;;  %v1980_v5 = vsel %vm1965_vm7, %v1947_v35, %v6302_v48  ;;  %v6649_v26 = vpack.i.bf16 %v809_v52, %v808_v50 }
 0x12f   : > { %v7964_v38 = vpop.permute.xlu1 %6310  ;;  %v1978_v16 = vsel %vm1965_vm7, %v1945_v9, %v6297_v53 }
 0x130   : > { %v6306_v43 = vpop.permute.xlu0 %6305  ;;  %v6313_v15 = vunpack.i.h.bf16 %v7964_v38  ;;  %v6312_v18 = vunpack.i.l.bf16 %v7964_v38  ;;  %v1981_v38 = vsel %vm1965_vm7, %v1948_v10, %v6303_v62 }
 0x131   : > { %6600 = vrot.lane.b32.xlu1 %v7951_v25, %s7167_s15  ;;  %v6308_v3 = vunpack.i.h.bf16 %v6306_v43  ;;  %v6307_v4 = vunpack.i.l.bf16 %v6306_v43 }
 0x132   : > { %6595 = vrot.lane.b32.xlu0 %v7826_v58, %s7167_s15  ;;  %v1913_v58 = vsel %vm1899_vm5, %v1880_v55, %v6278_v47  ;;  %v2013_v43 = vsel %vm1998_vm8, %v1980_v5, %v6312_v18  ;;  %s8974_s15 = smov 64  }
 0x133   : > { %v7991_v29 = vpop.permute.xlu1 %6320  ;;  %v1946_v11 = vsel %vm1932_vm6, %v1913_v58, %v6288_v56  ;;  %v540_v58 = vld [vmem:[#allocation2 + $0xe0] sm:$0xff] }
 0x134   : > { %v6316_v1 = vpop.permute.xlu0 %6315  ;;  %v1979_v31 = vsel %vm1965_vm7, %v1946_v11, %v6298_v63  ;;  %v6323_v24 = vunpack.i.h.bf16 %v7991_v29  ;;  %v6322_v59 = vunpack.i.l.bf16 %v7991_v29 }
 0x135   : > { %6610 = vrot.lane.b32.xlu1 %v7966_v39, %s7168_s16  ;;  %v6318_v41 = vunpack.i.h.bf16 %v6316_v1  ;;  %v6317_v7 = vunpack.i.l.bf16 %v6316_v1  ;;  %v2012_v19 = vsel %vm1998_vm8, %v1979_v31, %v6308_v3  ;;  %v539_v1 = vld [vmem:[#allocation2 + $0xd8] sm:$0xff] }
 0x136   : > { %6605 = vrot.lane.b32.xlu0 %v7882_v51, %s7168_s16  ;;  %v2011_v51 = vsel %vm1998_vm8, %v1978_v16, %v6307_v4  ;;  %v2046_v21 = vsel %vm2031_vm9, %v2013_v43, %v6322_v59  ;;  %v537_v4 = vld [vmem:[#allocation2 + $0xc0] sm:$0xff]  ;;  %s5521_s16 = sshll.u32 %s7262_s21, 12  ;;  %s7180_s21 = smov [#allocation11]  }
 0x137   : > { %v8009_v17 = vpop.permute.xlu1 %6330  ;;  %v2044_v28 = vsel %vm2031_vm9, %v2011_v51, %v6317_v7  ;;  %v2045_v32 = vsel %vm2031_vm9, %v2012_v19, %v6318_v41  ;;  %s7099_s13 = sshll.u32 %s7180_s21, 4  ;;  %s7100_s13 = int_to_ptr.vmem [resolvable:$false] %s7099_s13 }
 0x138   : > { %v6326_v14 = vpop.permute.xlu0 %6325  ;;  %v6333_v63 = vunpack.i.h.bf16 %v8009_v17 }
 0x139   : > { %v6328_v20 = vunpack.i.h.bf16 %v6326_v14  ;;  %v6327_v22 = vunpack.i.l.bf16 %v6326_v14  ;;  %6620 = vrot.lane.b32.xlu1 %v7968_v40, %s7169_s22 }
 0x13a   : > { %6615 = vrot.lane.b32.xlu0 %v7912_v12, %s7169_s22  ;;  %v2014_v12 = vsel %vm1998_vm8, %v1981_v38, %v6313_v15  ;;  %s3107_s22 = sadd.s32 1964635914, %s5521_s16  ;;  %s7101_s16 = scalar_lea.vmem %s7100_s13, 32 }
 0x13b   : > { %v2077_v6 = vsel %vm2064_vm10, %v2044_v28, %v6327_v22  ;;  %v2078_v37 = vsel %vm2064_vm10, %v2045_v32, %v6328_v20  ;;  %v6341_v44 = vpop.permute.xlu1 %6340  ;;  %v2047_v47 = vsel %vm2031_vm9, %v2014_v12, %v6323_v24 }
 0x13c   : > { %v6336_v33 = vpop.permute.xlu0 %6335  ;;  %v2103_v36 = vpack.c.bf16 %v2078_v37, %v2077_v6  ;;  %v6343_v61 = vunpack.i.h.bf16 %v6341_v44  ;;  %v6342_v13 = vunpack.i.l.bf16 %v6341_v44 }
 0x13d   : > { %v6338_v45 = vunpack.i.h.bf16 %v6336_v33  ;;  %v6337_v46 = vunpack.i.l.bf16 %v6336_v33  ;;  %6630 = vrot.lane.b32.xlu1 %v6629_v57, %s7171_s24 }
 0x13e   : > { %6625 = vrot.lane.b32.xlu0 %v7951_v25, %s7171_s24  ;;  %5902 = vmatprep.mubr.msk.bf16.mxu0 %vm2127_vm11, %v2103_v36  ;;  %v1853_v48 = vsel %vm400_vm0, %v540_v58, %v6343_v61  ;;  %v1852_v16 = vsel %vm400_vm0, %v539_v1, %v6342_v13  ;;  %s8983_s24 = smov 96  }
 0x13f   : > { %v2080_v42 = vsel %vm2064_vm10, %v2047_v47, %v6338_v45  ;;  %v2079_v49 = vsel %vm2064_vm10, %v2046_v21, %v6337_v46  ;;  %v6351_v55 = vpop.permute.xlu1 %6350 }
 0x140   : > { %v6346_v30 = vpop.permute.xlu0 %6345  ;;  %v2104_v56 = vpack.c.bf16 %v2080_v42, %v2079_v49  ;;  %v6353_v2 = vunpack.i.h.bf16 %v6351_v55  ;;  %v6352_v3 = vunpack.i.l.bf16 %v6351_v55 }
 0x141   : > { %6640 = vrot.lane.b32.xlu1 %v6639_v34, %s7172_s30  ;;  %v6348_v9 = vunpack.i.h.bf16 %v6346_v30 }
 0x142   : > { %6635 = vrot.lane.b32.xlu0 %v7966_v39, %s7172_s30  ;;  %5903 = vmatmul.mubr.msk.bf16.gmra.mxu0 %vm2127_vm11, %v2104_v56  ;;  %v6332_v39 = vunpack.i.l.bf16 %v8009_v17  ;;  %v1851_v17 = vsel %vm400_vm0, %v538_v8, %v6333_v63  ;;  %v1885_v14 = vsel %vm1866_vm4, %v1852_v16, %v6352_v3  ;;  %v1886_v51 = vsel %vm1866_vm4, %v1853_v48, %v6353_v2  ;;  %s8972_s30 = smov 96  }
 0x143   : > { %v6361_v25 = vpop.permute.xlu1 %6360  ;;  %v1884_v19 = vsel %vm1866_vm4, %v1851_v17, %v6348_v9 }
 0x144   : > { %v6356_v27 = vpop.permute.xlu0 %6355  ;;  %v6363_v7 = vunpack.i.h.bf16 %v6361_v25  ;;  %v6362_v11 = vunpack.i.l.bf16 %v6361_v25  ;;  %v1850_v18 = vsel %vm400_vm0, %v537_v4, %v6332_v39 }
 0x145   : > { %6650 = vrot.lane.b32.xlu1 %v6649_v26, %s7173_s25  ;;  %v6358_v31 = vunpack.i.h.bf16 %v6356_v27  ;;  %v6357_v15 = vunpack.i.l.bf16 %v6356_v27 }
 0x146   : > { %6645 = vrot.lane.b32.xlu0 %v7968_v40, %s7173_s25  ;;  %v6347_v40 = vunpack.i.l.bf16 %v6346_v30  ;;  %v1918_v24 = vsel %vm1899_vm5, %v1885_v14, %v6362_v11  ;;  %v1919_v59 = vsel %vm1899_vm5, %v1886_v51, %v6363_v7 }
 0x147   : > { %v8070_v57 = vpop.permute.xlu1 %6370  ;;  %v1917_v6 = vsel %vm1899_vm5, %v1884_v19, %v6358_v31 }
 0x148   : > { %v6366_v53 = vpop.permute.xlu0 %6365  ;;  %v1883_v20 = vsel %vm1866_vm4, %v1850_v18, %v6347_v40  ;;  %v6373_v5 = vunpack.i.h.bf16 %v8070_v57  ;;  %v6372_v38 = vunpack.i.l.bf16 %v8070_v57 }
 0x149   : > { %v6368_v22 = vunpack.i.h.bf16 %v6366_v53  ;;  %v6367_v54 = vunpack.i.l.bf16 %v6366_v53  ;;  %v1916_v10 = vsel %vm1899_vm5, %v1883_v20, %v6357_v15 }
 0x14a   : > { %v1951_v53 = vsel %vm1932_vm6, %v1918_v24, %v6372_v38 }
 0x14b   : > { %v8072_v29 = vpop.permute.xlu1 %6380  ;;  %v1949_v34 = vsel %vm1932_vm6, %v1916_v10, %v6367_v54  ;;  %v1950_v43 = vsel %vm1932_vm6, %v1917_v6, %v6368_v22  ;;  %v543_v54 = vld [vmem:[#allocation2 + $0x108] sm:$0xff] }
 0x14c   : > { %v6376_v60 = vpop.permute.xlu0 %6375  ;;  %v6383_v12 = vunpack.i.h.bf16 %v8072_v29  ;;  %v6382_v45 = vunpack.i.l.bf16 %v8072_v29  ;;  %v1952_v29 = vsel %vm1932_vm6, %v1919_v59, %v6373_v5 }
 0x14d   : > { %v6378_v28 = vunpack.i.h.bf16 %v6376_v60  ;;  %v6377_v32 = vunpack.i.l.bf16 %v6376_v60 }
 0x14e   : > { %v1984_v63 = vsel %vm1965_vm7, %v1951_v53, %v6382_v45  ;;  %v1985_v39 = vsel %vm1965_vm7, %v1952_v29, %v6383_v12 }
 0x14f   : > { %v6391_v41 = vpop.permute.xlu1 %6390  ;;  %v1982_v21 = vsel %vm1965_vm7, %v1949_v34, %v6377_v32  ;;  %v1983_v47 = vsel %vm1965_vm7, %v1950_v43, %v6378_v28  ;;  %v541_v28 = vld [vmem:[#allocation2 + $0xf0] sm:$0xff]  ;;  %v542_v32 = vld [vmem:[#allocation2 + $0xf8] sm:$0xff] }
 0x150   : > { %v6386_v62 = vpop.permute.xlu0 %6385  ;;  %v6393_v50 = vunpack.i.h.bf16 %v6391_v41  ;;  %v6392_v52 = vunpack.i.l.bf16 %v6391_v41 }
 0x151   : > { %v6388_v37 = vunpack.i.h.bf16 %v6386_v62  ;;  %v6387_v44 = vunpack.i.l.bf16 %v6386_v62 }
 0x152   : > { %v2017_v2 = vsel %vm1998_vm8, %v1984_v63, %v6392_v52  ;;  %v2018_v3 = vsel %vm1998_vm8, %v1985_v39, %v6393_v50 }
 0x153   : > { %v6401_v23 = vpop.permute.xlu1 %6400  ;;  %v2015_v49 = vsel %vm1998_vm8, %v1982_v21, %v6387_v44  ;;  %v2016_v55 = vsel %vm1998_vm8, %v1983_v47, %v6388_v37 }
 0x154   : > { %v6396_v35 = vpop.permute.xlu0 %6395  ;;  %v6403_v26 = vunpack.i.h.bf16 %v6401_v23  ;;  %v6402_v25 = vunpack.i.l.bf16 %v6401_v23  ;;  %v544_v23 = vld [vmem:[#allocation2 + $0x110] sm:$0xff] }
 0x155   : > { %v6398_v33 = vunpack.i.h.bf16 %v6396_v35  ;;  %v6397_v36 = vunpack.i.l.bf16 %v6396_v35 }
 0x156   : > { %v2050_v9 = vsel %vm2031_vm9, %v2017_v2, %v6402_v25  ;;  %v2051_v40 = vsel %vm2031_vm9, %v2018_v3, %v6403_v26 }
 0x157   : > { %v8094_v46 = vpop.permute.xlu1 %6410  ;;  %v2048_v27 = vsel %vm2031_vm9, %v2015_v49, %v6397_v36  ;;  %v2049_v57 = vsel %vm2031_vm9, %v2016_v55, %v6398_v33 }
 0x158   : > { %v6406_v42 = vpop.permute.xlu0 %6405  ;;  %v6413_v20 = vunpack.i.h.bf16 %v8094_v46  ;;  %v6412_v22 = vunpack.i.l.bf16 %v8094_v46 }
 0x159   : > { %v6408_v30 = vunpack.i.h.bf16 %v6406_v42  ;;  %v6407_v56 = vunpack.i.l.bf16 %v6406_v42 }
 0x15a   : > { %v1855_v43 = vsel %vm400_vm0, %v542_v32, %v6413_v20  ;;  %v1854_v12 = vsel %vm400_vm0, %v541_v28, %v6412_v22 }
 0x15b   : > { %v2081_v60 = vsel %vm2064_vm10, %v2048_v27, %v6407_v56  ;;  %v2082_v61 = vsel %vm2064_vm10, %v2049_v57, %v6408_v30  ;;  %v6421_v13 = vpop.permute.xlu1 %6420 }
 0x15c   : > { %v2105_v1 = vpack.c.bf16 %v2082_v61, %v2081_v60  ;;  %v6416_v58 = vpop.permute.xlu0 %6415  ;;  %v6423_v51 = vunpack.i.h.bf16 %v6421_v13  ;;  %v6422_v19 = vunpack.i.l.bf16 %v6421_v13 }
 0x15d   : > { %v6418_v4 = vunpack.i.h.bf16 %v6416_v58  ;;  %v6417_v8 = vunpack.i.l.bf16 %v6416_v58 }
 0x15e   : > { %5906 = vmatprep.mubr.msk.bf16.mxu0 %vm2127_vm11, %v2105_v1  ;;  %v1857_v38 = vsel %vm400_vm0, %v544_v23, %v6423_v51  ;;  %v1856_v33 = vsel %vm400_vm0, %v543_v54, %v6422_v19 }
 0x15f   : > { %v2084_v41 = vsel %vm2064_vm10, %v2051_v40, %v6418_v4  ;;  %v2083_v7 = vsel %vm2064_vm10, %v2050_v9, %v6417_v8  ;;  %v6431_v11 = vpop.permute.xlu1 %6430 }
 0x160   : > { %v2106_v62 = vpack.c.bf16 %v2084_v41, %v2083_v7  ;;  %v6426_v48 = vpop.permute.xlu0 %6425  ;;  %v6433_v24 = vunpack.i.h.bf16 %v6431_v11  ;;  %v6432_v59 = vunpack.i.l.bf16 %v6431_v11 }
 0x161   : > { %v6428_v35 = vunpack.i.h.bf16 %v6426_v48  ;;  %v6427_v10 = vunpack.i.l.bf16 %v6426_v48 }
 0x162   : > { %5907 = vmatmul.mubr.msk.bf16.gmra.mxu0 %vm2127_vm11, %v2106_v62  ;;  %v1889_v45 = vsel %vm1866_vm4, %v1856_v33, %v6432_v59  ;;  %v1890_v46 = vsel %vm1866_vm4, %v1857_v38, %v6433_v24 }
 0x163   : > { %v6441_v16 = vpop.permute.xlu1 %6440  ;;  %v1888_v21 = vsel %vm1866_vm4, %v1855_v43, %v6428_v35  ;;  %v1887_v47 = vsel %vm1866_vm4, %v1854_v12, %v6427_v10 }
 0x164   : > { %v6436_v31 = vpop.permute.xlu0 %6435  ;;  %v6443_v37 = vunpack.i.h.bf16 %v6441_v16  ;;  %v6442_v44 = vunpack.i.l.bf16 %v6441_v16 }
 0x165   : > { %v6438_v36 = vunpack.i.h.bf16 %v6436_v31  ;;  %v6437_v34 = vunpack.i.l.bf16 %v6436_v31 }
 0x166   : > { %v1922_v49 = vsel %vm1899_vm5, %v1889_v45, %v6442_v44  ;;  %v1923_v55 = vsel %vm1899_vm5, %v1890_v46, %v6443_v37 }
 0x167   : > { %v8116_v15 = vpop.permute.xlu1 %6450  ;;  %v1920_v25 = vsel %vm1899_vm5, %v1887_v47, %v6437_v34  ;;  %v1921_v27 = vsel %vm1899_vm5, %v1888_v21, %v6438_v36 }
 0x168   : > { %v6446_v17 = vpop.permute.xlu0 %6445  ;;  %v6453_v29 = vunpack.i.h.bf16 %v8116_v15  ;;  %v6452_v60 = vunpack.i.l.bf16 %v8116_v15 }
 0x169   : > { %v6448_v50 = vunpack.i.h.bf16 %v6446_v17  ;;  %v6447_v52 = vunpack.i.l.bf16 %v6446_v17 }
 0x16a   : > { %v1955_v17 = vsel %vm1932_vm6, %v1922_v49, %v6452_v60  ;;  %v545_v49 = vld [vmem:[#allocation2 + $0x120] sm:$0xff]  ;;  %v7064_v60 = vld [vmem:[#allocation2 + $0x138] sm:$0xff] }
 0x16b   : > { %v8118_v18 = vpop.permute.xlu1 %6460  ;;  %v1953_v63 = vsel %vm1932_vm6, %v1920_v25, %v6447_v52  ;;  %v1954_v39 = vsel %vm1932_vm6, %v1921_v27, %v6448_v50 }
 0x16c   : > { %v6456_v14 = vpop.permute.xlu0 %6455  ;;  %v6463_v1 = vunpack.i.h.bf16 %v8118_v18  ;;  %v6462_v58 = vunpack.i.l.bf16 %v8118_v18  ;;  %v1956_v18 = vsel %vm1932_vm6, %v1923_v55, %v6453_v29  ;;  %v546_v55 = vld [vmem:[#allocation2 + $0x128] sm:$0xff] }
 0x16d   : > { %v6458_v30 = vunpack.i.h.bf16 %v6456_v14  ;;  %v6457_v56 = vunpack.i.l.bf16 %v6456_v14 }
 0x16e   : > { %v1988_v20 = vsel %vm1965_vm7, %v1955_v17, %v6462_v58  ;;  %v1989_v22 = vsel %vm1965_vm7, %v1956_v18, %v6463_v1 }
 0x16f   : > { %v6471_v6 = vpop.permute.xlu1 %6470  ;;  %v1986_v3 = vsel %vm1965_vm7, %v1953_v63, %v6457_v56  ;;  %v1987_v4 = vsel %vm1965_vm7, %v1954_v39, %v6458_v30 }
 0x170   : > { %v6466_v5 = vpop.permute.xlu0 %6465  ;;  %v6473_v8 = vunpack.i.h.bf16 %v6471_v6  ;;  %v6472_v9 = vunpack.i.l.bf16 %v6471_v6 }
 0x171   : > { %v6468_v57 = vunpack.i.h.bf16 %v6466_v5  ;;  %v6467_v53 = vunpack.i.l.bf16 %v6466_v5 }
 0x172   : > { %v2021_v24 = vsel %vm1998_vm8, %v1988_v20, %v6472_v9  ;;  %v2022_v59 = vsel %vm1998_vm8, %v1989_v22, %v6473_v8 }
 0x173   : > { %v6481_v42 = vpop.permute.xlu1 %6480  ;;  %v2019_v41 = vsel %vm1998_vm8, %v1986_v3, %v6467_v53  ;;  %v2020_v7 = vsel %vm1998_vm8, %v1987_v4, %v6468_v57  ;;  %v7063_v53 = vld [vmem:[#allocation2 + $0x140] sm:$0xff] }
 0x174   : > { %v6476_v26 = vpop.permute.xlu0 %6475  ;;  %v6483_v48 = vunpack.i.h.bf16 %v6481_v42  ;;  %v6482_v16 = vunpack.i.l.bf16 %v6481_v42 }
 0x175   : > { %v6478_v61 = vunpack.i.h.bf16 %v6476_v26  ;;  %v6477_v13 = vunpack.i.l.bf16 %v6476_v26 }
 0x176   : > { %v2054_v35 = vsel %vm2031_vm9, %v2021_v24, %v6482_v16  ;;  %v2055_v10 = vsel %vm2031_vm9, %v2022_v59, %v6483_v48 }
 0x177   : > { %v8140_v2 = vpop.permute.xlu1 %6490  ;;  %v2052_v31 = vsel %vm2031_vm9, %v2019_v41, %v6477_v13  ;;  %v2053_v15 = vsel %vm2031_vm9, %v2020_v7, %v6478_v61 }
 0x178   : > { %v6486_v40 = vpop.permute.xlu0 %6485  ;;  %v6493_v47 = vunpack.i.h.bf16 %v8140_v2  ;;  %v6492_v50 = vunpack.i.l.bf16 %v8140_v2 }
 0x179   : > { %v6488_v11 = vunpack.i.h.bf16 %v6486_v40  ;;  %v6487_v62 = vunpack.i.l.bf16 %v6486_v40 }
 0x17a   : > { %v1859_v39 = vsel %vm400_vm0, %v546_v55, %v6493_v47  ;;  %v1858_v1 = vsel %vm400_vm0, %v545_v49, %v6492_v50 }
 0x17b   : > { %v2085_v14 = vsel %vm2064_vm10, %v2052_v31, %v6487_v62  ;;  %v2086_v51 = vsel %vm2064_vm10, %v2053_v15, %v6488_v11  ;;  %v6501_v19 = vpop.permute.xlu1 %6500 }
 0x17c   : > { %v2107_v54 = vpack.c.bf16 %v2086_v51, %v2085_v14  ;;  %v6496_v23 = vpop.permute.xlu0 %6495  ;;  %v6503_v46 = vunpack.i.h.bf16 %v6501_v19  ;;  %v6502_v21 = vunpack.i.l.bf16 %v6501_v19 }
 0x17d   : > { %v6498_v28 = vunpack.i.h.bf16 %v6496_v23  ;;  %v6497_v32 = vunpack.i.l.bf16 %v6496_v23 }
 0x17e   : > { %5910 = vmatprep.mubr.msk.bf16.mxu0 %vm2127_vm11, %v2107_v54  ;;  %v1861_v29 = vsel %vm400_vm0, %v7063_v53, %v6503_v46  ;;  %v1860_v61 = vsel %vm400_vm0, %v7064_v60, %v6502_v21 }
 0x17f   : > { %v2088_v6 = vsel %vm2064_vm10, %v2055_v10, %v6498_v28  ;;  %v2087_v37 = vsel %vm2064_vm10, %v2054_v35, %v6497_v32  ;;  %v6511_v44 = vpop.permute.xlu1 %6510 }
 0x180   : > { %v2108_v5 = vpack.c.bf16 %v2088_v6, %v2087_v37  ;;  %v6506_v38 = vpop.permute.xlu0 %6505  ;;  %v6513_v52 = vunpack.i.h.bf16 %v6511_v44  ;;  %v6512_v42 = vunpack.i.l.bf16 %v6511_v44 }
 0x181   : > { %v6508_v30 = vunpack.i.h.bf16 %v6506_v38  ;;  %v6507_v56 = vunpack.i.l.bf16 %v6506_v38 }
 0x182   : > { %5911 = vmatmul.mubr.msk.bf16.gmra.mxu0 %vm2127_vm11, %v2108_v5  ;;  %v1893_v58 = vsel %vm1866_vm4, %v1860_v61, %v6512_v42  ;;  %v1894_v2 = vsel %vm1866_vm4, %v1861_v29, %v6513_v52  ;;  %v8210_v61 = vld [vmem:[%s8962_s2] ss:$0 sm:$0xff] }
 0x183   : > { %v6521_v33 = vpop.permute.xlu1 %6520  ;;  %v1892_v3 = vsel %vm1866_vm4, %v1859_v39, %v6508_v30  ;;  %v1891_v4 = vsel %vm1866_vm4, %v1858_v1, %v6507_v56 }
 0x184   : > { %v6516_v36 = vpop.permute.xlu0 %6515  ;;  %v6523_v25 = vunpack.i.h.bf16 %v6521_v33  ;;  %v6522_v27 = vunpack.i.l.bf16 %v6521_v33 }
 0x185   : > { %v6518_v13 = vunpack.i.h.bf16 %v6516_v36  ;;  %v6517_v63 = vunpack.i.l.bf16 %v6516_v36 }
 0x186   : > { %v1926_v41 = vsel %vm1899_vm5, %v1893_v58, %v6522_v27  ;;  %v1927_v7 = vsel %vm1899_vm5, %v1894_v2, %v6523_v25 }
 0x187   : > { %v8162_v34 = vpop.permute.xlu1 %6530  ;;  %v1924_v16 = vsel %vm1899_vm5, %v1891_v4, %v6517_v63  ;;  %v1925_v31 = vsel %vm1899_vm5, %v1892_v3, %v6518_v13 }
 0x188   : > { %v6526_v43 = vpop.permute.xlu0 %6525  ;;  %v6533_v18 = vunpack.i.h.bf16 %v8162_v34  ;;  %v6532_v14 = vunpack.i.l.bf16 %v8162_v34 }
 0x189   : > { %v6528_v8 = vunpack.i.h.bf16 %v6526_v43  ;;  %v6527_v9 = vunpack.i.l.bf16 %v6526_v43 }
 0x18a   : > { %v1959_v43 = vsel %vm1932_vm6, %v1926_v41, %v6532_v14 }
 0x18b   : > { %v8164_v12 = vpop.permute.xlu1 %6540  ;;  %v1957_v20 = vsel %vm1932_vm6, %v1924_v16, %v6527_v9  ;;  %v1958_v22 = vsel %vm1932_vm6, %v1925_v31, %v6528_v8 }
 0x18c   : > { %v6536_v45 = vpop.permute.xlu0 %6535  ;;  %v6543_v54 = vunpack.i.h.bf16 %v8164_v12  ;;  %v6542_v23 = vunpack.i.l.bf16 %v8164_v12  ;;  %v1960_v12 = vsel %vm1932_vm6, %v1927_v7, %v6533_v18 }
 0x18d   : > { %v6538_v11 = vunpack.i.h.bf16 %v6536_v45  ;;  %v6537_v62 = vunpack.i.l.bf16 %v6536_v45 }
 0x18e   : > { %v1992_v47 = vsel %vm1965_vm7, %v1959_v43, %v6542_v23  ;;  %v1993_v50 = vsel %vm1965_vm7, %v1960_v12, %v6543_v54  ;;  %v7065_v23 = vld [vmem:[#allocation2 + $0x158] sm:$0xff] }
 0x18f   : > { %v6551_v26 = vpop.permute.xlu1 %6550  ;;  %v1990_v59 = vsel %vm1965_vm7, %v1957_v20, %v6537_v62  ;;  %v1991_v28 = vsel %vm1965_vm7, %v1958_v22, %v6538_v11 }
 0x190   : > { %v6546_v57 = vpop.permute.xlu0 %6545  ;;  %v6553_v32 = vunpack.i.h.bf16 %v6551_v26  ;;  %v6552_v35 = vunpack.i.l.bf16 %v6551_v26 }
 0x191   : > { %v6548_v15 = vunpack.i.h.bf16 %v6546_v57  ;;  %v6547_v17 = vunpack.i.l.bf16 %v6546_v57 }
 0x192   : > { %v2025_v49 = vsel %vm1998_vm8, %v1992_v47, %v6552_v35  ;;  %v2026_v55 = vsel %vm1998_vm8, %v1993_v50, %v6553_v32 }
 0x193   : > { %v6561_v40 = vpop.permute.xlu1 %6560  ;;  %v2023_v6 = vsel %vm1998_vm8, %v1990_v59, %v6547_v17  ;;  %v2024_v37 = vsel %vm1998_vm8, %v1991_v28, %v6548_v15  ;;  %v7066_v28 = vld [vmem:[#allocation2 + $0x170] sm:$0xff] }
 0x194   : > { %v6556_v48 = vpop.permute.xlu0 %6555  ;;  %v6563_v38 = vunpack.i.h.bf16 %v6561_v40  ;;  %v6562_v33 = vunpack.i.l.bf16 %v6561_v40 }
 0x195   : > { %v6558_v51 = vunpack.i.h.bf16 %v6556_v48  ;;  %v6557_v19 = vunpack.i.l.bf16 %v6556_v48 }
 0x196   : > { %v2058_v26 = vsel %vm2031_vm9, %v2025_v49, %v6562_v33  ;;  %v2059_v25 = vsel %vm2031_vm9, %v2026_v55, %v6563_v38  ;;  %v7068_v38 = vld [vmem:[#allocation2 + $0x150] sm:$0xff] }
 0x197   : > { %v8186_v24 = vpop.permute.xlu1 %6570  ;;  %v2056_v36 = vsel %vm2031_vm9, %v2023_v6, %v6557_v19  ;;  %v2057_v34 = vsel %vm2031_vm9, %v2024_v37, %v6558_v51  ;;  %v7067_v6 = vld [vmem:[#allocation2 + $0x168] sm:$0xff] }
 0x198   : > { %v6566_v10 = vpop.permute.xlu0 %6565  ;;  %v6573_v11 = vunpack.i.h.bf16 %v8186_v24  ;;  %v6572_v15 = vunpack.i.l.bf16 %v8186_v24 }
 0x199   : > { %v6568_v44 = vunpack.i.h.bf16 %v6566_v10  ;;  %v6567_v5 = vunpack.i.l.bf16 %v6566_v10 }
 0x19a   : > { %v1863_v59 = vsel %vm400_vm0, %v7065_v23, %v6573_v11  ;;  %v1862_v33 = vsel %vm400_vm0, %v7068_v38, %v6572_v15 }
 0x19b   : > { %v2089_v45 = vsel %vm2064_vm10, %v2056_v36, %v6567_v5  ;;  %v2090_v46 = vsel %vm2064_vm10, %v2057_v34, %v6568_v44  ;;  %v6581_v21 = vpop.permute.xlu1 %6580 }
 0x19c   : > { %v2109_v52 = vpack.c.bf16 %v2090_v46, %v2089_v45  ;;  %v6576_v42 = vpop.permute.xlu0 %6575  ;;  %v6583_v62 = vunpack.i.h.bf16 %v6581_v21  ;;  %v6582_v16 = vunpack.i.l.bf16 %v6581_v21 }
 0x19d   : > { %v6578_v30 = vunpack.i.h.bf16 %v6576_v42  ;;  %v6577_v56 = vunpack.i.l.bf16 %v6576_v42 }
 0x19e   : > { %5914 = vmatprep.mubr.msk.bf16.mxu0 %vm2127_vm11, %v2109_v52  ;;  %v1865_v32 = vsel %vm400_vm0, %v7066_v28, %v6583_v62  ;;  %v1864_v24 = vsel %vm400_vm0, %v7067_v6, %v6582_v16  ;;  %vm3267_vm0 = vcmask 521216  }
 0x19f   : > { %v2092_v27 = vsel %vm2064_vm10, %v2059_v25, %v6578_v30  ;;  %v2091_v57 = vsel %vm2064_vm10, %v2058_v26, %v6577_v56  ;;  %v6591_v53 = vpop.permute.xlu1 %6590  ;;  %3268 = vst.msk [vmem:[#allocation4] sm:$0x3f] %vm3267_vm0, %v7164_v0  ;;  %3269 = vst.msk [vmem:[#allocation4 + $0x8] sm:$0x3f] %vm3267_vm0, %v7164_v0 }
 0x1a0   : > { %v2110_v29 = vpack.c.bf16 %v2092_v27, %v2091_v57  ;;  %v6586_v60 = vpop.permute.xlu0 %6585  ;;  %v6593_v17 = vunpack.i.h.bf16 %v6591_v53  ;;  %v6592_v18 = vunpack.i.l.bf16 %v6591_v53  ;;  %3270 = vst.msk [vmem:[#allocation4 + $0x10] sm:$0x3f] %vm3267_vm0, %v7164_v0  ;;  %3271 = vst.msk [vmem:[#allocation4 + $0x18] sm:$0x3f] %vm3267_vm0, %v7164_v0 }
 0x1a1   : > { %v6588_v14 = vunpack.i.h.bf16 %v6586_v60  ;;  %v6587_v19 = vunpack.i.l.bf16 %v6586_v60  ;;  %3272 = vst.msk [vmem:[#allocation4 + $0x20] sm:$0x3f] %vm3267_vm0, %v7164_v0  ;;  %3273 = vst.msk [vmem:[#allocation4 + $0x28] sm:$0x3f] %vm3267_vm0, %v7164_v0 }
 0x1a2   : > { %v5892_v13 = vpop.f32.mrf.mxu0  ;;  %5915 = vmatmul.mubr.msk.bf16.gmra.mxu0 %vm2127_vm11, %v2110_v29  ;;  %v1897_v36 = vsel %vm1866_vm4, %v1864_v24, %v6592_v18  ;;  %v1898_v34 = vsel %vm1866_vm4, %v1865_v32, %v6593_v17 }
 0x1a3   : > { %v2226_v63 = vadd.f32 %v5892_v13, %v8210_v61  ;;  %v6601_v39 = vpop.permute.xlu1 %6600  ;;  %v1896_v43 = vsel %vm1866_vm4, %v1863_v59, %v6588_v14  ;;  %v1895_v45 = vsel %vm1866_vm4, %v1862_v33, %v6587_v19 }
 0x1a4   : > { %v6596_v1 = vpop.permute.xlu0 %6595  ;;  %v2217_v58 = vpop.f32.mrf.mxu0  ;;  %v6603_v35 = vunpack.i.h.bf16 %v6601_v39  ;;  %v6602_v10 = vunpack.i.l.bf16 %v6601_v39 }
 0x1a5   : > { %v2218_v2 = vadd.f32 %v8210_v61, %v2217_v58  ;;  %v2346_v4 = vmax.f32 %v2226_v63, 0.0  ;;  %v6598_v37 = vunpack.i.h.bf16 %v6596_v1  ;;  %v6597_v44 = vunpack.i.l.bf16 %v6596_v1 }
 0x1a6   : > { %v5893_v3 = vpop.f32.mrf.mxu0  ;;  %v1930_v52 = vsel %vm1899_vm5, %v1897_v36, %v6602_v10  ;;  %v1931_v42 = vsel %vm1899_vm5, %v1898_v34, %v6603_v35 }
 0x1a7   : > { %v2344_v8 = vmax.f32 %v2218_v2, 0.0  ;;  %v6611_v9 = vpop.permute.xlu1 %6610  ;;  %v2229_v40 = vadd.f32 %v5893_v3, %v8210_v61  ;;  %v1928_v30 = vsel %vm1899_vm5, %v1895_v45, %v6597_v44  ;;  %v1929_v56 = vsel %vm1899_vm5, %v1896_v43, %v6598_v37  ;;  %v2494_v43 = vld [vmem:[#allocation3 + $0x2] sm:$0xff] }
 0x1a8   : > { %v6606_v41 = vpop.permute.xlu0 %6605  ;;  %v2220_v7 = vpop.f32.mrf.mxu0  ;;  %v6613_v46 = vunpack.i.h.bf16 %v6611_v9  ;;  %v6612_v21 = vunpack.i.l.bf16 %v6611_v9 }
 0x1a9   : > { %v2376_v48 = vmax.f32 %v2344_v8, %v2346_v4  ;;  %v2221_v31 = vadd.f32 %v8210_v61, %v2220_v7  ;;  %v2347_v20 = vmax.f32 %v2229_v40, 0.0  ;;  %v6607_v47 = vunpack.i.l.bf16 %v6606_v41 }
 0x1aa   : > { %v6608_v49 = vunpack.i.h.bf16 %v6606_v41  ;;  %v1963_v13 = vsel %vm1932_vm6, %v1930_v52, %v6612_v21  ;;  %v1964_v63 = vsel %vm1932_vm6, %v1931_v42, %v6613_v46 }
 0x1ab   : > { %2393 = vst.msk [vmem:[#allocation5] sm:$0xff] %vm2392_vm12, %v2376_v48  ;;  %v6621_v51 = vpop.permute.xlu1 %6620  ;;  %v2345_v22 = vmax.f32 %v2221_v31, 0.0  ;;  %v1961_v39 = vsel %vm1932_vm6, %v1928_v30, %v6607_v47 }
 0x1ac   : > { %v6616_v54 = vpop.permute.xlu0 %6615  ;;  %v6622_v55 = vunpack.i.l.bf16 %v6621_v51  ;;  %v6623_v26 = vunpack.i.h.bf16 %v6621_v51  ;;  %v1962_v2 = vsel %vm1932_vm6, %v1929_v56, %v6608_v49 }
 0x1ad   : > { %v2377_v5 = vmax.f32 %v2345_v22, %v2347_v20  ;;  %v6617_v25 = vunpack.i.l.bf16 %v6616_v54  ;;  %v6618_v27 = vunpack.i.h.bf16 %v6616_v54 }
 0x1ae   : > { %v1996_v3 = vsel %vm1965_vm7, %v1963_v13, %v6622_v55  ;;  %v1997_v9 = vsel %vm1965_vm7, %v1964_v63, %v6623_v26 }
 0x1af   : > { %v6631_v12 = vpop.permute.xlu1 %6630  ;;  %2394 = vst.msk [vmem:[#allocation5 + $0x8] sm:$0xff] %vm2392_vm12, %v2377_v5  ;;  %v1994_v40 = vsel %vm1965_vm7, %v1961_v39, %v6617_v25  ;;  %v1995_v48 = vsel %vm1965_vm7, %v1962_v2, %v6618_v27  ;;  %v2486_v5 = vld [vmem:[#allocation3 + $0x1] sm:$0xff] }
 0x1b0   : > { %v6626_v50 = vpop.permute.xlu0 %6625  ;;  %v6633_v57 = vunpack.i.h.bf16 %v6631_v12  ;;  %v6632_v53 = vunpack.i.l.bf16 %v6631_v12 }
 0x1b1   : > { %v6627_v29 = vunpack.i.l.bf16 %v6626_v50  ;;  %v6628_v1 = vunpack.i.h.bf16 %v6626_v50 }
 0x1b2   : > { %v2029_v16 = vsel %vm1998_vm8, %v1996_v3, %v6632_v53  ;;  %v2030_v31 = vsel %vm1998_vm8, %v1997_v9, %v6633_v57  ;;  %v6778_v9 = vld [vmem:[%s8963_s3 + $0x30] sm:$0xff]  }
 0x1b3   : > { %v6641_v60 = vpop.permute.xlu1 %6640  ;;  %v2027_v15 = vsel %vm1998_vm8, %v1994_v40, %v6627_v29  ;;  %v2028_v14 = vsel %vm1998_vm8, %v1995_v48, %v6628_v1  ;;  %v6775_v29 = vld [vmem:[%s8963_s3 + $0x78] sm:$0xff]   ;;  %v6779_v48 = vld [vmem:[%s8963_s3 + $0x68] sm:$0xff]  }
 0x1b4   : > { %v6636_v58 = vpop.permute.xlu0 %6635  ;;  %v6643_v4 = vunpack.i.h.bf16 %v6641_v60  ;;  %v6642_v8 = vunpack.i.l.bf16 %v6641_v60  ;;  %v6776_v60 = vld [vmem:[%s8963_s3 + $0x38] sm:$0xff]   ;;  %5749 = vmatprep.subr.bf16.mxu1 %v6775_v29 }
 0x1b5   : > { %v6638_v41 = vunpack.i.h.bf16 %v6636_v58  ;;  %v6637_v7 = vunpack.i.l.bf16 %v6636_v58  ;;  %5750 = vmatpush3.bf16.msra.mxu1 %v6776_v60 }
 0x1b6   : > { %v2409_v11 = vld [vmem:[#allocation5] ss:$2 sm:$0xff]  ;;  %v2425_v62 = vld [vmem:[#allocation5 + $0x1] ss:$2 sm:$0xff]  ;;  %v2062_v22 = vsel %vm2031_vm9, %v2029_v16, %v6642_v8  ;;  %v2063_v54 = vsel %vm2031_vm9, %v2030_v31, %v6643_v4  ;;  %v6777_v4 = vld [vmem:[%s8963_s3 + $0x70] sm:$0xff]  }
 0x1b7   : > { %v6651_v17 = vpop.permute.xlu1 %6650  ;;  %v2440_v18 = vmax.f32 %v2409_v11, %v2425_v62  ;;  %v2060_v28 = vsel %vm2031_vm9, %v2027_v15, %v6637_v7  ;;  %v2061_v32 = vsel %vm2031_vm9, %v2028_v14, %v6638_v41  ;;  %5751 = vmatprep.subr.bf16.mxu1 %v6777_v4  ;;  %v6780_v31 = vld [vmem:[%s8963_s3 + $0x28] sm:$0xff]   ;;  %vm3275_vm9 = vcmask 519168  }
 0x1b8   : > { %v6653_v51 = vunpack.i.h.bf16 %v6651_v17  ;;  %v6652_v19 = vunpack.i.l.bf16 %v6651_v17  ;;  %v6646_v20 = vpop.permute.xlu0 %6645 }
 0x1b9   : > { %v6648_v23 = vunpack.i.h.bf16 %v6646_v20  ;;  %v6647_v59 = vunpack.i.l.bf16 %v6646_v20  ;;  %2470 = vst.msk [vmem:[#allocation3 + $0x11] sm:$0xff] %vm2392_vm12, %v2440_v18  ;;  %5752 = vmatpush3.bf16.msra.mxu1 %v6778_v9 }
 0x1ba   : > { %v2095_v35 = vsel %vm2064_vm10, %v2062_v22, %v6652_v19  ;;  %v2096_v10 = vsel %vm2064_vm10, %v2063_v54, %v6653_v51  ;;  %5753 = vmatprep.subr.bf16.mxu1 %v6779_v48  ;;  %v6781_v51 = vld [vmem:[%s8963_s3 + $0x60] sm:$0xff]   ;;  %v6783_v22 = vld [vmem:[%s8963_s3 + $0x58] sm:$0xff]  }
 0x1bb   : > { %v2112_v6 = vpack.c.bf16 %v2096_v10, %v2095_v35  ;;  %v2093_v24 = vsel %vm2064_vm10, %v2060_v28, %v6647_v59  ;;  %v2094_v37 = vsel %vm2064_vm10, %v2061_v32, %v6648_v23  ;;  %v6782_v19 = vld [vmem:[%s8963_s3 + $0x20] sm:$0xff]   ;;  %v6784_v54 = vld [vmem:[%s8963_s3 + $0x18] sm:$0xff]   ;;  %v6785_v23 = vld [vmem:[%s8963_s3 + $0x50] sm:$0xff]   ;;  %vm7177_vm10 = vmmov 0  }
 0x1bc   : > { %v2111_v44 = vpack.c.bf16 %v2094_v37, %v2093_v24  ;;  %v6786_v59 = vld [vmem:[%s8963_s3 + $0x10] sm:$0xff]   ;;  %v6787_v10 = vld [vmem:[%s8963_s3 + $0x48] sm:$0xff]   ;;  %v6789_v24 = vld [vmem:[%s8963_s3 + $0x40] sm:$0xff]  }
 0x1bd   : > { %5754 = vmatpush3.bf16.msra.mxu1 %v6780_v31  ;;  %v6790_v37 = vld [vmem:[%s8963_s3] sm:$0xff]  }
 0x1be   : > { %5918 = vmatprep.mubr.msk.bf16.mxu0 %vm2127_vm11, %v2111_v44  ;;  %5755 = vmatprep.subr.bf16.mxu1 %v6781_v51 }
 0x1bf   : > { %5919 = vmatmul.mubr.msk.bf16.gmra.mxu0 %vm2127_vm11, %v2112_v6  ;;  %v6788_v6 = vld [vmem:[%s8963_s3 + $0x8] sm:$0xff]  }
 0x1c0   : > { %v8256_v38 = vld [vmem:[#allocation3 + $0x11] sm:$0xff] }
 0x1c1   : > { %v6654_v36 = vpack.i.bf16 %v8256_v38, %v2486_v5  ;;  %v2495_v12 = vld [vmem:[#allocation3 + $0x12] sm:$0xff]  ;;  %5756 = vmatpush3.bf16.msra.mxu1 %v6782_v19 }
 0x1c2   : > { %v5896_v33 = vpop.f32.mrf.mxu0  ;;  %v6659_v47 = vpack.i.bf16 %v2495_v12, %v2494_v43  ;;  %v8276_v63 = vld [vmem:[#allocation3 + $0x10] sm:$0xff]  ;;  %5757 = vmatprep.subr.bf16.mxu1 %v6783_v22 }
 0x1c3   : > { %v2242_v34 = vadd.f32 %v5896_v33, %v8210_v61  ;;  %6655 = vrot.lane.b32.xlu1 %v6654_v36, %s7174_s14 }
 0x1c4   : > { %v2233_v45 = vpop.f32.mrf.mxu0 }
 0x1c5   : > { %v2234_v46 = vadd.f32 %v8210_v61, %v2233_v45  ;;  %v2350_v50 = vmax.f32 %v2242_v34, 0.0  ;;  %5758 = vmatpush3.bf16.msra.mxu1 %v6784_v54 }
 0x1c6   : > { %v5897_v21 = vpop.f32.mrf.mxu0  ;;  %5759 = vmatprep.subr.bf16.mxu1 %v6785_v23 }
 0x1c7   : > { %v2348_v52 = vmax.f32 %v2234_v46, 0.0  ;;  %v2245_v42 = vadd.f32 %v5897_v21, %v8210_v61  ;;  %6660 = vrot.lane.b32.xlu1 %v6659_v47, %s8974_s15 }
 0x1c8   : > { %v2236_v49 = vpop.f32.mrf.mxu0 }
 0x1c9   : > { %v2378_v55 = vmax.f32 %v2348_v52, %v2350_v50  ;;  %v2237_v30 = vadd.f32 %v8210_v61, %v2236_v49  ;;  %v2351_v56 = vmax.f32 %v2245_v42, 0.0  ;;  %5760 = vmatpush3.bf16.msra.mxu1 %v6786_v59 }
 0x1ca   : > { %5761 = vmatprep.subr.bf16.mxu1 %v6787_v10 }
 0x1cb   : > { %2395 = vst.msk [vmem:[#allocation5 + $0x10] sm:$0xff] %vm2392_vm12, %v2378_v55  ;;  %v2349_v26 = vmax.f32 %v2237_v30, 0.0 }
 0x1cd   : > { %v2379_v25 = vmax.f32 %v2349_v26, %v2351_v56  ;;  %5762 = vmatpush3.bf16.msra.mxu1 %v6788_v6 }
 0x1ce   : > { %5763 = vmatprep.subr.bf16.mxu1 %v6789_v24 }
 0x1cf   : > { %2396 = vst.msk [vmem:[#allocation5 + $0x18] sm:$0xff] %vm2392_vm12, %v2379_v25 }
 0x1d1   : > { %5764 = vmatpush3.bf16.msra.mxu1 %v6790_v37 }
 0x1d6   : > { %v2411_v27 = vld [vmem:[#allocation5 + $0x10] ss:$2 sm:$0xff]  ;;  %v2427_v57 = vld [vmem:[#allocation5 + $0x11] ss:$2 sm:$0xff] }
 0x1d7   : > { %v2441_v53 = vmax.f32 %v2411_v27, %v2427_v57 }
 0x1d9   : > { %2471 = vst.msk [vmem:[#allocation3 + $0x21] sm:$0xff] %vm2392_vm12, %v2441_v53 }
 0x1e0   : > { %v8274_v13 = vld [vmem:[#allocation3 + $0x22] sm:$0xff] }
 0x1e1   : > { %v8278_v39 = vld [vmem:[#allocation3 + $0x20] sm:$0xff]  ;;  %v6664_v1 = vpack.i.bf16 %v8274_v13, %v2495_v12 }
 0x1e2   : > { %v6669_v58 = vpack.i.bf16 %v8278_v39, %v8276_v63  ;;  %v5900_v2 = vpop.f32.mrf.mxu0  ;;  %v8334_v44 = vld [vmem:[#allocation3 + $0x21] sm:$0xff] }
 0x1e3   : > { %v2258_v3 = vadd.f32 %v5900_v2, %v8210_v61  ;;  %6665 = vrot.lane.b32.xlu0 %v6664_v1, %s7174_s14 }
 0x1e4   : > { %6670 = vrot.lane.b32.xlu1 %v6669_v58, %s8972_s30  ;;  %v2249_v8 = vpop.f32.mrf.mxu0 }
 0x1e5   : > { %v2250_v40 = vadd.f32 %v8210_v61, %v2249_v8  ;;  %v2354_v7 = vmax.f32 %v2258_v3, 0.0 }
 0x1e6   : > { %v5901_v41 = vpop.f32.mrf.mxu0 }
 0x1e7   : > { %v2352_v11 = vmax.f32 %v2250_v40, 0.0  ;;  %v2261_v62 = vadd.f32 %v5901_v41, %v8210_v61 }
 0x1e8   : > { %v2252_v16 = vpop.f32.mrf.mxu0 }
 0x1e9   : > { %v2380_v15 = vmax.f32 %v2352_v11, %v2354_v7  ;;  %v2253_v17 = vadd.f32 %v8210_v61, %v2252_v16  ;;  %v2355_v18 = vmax.f32 %v2261_v62, 0.0 }
 0x1eb   : > { %2397 = vst.msk [vmem:[#allocation5 + $0x20] sm:$0xff] %vm2392_vm12, %v2380_v15  ;;  %v2353_v14 = vmax.f32 %v2253_v17, 0.0 }
 0x1ed   : > { %v2381_v20 = vmax.f32 %v2353_v14, %v2355_v18 }
 0x1ef   : > { %2398 = vst.msk [vmem:[#allocation5 + $0x28] sm:$0xff] %vm2392_vm12, %v2381_v20 }
 0x1f6   : > { %v2413_v28 = vld [vmem:[#allocation5 + $0x20] ss:$2 sm:$0xff]  ;;  %v2429_v32 = vld [vmem:[#allocation5 + $0x21] ss:$2 sm:$0xff] }
 0x1f7   : > { %v2442_v35 = vmax.f32 %v2413_v28, %v2429_v32 }
 0x1f9   : > { %2472 = vst.msk [vmem:[#allocation3 + $0x31] sm:$0xff] %vm2392_vm12, %v2442_v35 }
 0x200   : > { %v8336_v5 = vld [vmem:[#allocation3 + $0x30] sm:$0xff] }
 0x201   : > { %v8338_v33 = vld [vmem:[#allocation3 + $0x31] sm:$0xff]  ;;  %v6674_v34 = vpack.i.bf16 %v8336_v5, %v8278_v39 }
 0x202   : > { %v8340_v36 = vld [vmem:[#allocation3 + $0x32] sm:$0xff]  ;;  %v6684_v43 = vpack.i.bf16 %v8338_v33, %v8334_v44  ;;  %v5904_v45 = vpop.f32.mrf.mxu0 }
 0x203   : > { %v2795_v12 = vpack.c.bf16 %v8340_v36, %v8274_v13  ;;  %v2274_v46 = vadd.f32 %v5904_v45, %v8210_v61  ;;  %6675 = vrot.lane.b32.xlu0 %v6674_v34, %s8974_s15  ;;  %v6689_v50 = vpack.i.bf16 %v8340_v36, %v8274_v13  ;;  %v3284_v13 = vld [vmem:[#allocation4 + $0x1] sm:$0xf] }
 0x204   : > { %6685 = vrot.lane.b32.xlu1 %v6684_v43, %s7174_s14  ;;  %v2265_v21 = vpop.f32.mrf.mxu0 }
 0x205   : > { %v2266_v47 = vadd.f32 %v8210_v61, %v2265_v21  ;;  %v2358_v42 = vmax.f32 %v2274_v46, 0.0 }
 0x206   : > { %v5905_v52 = vpop.f32.mrf.mxu0 }
 0x207   : > { %v2356_v49 = vmax.f32 %v2266_v47, 0.0  ;;  %v2277_v55 = vadd.f32 %v5905_v52, %v8210_v61  ;;  %6680 = vrot.lane.b32.xlu0 %v6684_v43, %s8983_s24 }
 0x208   : > { %6690 = vrot.lane.b32.xlu1 %v6689_v50, %s8974_s15  ;;  %v2268_v30 = vpop.f32.mrf.mxu0 }
 0x209   : > { %v2382_v56 = vmax.f32 %v2356_v49, %v2358_v42  ;;  %v2269_v26 = vadd.f32 %v8210_v61, %v2268_v30  ;;  %v2359_v25 = vmax.f32 %v2277_v55, 0.0 }
 0x20b   : > { %2399 = vst.msk [vmem:[#allocation5 + $0x30] sm:$0xff] %vm2392_vm12, %v2382_v56  ;;  %v2357_v27 = vmax.f32 %v2269_v26, 0.0 }
 0x20d   : > { %v2383_v57 = vmax.f32 %v2357_v27, %v2359_v25 }
 0x20f   : > { %2400 = vst.msk [vmem:[#allocation5 + $0x38] sm:$0xff] %vm2392_vm12, %v2383_v57 }
 0x216   : > { %v2415_v53 = vld [vmem:[#allocation5 + $0x30] ss:$2 sm:$0xff]  ;;  %v2431_v29 = vld [vmem:[#allocation5 + $0x31] ss:$2 sm:$0xff] }
 0x217   : > { %v2443_v60 = vmax.f32 %v2415_v53, %v2431_v29 }
 0x219   : > { %2473 = vst.msk [vmem:[#allocation3 + $0x41] sm:$0xff] %vm2392_vm12, %v2443_v60 }
 0x220   : > { %v8361_v1 = vld [vmem:[#allocation3 + $0x42] sm:$0xff] }
 0x221   : > { %v8363_v58 = vld [vmem:[#allocation3 + $0x40] sm:$0xff]  ;;  %v6694_v2 = vpack.i.bf16 %v8361_v1, %v8340_v36  ;;  %v6793_v36 = vld [vmem:[%s8965_s5 + $0x78] sm:$0xff]  }
 0x222   : > { %v6699_v3 = vpack.i.bf16 %v8363_v58, %v8336_v5  ;;  %v5908_v4 = vpop.f32.mrf.mxu0  ;;  %v8378_v20 = vld [vmem:[#allocation3 + $0x41] sm:$0xff]  ;;  %5795 = vmatprep.subr.bf16.mxu0 %v6793_v36 }
 0x223   : > { %v2290_v8 = vadd.f32 %v5908_v4, %v8210_v61  ;;  %6695 = vrot.lane.b32.xlu0 %v6694_v2, %s7174_s14 }
 0x224   : > { %6700 = vrot.lane.b32.xlu1 %v6699_v3, %s8983_s24  ;;  %v2281_v9 = vpop.f32.mrf.mxu0 }
 0x225   : > { %v2282_v40 = vadd.f32 %v8210_v61, %v2281_v9  ;;  %v2362_v7 = vmax.f32 %v2290_v8, 0.0 }
 0x226   : > { %v5909_v41 = vpop.f32.mrf.mxu0 }
 0x227   : > { %v2360_v11 = vmax.f32 %v2282_v40, 0.0  ;;  %v2293_v62 = vadd.f32 %v5909_v41, %v8210_v61 }
 0x228   : > { %v2284_v48 = vpop.f32.mrf.mxu0 }
 0x229   : > { %v2384_v16 = vmax.f32 %v2360_v11, %v2362_v7  ;;  %v2285_v31 = vadd.f32 %v8210_v61, %v2284_v48  ;;  %v2363_v15 = vmax.f32 %v2293_v62, 0.0 }
 0x22b   : > { %2401 = vst.msk [vmem:[#allocation5 + $0x40] sm:$0xff] %vm2392_vm12, %v2384_v16  ;;  %v2361_v17 = vmax.f32 %v2285_v31, 0.0 }
 0x22d   : > { %v2385_v18 = vmax.f32 %v2361_v17, %v2363_v15 }
 0x22f   : > { %2402 = vst.msk [vmem:[#allocation5 + $0x48] sm:$0xff] %vm2392_vm12, %v2385_v18 }
 0x235   : > { %v6656_v41 = vpop.permute.xlu1 %6655 }
 0x236   : > { %v2417_v14 = vld [vmem:[#allocation5 + $0x40] ss:$2 sm:$0xff]  ;;  %v2433_v51 = vld [vmem:[#allocation5 + $0x41] ss:$2 sm:$0xff]  ;;  %v6658_v18 = vunpack.i.h.bf16 %v6656_v41 }
 0x237   : > { %v2444_v19 = vmax.f32 %v2417_v14, %v2433_v51  ;;  %v6657_v14 = vunpack.i.l.bf16 %v6656_v41  ;;  %v2478_v51 = vld [vmem:[#allocation3] sm:$0xff] }
 0x239   : > { %2474 = vst.msk [vmem:[#allocation3 + $0x51] sm:$0xff] %vm2392_vm12, %v2444_v19  ;;  %v6661_v31 = vpop.permute.xlu1 %6660 }
 0x23a   : > { %v6663_v19 = vunpack.i.h.bf16 %v6661_v31 }
 0x240   : > { %v8380_v22 = vld [vmem:[#allocation3 + $0x50] sm:$0xff] }
 0x241   : > { %v8382_v54 = vld [vmem:[#allocation3 + $0x51] sm:$0xff]  ;;  %v6704_v59 = vpack.i.bf16 %v8380_v22, %v8363_v58 }
 0x242   : > { %v8384_v23 = vld [vmem:[#allocation3 + $0x52] sm:$0xff]  ;;  %v6714_v28 = vpack.i.bf16 %v8382_v54, %v8378_v20  ;;  %v5912_v35 = vpop.f32.mrf.mxu0 }
 0x243   : > { %v2798_v32 = vpack.c.bf16 %v8384_v23, %v8361_v1  ;;  %v2306_v10 = vadd.f32 %v5912_v35, %v8210_v61  ;;  %6705 = vrot.lane.b32.xlu0 %v6704_v59, %s8974_s15  ;;  %v6719_v37 = vpack.i.bf16 %v8384_v23, %v8361_v1  ;;  %v6662_v59 = vunpack.i.l.bf16 %v6661_v31  ;;  %v6795_v1 = vld [vmem:[%s8965_s5 + $0x70] sm:$0xff]  }
 0x244   : > { %6715 = vrot.lane.b32.xlu1 %v6714_v28, %s7174_s14  ;;  %v2297_v6 = vpop.f32.mrf.mxu0 }
 0x245   : > { %v2298_v24 = vadd.f32 %v8210_v61, %v2297_v6  ;;  %v2366_v43 = vmax.f32 %v2306_v10, 0.0 }
 0x246   : > { %v5913_v34 = vpop.f32.mrf.mxu0 }
 0x247   : > { %v2364_v45 = vmax.f32 %v2298_v24, 0.0  ;;  %v2309_v46 = vadd.f32 %v5913_v34, %v8210_v61  ;;  %6710 = vrot.lane.b32.xlu0 %v6714_v28, %s8983_s24 }
 0x248   : > { %6720 = vrot.lane.b32.xlu1 %v6719_v37, %s8974_s15  ;;  %v2300_v21 = vpop.f32.mrf.mxu0 }
 0x249   : > { %v2386_v47 = vmax.f32 %v2364_v45, %v2366_v43  ;;  %v2301_v50 = vadd.f32 %v8210_v61, %v2300_v21  ;;  %v2367_v52 = vmax.f32 %v2309_v46, 0.0  ;;  %v2743_v21 = vsel %vm2392_vm12, %v2478_v51, %v6657_v14 }
 0x24b   : > { %2403 = vst.msk [vmem:[#allocation5 + $0x50] sm:$0xff] %vm2392_vm12, %v2386_v47  ;;  %v2365_v42 = vmax.f32 %v2301_v50, 0.0  ;;  %v2744_v47 = vsel %vm2392_vm12, %v8276_v63, %v6658_v18  ;;  %v2752_v50 = vsel %vm2751_vm14, %v2743_v21, %v6662_v59  ;;  %v2534_v21 = vld [vmem:[#allocation3 + $0x90] sm:$0xff] }
 0x24d   : > { %v2387_v49 = vmax.f32 %v2365_v42, %v2367_v52  ;;  %v2753_v52 = vsel %vm2751_vm14, %v2744_v47, %v6663_v19 }
 0x24f   : > { %2404 = vst.msk [vmem:[#allocation5 + $0x58] sm:$0xff] %vm2392_vm12, %v2387_v49 }
 0x255   : > { %v6666_v15 = vpop.permute.xlu0 %6665 }
 0x256   : > { %v2419_v55 = vld [vmem:[#allocation5 + $0x50] ss:$2 sm:$0xff]  ;;  %v2435_v30 = vld [vmem:[#allocation5 + $0x51] ss:$2 sm:$0xff]  ;;  %v6671_v17 = vpop.permute.xlu1 %6670  ;;  %v6668_v35 = vunpack.i.h.bf16 %v6666_v15  ;;  %v6667_v10 = vunpack.i.l.bf16 %v6666_v15 }
 0x257   : > { %v2445_v56 = vmax.f32 %v2419_v55, %v2435_v30  ;;  %v6673_v6 = vunpack.i.h.bf16 %v6671_v17  ;;  %v6672_v34 = vunpack.i.l.bf16 %v6671_v17 }
 0x258   : > { %v2769_v30 = vsel %vm2392_vm12, %v8256_v38, %v6667_v10 }
 0x259   : > { %2475 = vst.msk [vmem:[#allocation3 + $0x61] sm:$0xff] %vm2392_vm12, %v2445_v56  ;;  %v2770_v56 = vsel %vm2392_vm12, %v8334_v44, %v6668_v35 }
 0x260   : > { %v8405_v26 = vld [vmem:[#allocation3 + $0x62] sm:$0xff] }
 0x261   : > { %v8407_v25 = vld [vmem:[#allocation3 + $0x60] sm:$0xff]  ;;  %v6724_v27 = vpack.i.bf16 %v8405_v26, %v8384_v23 }
 0x262   : > { %v6729_v57 = vpack.i.bf16 %v8407_v25, %v8380_v22  ;;  %v5916_v53 = vpop.f32.mrf.mxu0  ;;  %v8437_v38 = vld [vmem:[#allocation3 + $0x61] sm:$0xff] }
 0x263   : > { %v2322_v29 = vadd.f32 %v5916_v53, %v8210_v61  ;;  %6725 = vrot.lane.b32.xlu0 %v6724_v27, %s7174_s14  ;;  %v2762_v53 = vsel %vm2760_vm15, %v2753_v52, %v6673_v6  ;;  %v2542_v52 = vld [vmem:[#allocation3 + $0x91] sm:$0xff]  ;;  %v6796_v23 = vld [vmem:[%s8965_s5 + $0x30] sm:$0xff]  }
 0x264   : > { %6730 = vrot.lane.b32.xlu1 %v6729_v57, %s8983_s24  ;;  %v2313_v60 = vpop.f32.mrf.mxu0  ;;  %v2761_v57 = vsel %vm2760_vm15, %v2752_v50, %v6672_v34 }
 0x265   : > { %v2314_v2 = vadd.f32 %v8210_v61, %v2313_v60  ;;  %v2370_v4 = vmax.f32 %v2322_v29, 0.0 }
 0x266   : > { %v5917_v3 = vpop.f32.mrf.mxu0 }
 0x267   : > { %v2368_v8 = vmax.f32 %v2314_v2, 0.0  ;;  %v2325_v9 = vadd.f32 %v5917_v3, %v8210_v61  ;;  %v2793_v3 = vpack.c.bf16 %v2762_v53, %v2761_v57 }
 0x268   : > { %v2316_v40 = vpop.f32.mrf.mxu0 }
 0x269   : > { %v2388_v7 = vmax.f32 %v2368_v8, %v2370_v4  ;;  %v2317_v11 = vadd.f32 %v8210_v61, %v2316_v40  ;;  %v2371_v62 = vmax.f32 %v2325_v9, 0.0 }
 0x26b   : > { %2405 = vst.msk [vmem:[#allocation5 + $0x60] sm:$0xff] %vm2392_vm12, %v2388_v7  ;;  %v2369_v48 = vmax.f32 %v2317_v11, 0.0 }
 0x26d   : > { %v2389_v16 = vmax.f32 %v2369_v48, %v2371_v62  ;;  %v6791_v62 = vld [vmem:[%s8963_s3 + $0x88] sm:$0xff]  }
 0x26e   : > { %5922 = vmatprep.subr.bf16.mxu1 %v6791_v62 }
 0x26f   : > { %2406 = vst.msk [vmem:[#allocation5 + $0x68] sm:$0xff] %vm2392_vm12, %v2389_v16 }
 0x275   : > { %v6676_v28 = vpop.permute.xlu0 %6675 }
 0x276   : > { %v2421_v24 = vld [vmem:[#allocation5 + $0x60] ss:$2 sm:$0xff]  ;;  %v2437_v37 = vld [vmem:[#allocation5 + $0x61] ss:$2 sm:$0xff]  ;;  %v6678_v45 = vunpack.i.h.bf16 %v6676_v28  ;;  %v6677_v46 = vunpack.i.l.bf16 %v6676_v28 }
 0x277   : > { %v2446_v43 = vmax.f32 %v2421_v24, %v2437_v37 }
 0x278   : > { %v2777_v27 = vsel %vm2751_vm14, %v2769_v30, %v6677_v46  ;;  %v2778_v63 = vsel %vm2751_vm14, %v2770_v56, %v6678_v45 }
 0x279   : > { %2476 = vst.msk [vmem:[#allocation3 + $0x71] sm:$0xff] %vm2392_vm12, %v2446_v43  ;;  %v6681_v42 = vpop.permute.xlu0 %6680 }
 0x27a   : > { %v6683_v49 = vunpack.i.h.bf16 %v6681_v42  ;;  %v6682_v55 = vunpack.i.l.bf16 %v6681_v42 }
 0x27c   : > { %v2785_v29 = vsel %vm2760_vm15, %v2777_v27, %v6682_v55  ;;  %v2786_v60 = vsel %vm2760_vm15, %v2778_v63, %v6683_v49  ;;  %v6686_v49 = vpop.permute.xlu1 %6685 }
 0x27d   : > { %v2794_v2 = vpack.c.bf16 %v2786_v60, %v2785_v29  ;;  %v6688_v56 = vunpack.i.h.bf16 %v6686_v49  ;;  %v6687_v27 = vunpack.i.l.bf16 %v6686_v49 }
 0x27f   : > { %v5920_v4 = vpop.f32.mrf.mxu0  ;;  %3000 = vmatprep.mubr.bf16.mxu1 %v2794_v2 }
 0x280   : > { %v2338_v44 = vadd.f32 %v5920_v4, %v8210_v61  ;;  %3001 = vmatmul.mubr.bf16.vlgmr.msra.gmra.mxu1 %v2793_v3  ;;  %v8440_v8 = vld [vmem:[#allocation3 + $0x70] sm:$0xff]  ;;  %v6691_v55 = vpop.permute.xlu1 %6690 }
 0x281   : > { %v8442_v9 = vld [vmem:[#allocation3 + $0x71] sm:$0xff]  ;;  %v2329_v41 = vpop.f32.mrf.mxu0  ;;  %v6734_v7 = vpack.i.bf16 %v8440_v8, %v8407_v25  ;;  %5923 = vmatpush3.bf16.msra.mxu1 %v6791_v62  ;;  %v6693_v57 = vunpack.i.h.bf16 %v6691_v55  ;;  %v6692_v53 = vunpack.i.l.bf16 %v6691_v55 }
 0x282   : > { %v8444_v40 = vld [vmem:[#allocation3 + $0x72] sm:$0xff]  ;;  %v6744_v11 = vpack.i.bf16 %v8442_v9, %v8437_v38  ;;  %v2330_v16 = vadd.f32 %v8210_v61, %v2329_v41  ;;  %v2374_v15 = vmax.f32 %v2338_v44, 0.0 }
 0x283   : > { %v2801_v48 = vpack.c.bf16 %v8444_v40, %v8405_v26  ;;  %v5921_v31 = vpop.f32.mrf.mxu0  ;;  %6735 = vrot.lane.b32.xlu0 %v6734_v7, %s8974_s15  ;;  %v6749_v51 = vpack.i.bf16 %v8444_v40, %v8405_v26  ;;  %v2746_v7 = vsel %vm2392_vm12, %v8336_v5, %v6688_v56  ;;  %v6798_v26 = vld [vmem:[%s8965_s5 + $0x28] sm:$0xff]  }
 0x284   : > { %6745 = vrot.lane.b32.xlu1 %v6744_v11, %s7174_s14  ;;  %v2372_v17 = vmax.f32 %v2330_v16, 0.0  ;;  %v2341_v18 = vadd.f32 %v5921_v31, %v8210_v61  ;;  %v2755_v16 = vsel %vm2751_vm14, %v2746_v7, %v6693_v57 }
 0x285   : > { %v2332_v14 = vpop.f32.mrf.mxu0 }
 0x286   : > { %v2390_v19 = vmax.f32 %v2372_v17, %v2374_v15  ;;  %v2333_v59 = vadd.f32 %v8210_v61, %v2332_v14  ;;  %v2375_v28 = vmax.f32 %v2341_v18, 0.0  ;;  %v6792_v61 = vld [vmem:[%s8963_s3 + $0x80] sm:$0xff]  }
 0x287   : > { %6740 = vrot.lane.b32.xlu0 %v6744_v11, %s8983_s24  ;;  %5924 = vmatprep.subr.bf16.mxu1 %v6792_v61  ;;  %v2745_v11 = vsel %vm2392_vm12, %v8278_v39, %v6687_v27 }
 0x288   : > { %6750 = vrot.lane.b32.xlu1 %v6749_v51, %s8974_s15  ;;  %2407 = vst.msk [vmem:[#allocation5 + $0x70] sm:$0xff] %vm2392_vm12, %v2390_v19  ;;  %v2373_v35 = vmax.f32 %v2333_v59, 0.0  ;;  %5925 = vmatpush3.bf16.msra.mxu1 %v6792_v61  ;;  %v2754_v62 = vsel %vm2751_vm14, %v2745_v11, %v6692_v53 }
 0x28a   : > { %v2391_v10 = vmax.f32 %v2373_v35, %v2375_v28 }
 0x28c   : > { %2408 = vst.msk [vmem:[#allocation5 + $0x78] sm:$0xff] %vm2392_vm12, %v2391_v10 }
 0x293   : > { %v2423_v6 = vld [vmem:[#allocation5 + $0x70] ss:$2 sm:$0xff]  ;;  %v2439_v24 = vld [vmem:[#allocation5 + $0x71] ss:$2 sm:$0xff] }
 0x294   : > { %v2447_v37 = vmax.f32 %v2423_v6, %v2439_v24 }
 0x295   : > { %v6696_v30 = vpop.permute.xlu0 %6695 }
 0x296   : > { %2477 = vst.msk [vmem:[#allocation3 + $0x81] sm:$0xff] %vm2392_vm12, %v2447_v37  ;;  %v6701_v63 = vpop.permute.xlu1 %6700  ;;  %v6698_v60 = vunpack.i.h.bf16 %v6696_v30  ;;  %v6697_v2 = vunpack.i.l.bf16 %v6696_v30 }
 0x297   : > { %v6703_v3 = vunpack.i.h.bf16 %v6701_v63  ;;  %v6702_v4 = vunpack.i.l.bf16 %v6701_v63 }
 0x298   : > { %v2772_v15 = vsel %vm2392_vm12, %v8378_v20, %v6698_v60  ;;  %v2771_v17 = vsel %vm2392_vm12, %v8338_v33, %v6697_v2 }
 0x299   : > { %v2763_v19 = vsel %vm2760_vm15, %v2754_v62, %v6702_v4  ;;  %v2764_v39 = vsel %vm2760_vm15, %v2755_v16, %v6703_v3 }
 0x29a   : > { %v2796_v10 = vpack.c.bf16 %v2764_v39, %v2763_v19 }
 0x29d   : > { %v8470_v34 = vld [vmem:[#allocation3 + $0x82] sm:$0xff] }
 0x29e   : > { %v2509_v43 = vld [vmem:[#allocation3 + $0x80] sm:$0xff]  ;;  %v6754_v45 = vpack.i.bf16 %v8470_v34, %v8444_v40  ;;  %v6799_v40 = vld [vmem:[%s8965_s5 + $0x60] sm:$0xff]  }
 0x29f   : > { %v6769_v46 = vpack.i.bf16 %v2509_v43, %v8440_v8  ;;  %v6759_v47 = vpack.i.bf16 %v2534_v21, %v2509_v43  ;;  %v8477_v50 = vld [vmem:[#allocation3 + $0x81] sm:$0xff] }
 0x2a0   : > { %6755 = vrot.lane.b32.xlu0 %v6754_v45, %s7174_s14  ;;  %v6764_v42 = vpack.i.bf16 %v2542_v52, %v8477_v50 }
 0x2a1   : > { %6770 = vrot.lane.b32.xlu1 %v6769_v46, %s8983_s24 }
 0x2a4   : > { %6760 = vrot.lane.b32.xlu0 %v6759_v47, %s8974_s15 }
 0x2a8   : > { %6765 = vrot.lane.b32.xlu0 %v6764_v42, %s8983_s24  ;;  %s8996_s24 = smov 64  }
 0x2ac   : > { %3321 = vrot.lane.b32.xlu0 %v3284_v13, %s8974_s15  ;;  %s393_s15 = scalar_lea.vmem [#allocation11], %s392_s1 }
 0x2ad   : > { %s5405_s30 = sshll.u32 %s393_s15, 4  ;;  %s5406_s30 = int_to_ptr.vmem [resolvable:$true] %s5405_s30 }
 0x2ae   : > { %s7095_s14 = scalar_lea.vmem %s5406_s30, 16  ;;  %p7102_p11 = scmp.lt.s32.totalorder %s5406_s30, %s7100_s13 }
 0x2af   : > { %p7096_p8 = scmp.ne.s32.totalorder %s5406_s30, %s7095_s14  ;;  %p7103_p12 = scmp.lt.s32.totalorder %s7101_s16, %s7095_s14 }
 0x2b1   : > { %p7097_p9 = pnand %p7096_p8, %p7279_p5  ;;  %p7104_p13 = por %p7103_p12, %p7102_p11 }
 0x2b3   : > { %p7098_p10 = pneg %p7097_p9 }
 0x2b5   : > { %v6706_v29 = vpop.permute.xlu0 %6705  ;;  %p7105_p0 = pnand %p7104_p13, %p7098_p10 }
 0x2b6   : > { %v6708_v44 = vunpack.i.h.bf16 %v6706_v29  ;;  %v6707_v41 = vunpack.i.l.bf16 %v6706_v29  ;;  %v6716_v20 = vpop.permute.xlu1 %6715 }
 0x2b7   : > { %v6718_v24 = vunpack.i.h.bf16 %v6716_v20  ;;  %v6717_v37 = vunpack.i.l.bf16 %v6716_v20 }
 0x2b8   : > { %v2779_v51 = vsel %vm2751_vm14, %v2771_v17, %v6707_v41  ;;  %v2780_v5 = vsel %vm2751_vm14, %v2772_v15, %v6708_v44 }
 0x2b9   : > { %v6711_v31 = vpop.permute.xlu0 %6710  ;;  %v2748_v30 = vsel %vm2392_vm12, %v8380_v22, %v6718_v24  ;;  %v2747_v56 = vsel %vm2392_vm12, %v8363_v58, %v6717_v37 }
 0x2ba   : > { %v6713_v18 = vunpack.i.h.bf16 %v6711_v31  ;;  %v6712_v14 = vunpack.i.l.bf16 %v6711_v31  ;;  %v6721_v33 = vpop.permute.xlu1 %6720 }
 0x2bb   : > { %v6723_v43 = vunpack.i.h.bf16 %v6721_v33  ;;  %v6722_v45 = vunpack.i.l.bf16 %v6721_v33 }
 0x2bc   : > { %v2787_v59 = vsel %vm2760_vm15, %v2779_v51, %v6712_v14  ;;  %v2788_v28 = vsel %vm2760_vm15, %v2780_v5, %v6713_v18 }
 0x2bd   : > { %v2797_v35 = vpack.c.bf16 %v2788_v28, %v2787_v59  ;;  %v2756_v27 = vsel %vm2751_vm14, %v2747_v56, %v6722_v45  ;;  %v2757_v63 = vsel %vm2751_vm14, %v2748_v30, %v6723_v43  ;;  %v6803_v56 = vld [vmem:[%s8965_s5 + $0x50] sm:$0xff]  }
 0x2bf   : > { %3008 = vmatprep.mubr.bf16.mxu1 %v2797_v35 }
 0x2c0   : > { %3009 = vmatmul.mubr.bf16.gmra.mxu1 %v2796_v10 }
 0x2d5   : > { %v6726_v6 = vpop.permute.xlu0 %6725 }
 0x2d6   : > { %v6731_v61 = vpop.permute.xlu1 %6730  ;;  %v6728_v21 = vunpack.i.h.bf16 %v6726_v6  ;;  %v6727_v47 = vunpack.i.l.bf16 %v6726_v6 }
 0x2d7   : > { %v6733_v52 = vunpack.i.h.bf16 %v6731_v61  ;;  %v6732_v42 = vunpack.i.l.bf16 %v6731_v61 }
 0x2d8   : > { %v2774_v53 = vsel %vm2392_vm12, %v8437_v38, %v6728_v21  ;;  %v2773_v29 = vsel %vm2392_vm12, %v8382_v54, %v6727_v47 }
 0x2d9   : > { %v2765_v4 = vsel %vm2760_vm15, %v2756_v27, %v6732_v42  ;;  %v2766_v58 = vsel %vm2760_vm15, %v2757_v63, %v6733_v52 }
 0x2da   : > { %v2799_v11 = vpack.c.bf16 %v2766_v58, %v2765_v4 }
 0x2f5   : > { %v6736_v46 = vpop.permute.xlu0 %6735 }
 0x2f6   : > { %v6738_v49 = vunpack.i.h.bf16 %v6736_v46  ;;  %v6737_v55 = vunpack.i.l.bf16 %v6736_v46  ;;  %v6746_v38 = vpop.permute.xlu1 %6745 }
 0x2f7   : > { %v6748_v16 = vunpack.i.h.bf16 %v6746_v38  ;;  %v6747_v31 = vunpack.i.l.bf16 %v6746_v38 }
 0x2f8   : > { %v2781_v3 = vsel %vm2751_vm14, %v2773_v29, %v6737_v55  ;;  %v2782_v22 = vsel %vm2751_vm14, %v2774_v53, %v6738_v49  ;;  %v6801_v49 = vld [vmem:[%s8965_s5 + $0x58] sm:$0xff]  }
 0x2f9   : > { %v6741_v57 = vpop.permute.xlu0 %6740  ;;  %v2750_v35 = vsel %vm2392_vm12, %v8440_v8, %v6748_v16  ;;  %v2749_v10 = vsel %vm2392_vm12, %v8407_v25, %v6747_v31  ;;  %v6802_v55 = vld [vmem:[%s8965_s5 + $0x18] sm:$0xff]  }
 0x2fa   : > { %v6743_v60 = vunpack.i.h.bf16 %v6741_v57  ;;  %v6742_v2 = vunpack.i.l.bf16 %v6741_v57  ;;  %v6751_v54 = vpop.permute.xlu1 %6750 }
 0x2fb   : > { %v6753_v17 = vunpack.i.h.bf16 %v6751_v54  ;;  %v6752_v18 = vunpack.i.l.bf16 %v6751_v54 }
 0x2fc   : > { %v2789_v44 = vsel %vm2760_vm15, %v2781_v3, %v6742_v2  ;;  %v2790_v41 = vsel %vm2760_vm15, %v2782_v22, %v6743_v60 }
 0x2fd   : > { %v2800_v7 = vpack.c.bf16 %v2790_v41, %v2789_v44  ;;  %v2758_v20 = vsel %vm2751_vm14, %v2749_v10, %v6752_v18  ;;  %v2759_v33 = vsel %vm2751_vm14, %v2750_v35, %v6753_v17  ;;  %v3135_v41 = vstv %s3107_s22 }
 0x2ff   : > { %3016 = vmatprep.mubr.bf16.mxu1 %v2800_v7 }
 0x300   : > { %3017 = vmatmul.mubr.bf16.gmra.mxu1 %v2799_v11 }
 0x312   : > { %v6756_v62 = vpop.permute.xlu0 %6755 }
 0x313   : > { %v6771_v15 = vpop.permute.xlu1 %6770  ;;  %v6758_v51 = vunpack.i.h.bf16 %v6756_v62  ;;  %v6757_v5 = vunpack.i.l.bf16 %v6756_v62 }
 0x314   : > { %v6773_v19 = vunpack.i.h.bf16 %v6771_v15  ;;  %v6772_v39 = vunpack.i.l.bf16 %v6771_v15 }
 0x315   : > { %v2776_v24 = vsel %vm2392_vm12, %v8477_v50, %v6758_v51  ;;  %v2775_v37 = vsel %vm2392_vm12, %v8442_v9, %v6757_v5  ;;  %v2550_v9 = vld [vmem:[#allocation3 + $0x92] sm:$0xff] }
 0x316   : > { %v6761_v14 = vpop.permute.xlu0 %6760  ;;  %v2767_v46 = vsel %vm2760_vm15, %v2758_v20, %v6772_v39  ;;  %v2768_v25 = vsel %vm2760_vm15, %v2759_v33, %v6773_v19  ;;  %v2804_v50 = vpack.c.bf16 %v2550_v9, %v8470_v34  ;;  %v3108_v34 = vlaneseq }
 0x317   : > { %v6763_v59 = vunpack.i.h.bf16 %v6761_v14  ;;  %v6762_v28 = vunpack.i.l.bf16 %v6761_v14  ;;  %v2802_v42 = vpack.c.bf16 %v2768_v25, %v2767_v46 }
 0x318   : > { %v8581_v30 = vshrl.u32 %v3108_v34, 7  ;;  %v3118_v29 = vand.u32 127, %v3108_v34 }
 0x319   : > { %v2783_v45 = vsel %vm2751_vm14, %v2775_v37, %v6762_v28  ;;  %v2784_v8 = vsel %vm2751_vm14, %v2776_v24, %v6763_v59 }
 0x31a   : > { %v6766_v6 = vpop.permute.xlu0 %6765  ;;  %v3111_v63 = vadd.s32 16, %v8581_v30  ;;  %v3112_v57 = vadd.s32 24, %v8581_v30  ;;  %v3110_v2 = vadd.s32 8, %v8581_v30  ;;  %v3119_v3 = vmul.u32 64, %v8581_v30 }
 0x31b   : > { %v6768_v61 = vunpack.i.h.bf16 %v6766_v6  ;;  %v6767_v43 = vunpack.i.l.bf16 %v6766_v6  ;;  %v3115_v54 = vadd.s32 48, %v8581_v30  ;;  %v3116_v15 = vadd.s32 56, %v8581_v30 }
 0x31c   : > { %v3121_v60 = vmul.u32 64, %v3111_v63  ;;  %v3122_v22 = vmul.u32 64, %v3112_v57  ;;  %v3127_v7 = vadd.s32 %v3119_v3, %v3118_v29  ;;  %v3113_v51 = vadd.s32 32, %v8581_v30 }
 0x31d   : > { %v2791_v21 = vsel %vm2760_vm15, %v2783_v45, %v6767_v43  ;;  %v2792_v47 = vsel %vm2760_vm15, %v2784_v8, %v6768_v61  ;;  %v3120_v44 = vmul.u32 64, %v3110_v2  ;;  %v3125_v14 = vmul.u32 64, %v3115_v54 }
 0x31e   : > { %v2803_v52 = vpack.c.bf16 %v2792_v47, %v2791_v21  ;;  %v3129_v58 = vadd.s32 %v3121_v60, %v3118_v29  ;;  %v3130_v11 = vadd.s32 %v3122_v22, %v3118_v29  ;;  %v3136_v17 = vadd.s32 %v3135_v41, %v3127_v7 }
 0x31f   : > { %v3128_v31 = vadd.s32 %v3120_v44, %v3118_v29  ;;  %v3114_v5 = vadd.s32 40, %v8581_v30  ;;  %v3126_v28 = vmul.u32 64, %v3116_v15  ;;  %v3133_v20 = vadd.s32 %v3125_v14, %v3118_v29 }
 0x320   : > { %3024 = vmatprep.mubr.bf16.mxu1 %v2803_v52  ;;  %v3138_v16 = vadd.s32 %v3135_v41, %v3129_v58  ;;  %v3139_v18 = vadd.s32 %v3135_v41, %v3130_v11  ;;  %v3144_v35 = vshrl.u32 %v3136_v17, 16  ;;  %v3123_v33 = vmul.u32 64, %v3113_v51 }
 0x321   : > { %3025 = vmatmul.mubr.bf16.gmra.mxu1 %v2802_v42  ;;  %v3137_v59 = vadd.s32 %v3135_v41, %v3128_v31  ;;  %v3124_v6 = vmul.u32 64, %v3114_v5  ;;  %v3134_v43 = vadd.s32 %v3126_v28, %v3118_v29  ;;  %v3142_v46 = vadd.s32 %v3135_v41, %v3133_v20 }
 0x322   : > { %5926 = vmatprep.mubr.msk.bf16.mxu1 %vm2392_vm12, %v2795_v12  ;;  %v6794_v12 = vld [vmem:[%s8965_s5 + $0x38] sm:$0xff]   ;;  %v3146_v39 = vshrl.u32 %v3138_v16, 16  ;;  %v3147_v10 = vshrl.u32 %v3139_v18, 16  ;;  %v3152_v45 = vxor.u32 %v3144_v35, %v3136_v17  ;;  %v3131_v25 = vadd.s32 %v3123_v33, %v3118_v29 }
 0x323   : > { %5796 = vmatpush3.bf16.msra.mxu0 %v6794_v12  ;;  %v3145_v61 = vshrl.u32 %v3137_v59, 16  ;;  %v3132_v21 = vadd.s32 %v3124_v6, %v3118_v29  ;;  %v3143_v9 = vadd.s32 %v3135_v41, %v3134_v43  ;;  %v3150_v12 = vshrl.u32 %v3142_v46, 16 }
 0x324   : > { %5797 = vmatprep.subr.bf16.mxu0 %v6795_v1  ;;  %v3154_v37 = vxor.u32 %v3146_v39, %v3138_v16  ;;  %v3155_v8 = vxor.u32 %v3147_v10, %v3139_v18  ;;  %v3140_v1 = vadd.s32 %v3135_v41, %v3131_v25 }
 0x325   : > { %v3153_v42 = vxor.u32 %v3145_v61, %v3137_v59 }
 0x326   : > { %v3162_v52 = vmul.u32 2146121005, %v3154_v37  ;;  %v3163_v13 = vmul.u32 2146121005, %v3155_v8 }
 0x327   : > { %5798 = vmatpush3.bf16.msra.mxu0 %v6796_v23  ;;  %v3141_v23 = vadd.s32 %v3135_v41, %v3132_v21 }
 0x328   : > { %v3171_v34 = vshrl.u32 %v3163_v13, 15 }
 0x329   : > { %5927 = vmatmul.mubr.msk.bf16.vlgmr.msra.gmra.mxu1 %vm2392_vm12, %v2798_v32  ;;  %v6797_v32 = vld [vmem:[%s8965_s5 + $0x68] sm:$0xff]   ;;  %v3149_v63 = vshrl.u32 %v3141_v23, 16 }
 0x32a   : > { %5930 = vmatprep.mubr.msk.bf16.mxu1 %vm2392_vm12, %v2801_v48  ;;  %5799 = vmatprep.subr.bf16.mxu0 %v6797_v32  ;;  %v6800_v48 = vld [vmem:[%s8965_s5 + $0x20] sm:$0xff]   ;;  %v3170_v32 = vshrl.u32 %v3162_v52, 15  ;;  %v3179_v3 = vxor.u32 %v3171_v34, %v3163_v13 }
 0x32b   : > { %5800 = vmatpush3.bf16.msra.mxu0 %v6798_v26  ;;  %v3161_v26 = vmul.u32 2146121005, %v3153_v42  ;;  %v3157_v41 = vxor.u32 %v3149_v63, %v3141_v23 }
 0x32c   : > { %5801 = vmatprep.subr.bf16.mxu0 %v6799_v40  ;;  %v3151_v40 = vshrl.u32 %v3143_v9, 16  ;;  %v3178_v57 = vxor.u32 %v3170_v32, %v3162_v52  ;;  %v3187_v31 = vmul.u32 2221713035, %v3179_v3 }
 0x32d   : > { %v3169_v29 = vshrl.u32 %v3161_v26, 15  ;;  %v3165_v14 = vmul.u32 2146121005, %v3157_v41 }
 0x32e   : > { %v3159_v60 = vxor.u32 %v3151_v40, %v3143_v9  ;;  %v3186_v7 = vmul.u32 2221713035, %v3178_v57  ;;  %v3195_v35 = vshrl.u32 %v3187_v31, 16  ;;  %v8626_v9 = vld [vmem:[%s8964_s4] ss:$0 sm:$0xff] }
 0x32f   : > { %5802 = vmatpush3.bf16.msra.mxu0 %v6800_v48  ;;  %v3177_v11 = vxor.u32 %v3169_v29, %v3161_v26  ;;  %v3173_v6 = vshrl.u32 %v3165_v14, 15 }
 0x330   : > { %5803 = vmatprep.subr.bf16.mxu0 %v6801_v49  ;;  %v3167_v54 = vmul.u32 2146121005, %v3159_v60  ;;  %v3194_v5 = vshrl.u32 %v3186_v7, 16  ;;  %v3203_v21 = vxor.u32 %v3195_v35, %v3187_v31 }
 0x331   : > { %5931 = vmatmul.mubr.msk.bf16.gmra.mxu1 %vm2392_vm12, %v2804_v50  ;;  %v3160_v50 = vmul.u32 2146121005, %v3152_v45  ;;  %v3185_v39 = vmul.u32 2221713035, %v3177_v11 }
 0x332   : > { %v3175_v59 = vshrl.u32 %v3167_v54, 15  ;;  %v3202_v43 = vxor.u32 %v3194_v5, %v3186_v7  ;;  %v3211_v26 = vshrl.u32 %v3203_v21, 8 }
 0x333   : > { %5804 = vmatpush3.bf16.msra.mxu0 %v6802_v55  ;;  %v3168_v48 = vshrl.u32 %v3160_v50, 15  ;;  %v3158_v55 = vxor.u32 %v3150_v12, %v3142_v46  ;;  %v3193_v45 = vshrl.u32 %v3185_v39, 16 }
 0x334   : > { %5805 = vmatprep.subr.bf16.mxu0 %v6803_v56  ;;  %v3148_v56 = vshrl.u32 %v3140_v1, 16  ;;  %v3183_v8 = vxor.u32 %v3175_v59, %v3167_v54  ;;  %vm8643_vm3 = vcmp.ge.s32.totalorder %v3211_v26, 8388608 }
 0x335   : > { %v3176_v2 = vxor.u32 %v3168_v48, %v3160_v50  ;;  %v3166_v58 = vmul.u32 2146121005, %v3158_v55 }
 0x336   : > { %v3156_v44 = vxor.u32 %v3148_v56, %v3140_v1  ;;  %v3191_v23 = vmul.u32 2221713035, %v3183_v8 }
 0x337   : > { %v3184_v16 = vmul.u32 2221713035, %v3176_v2  ;;  %v3174_v17 = vshrl.u32 %v3166_v58, 15 }
 0x338   : > { %v3164_v18 = vmul.u32 2146121005, %v3156_v44 }
 0x339   : > { %v3192_v28 = vshrl.u32 %v3184_v16, 16  ;;  %v3182_v20 = vxor.u32 %v3174_v17, %v3166_v58  ;;  %v3199_v58 = vshrl.u32 %v3191_v23, 16 }
 0x33a   : > { %v3172_v33 = vshrl.u32 %v3164_v18, 15 }
 0x33b   : > { %v3200_v25 = vxor.u32 %v3192_v28, %v3184_v16  ;;  %v3190_v50 = vmul.u32 2221713035, %v3182_v20  ;;  %v3207_v35 = vxor.u32 %v3199_v58, %v3191_v23 }
 0x33d   : > { %v3198_v34 = vshrl.u32 %v3190_v50, 16 }
 0x340   : > { %v8586_v27 = vpop.f32.mrf.mxu1 }
 0x342   : > { %v8590_v53 = vpop.f32.mrf.mxu1 }
 0x343   : > { %v5767_v46 = vadd.f32 %v8590_v53, %v8586_v27  ;;  %v3210_v27 = vshrl.u32 %v3202_v43, 8  ;;  %v3201_v53 = vxor.u32 %v3193_v45, %v3185_v39 }
 0x344   : > { %v8595_v4 = vpop.f32.mrf.mxu1 }
 0x345   : > { %vm8635_vm1 = vcmp.ge.s32.totalorder %v3210_v27, 8388608  ;;  %v3209_v3 = vshrl.u32 %v3201_v53, 8 }
 0x346   : > { %v8597_v38 = vpop.f32.mrf.mxu1 }
 0x347   : > { %v5770_v52 = vadd.f32 %v8597_v38, %v8595_v4  ;;  %v3003_v4 = vadd.f32 %v5767_v46, %v8626_v9  ;;  %v3208_v38 = vshrl.u32 %v3200_v25, 8  ;;  %vm8650_vm4 = vcmp.ge.s32.totalorder %v3209_v3, 8388608 }
 0x349   : > { %v3006_v48 = vadd.f32 %v5770_v52, %v8626_v9  ;;  %vm8639_vm2 = vcmp.ge.s32.totalorder %v3208_v38, 8388608 }
 0x380   : > { %v8600_v62 = vpop.f32.mrf.mxu1 }
 0x382   : > { %v8605_v19 = vpop.f32.mrf.mxu1 }
 0x383   : > { %v5773_v37 = vadd.f32 %v8605_v19, %v8600_v62  ;;  %v3180_v62 = vxor.u32 %v3172_v33, %v3164_v18  ;;  %v3181_v19 = vxor.u32 %v3173_v6, %v3165_v14 }
 0x384   : > { %v8607_v24 = vpop.f32.mrf.mxu1 }
 0x385   : > { %v3011_v12 = vadd.f32 %v5773_v37, %v8626_v9  ;;  %v3188_v55 = vmul.u32 2221713035, %v3180_v62  ;;  %v3189_v56 = vmul.u32 2221713035, %v3181_v19 }
 0x386   : > { %v5775_v47 = vpop.f32.mrf.mxu1 }
 0x387   : > { %v5776_v13 = vadd.f32 %v5775_v47, %v8607_v24  ;;  %v3197_v31 = vshrl.u32 %v3189_v56, 16 }
 0x389   : > { %v3014_v47 = vadd.f32 %v5776_v13, %v8626_v9 }
 0x3c0   : > { %v8609_v36 = vpop.f32.mrf.mxu1 }
 0x3c2   : > { %v8611_v49 = vpop.f32.mrf.mxu1 }
 0x3c3   : > { %v5779_v29 = vadd.f32 %v8611_v49, %v8609_v36  ;;  %v3196_v49 = vshrl.u32 %v3188_v55, 16 }
 0x3c4   : > { %v8613_v22 = vpop.f32.mrf.mxu1 }
 0x3c5   : > { %v3019_v28 = vadd.f32 %v5779_v29, %v8626_v9  ;;  %v3204_v43 = vxor.u32 %v3196_v49, %v3188_v55  ;;  %v6806_v29 = vld [vmem:[%s8965_s5 + $0xb8] sm:$0xff]   ;;  %v6808_v49 = vld [vmem:[%s8965_s5 + $0xb0] sm:$0xff]  }
 0x3c6   : > { %v8615_v15 = vpop.f32.mrf.mxu1 }
 0x3c7   : > { %v5782_v5 = vadd.f32 %v8615_v15, %v8613_v22  ;;  %v3205_v22 = vxor.u32 %v3197_v31, %v3189_v56  ;;  %v3212_v53 = vshrl.u32 %v3204_v43, 8  ;;  %v6809_v31 = vld [vmem:[%s8965_s5 + $0x48] sm:$0xff]   ;;  %v6815_v43 = vld [vmem:[%s8965_s5 + $0x40] sm:$0xff]  }
 0x3c9   : > { %vm8667_vm7 = vcmp.ge.s32.totalorder %v3212_v53, 8388608  ;;  %v6827_v53 = vld [vmem:[%s8965_s5 + $0x80] sm:$0xff]  }
 0x3e1   : > { %v5783_v51 = vpop.f32.mrf.mxu1 }
 0x3e3   : > { %v5784_v10 = vpop.f32.mrf.mxu1 }
 0x3e4   : > { %v5785_v63 = vadd.f32 %v5784_v10, %v5783_v51  ;;  %v3206_v51 = vxor.u32 %v3198_v34, %v3190_v50  ;;  %v3215_v50 = vshrl.u32 %v3207_v35, 8 }
 0x3e5   : > { %v5786_v61 = vpop.f32.mrf.mxu1 }
 0x3e6   : > { %v3027_v14 = vadd.f32 %v5785_v63, %v8626_v9  ;;  %v3214_v52 = vshrl.u32 %v3206_v51, 8  ;;  %vm3223_vm6 = vcmp.ge.s32.totalorder %v3215_v50, 8388608  ;;  %v6822_v50 = vld [vmem:[%s8965_s5 + $0xc8] sm:$0xff]  }
 0x3e7   : > { %v5787_v42 = vpop.f32.mrf.mxu1 }
 0x3e8   : > { %v5788_v54 = vadd.f32 %v5787_v42, %v5786_v61  ;;  %vm3222_vm5 = vcmp.ge.s32.totalorder %v3214_v52, 8388608 }
 0x3e9   : > { %v5928_v1 = vpop.f32.mrf.mxu1 }
 0x3ea   : > { %v3076_v32 = vadd.f32 %v5928_v1, %v3011_v12  ;;  %v3030_v45 = vadd.f32 %v5788_v54, %v8626_v9  ;;  %v3022_v12 = vadd.f32 %v5782_v5, %v8626_v9 }
 0x3eb   : > { %v3067_v40 = vpop.f32.mrf.mxu1 }
 0x3ec   : > { %v3100_v57 = vmax.f32 %v3076_v32, 0.0  ;;  %v3068_v24 = vadd.f32 %v3067_v40, %v3003_v4  ;;  %v3213_v32 = vshrl.u32 %v3205_v22, 8  ;;  %v6817_v22 = vld [vmem:[%s8965_s5 + $0xd8] sm:$0xff]  }
 0x3ed   : > { %v5929_v2 = vpop.f32.mrf.mxu1 }
 0x3ee   : > { %v3098_v44 = vmax.f32 %v3068_v24, 0.0  ;;  %v3079_v7 = vadd.f32 %v5929_v2, %v3014_v47  ;;  %v3226_v16 = vmul.f32 2.0, %v3100_v57  ;;  %vm8671_vm8 = vcmp.ge.s32.totalorder %v3213_v32, 8388608  ;;  %v6804_v24 = vld [vmem:[%s8965_s5 + $0x10] sm:$0xff]   ;;  %v6805_v47 = vld [vmem:[%s8965_s5 + $0xf8] sm:$0xff]  }
 0x3ef   : > { %v3070_v36 = vpop.f32.mrf.mxu1  ;;  %5806 = vmatpush3.bf16.msra.mxu0 %v6804_v24  ;;  %5817 = vmatprep.subr.bf16.mxu1 %v6805_v47 }
 0x3f0   : > { %v3101_v17 = vmax.f32 %v3079_v7, 0.0  ;;  %v3071_v18 = vadd.f32 %v3070_v36, %v3006_v48  ;;  %v3224_v10 = vmul.f32 2.0, %v3098_v44  ;;  %v3234_v37 = vsel %vm8635_vm1, %v3226_v16, 0.0  ;;  %5818 = vmatpush3.bf16.msra.mxu1 %v6806_v29  ;;  %v6807_v36 = vld [vmem:[%s8965_s5 + $0xf0] sm:$0xff]   ;;  %5807 = vmatprep.subr.bf16.mxu0 %v6809_v31 }
 0x3f1   : > { %v5932_v59 = vpop.f32.mrf.mxu1  ;;  %5819 = vmatprep.subr.bf16.mxu1 %v6807_v36 }
 0x3f2   : > { %v3227_v20 = vmul.f32 2.0, %v3101_v17  ;;  %v3099_v33 = vmax.f32 %v3071_v18, 0.0  ;;  %v3092_v6 = vadd.f32 %v5932_v59, %v3027_v14  ;;  %v3232_v62 = vsel %vm8639_vm2, %v3224_v10, 0.0  ;;  %v6810_v17 = vld [vmem:[%s8965_s5 + $0x8] sm:$0xff]  }
 0x3f3   : > { %v3083_v61 = vpop.f32.mrf.mxu1  ;;  %v6811_v18 = vld [vmem:[%s8965_s5 + $0xe8] sm:$0xff]   ;;  %5808 = vmatpush3.bf16.msra.mxu0 %v6810_v17 }
 0x3f4   : > { %v3235_v15 = vsel %vm8643_vm3, %v3227_v20, 0.0  ;;  %v3225_v8 = vmul.f32 2.0, %v3099_v33  ;;  %v3104_v46 = vmax.f32 %v3092_v6, 0.0  ;;  %v3084_v25 = vadd.f32 %v3083_v61, %v3019_v28  ;;  %5820 = vmatpush3.bf16.msra.mxu1 %v6808_v49  ;;  %v6812_v14 = vld [vmem:[%s8965_s5 + $0xa8] sm:$0xff]   ;;  %v6814_v61 = vld [vmem:[%s8965_s5 + $0xa0] sm:$0xff]   ;;  %5809 = vmatprep.subr.bf16.mxu0 %v6815_v43 }
 0x3f5   : > { %v3241_v21 = vmax.f32 %v3234_v37, %v3235_v15  ;;  %v5933_v42 = vpop.f32.mrf.mxu1  ;;  %5821 = vmatprep.subr.bf16.mxu1 %v6811_v18  ;;  %v6813_v37 = vld [vmem:[%s8965_s5 + $0xe0] sm:$0xff]  }
 0x3f6   : > { %v3233_v19 = vsel %vm8650_vm4, %v3225_v8, 0.0  ;;  %v3095_v13 = vadd.f32 %v5933_v42, %v3030_v45  ;;  %v3102_v27 = vmax.f32 %v3084_v25, 0.0  ;;  %v3230_v4 = vmul.f32 2.0, %v3104_v46  ;;  %v6816_v45 = vld [vmem:[%s8965_s5] sm:$0xff]   ;;  %v6818_v46 = vld [vmem:[%s8965_s5 + $0x98] sm:$0xff]   ;;  %v6821_v42 = vld [vmem:[%s8965_s5 + $0x90] sm:$0xff]  }
 0x3f7   : > { %3245 = vst.msk [vmem:[#allocation6 + $0x8] sm:$0xff] %vm2751_vm14, %v3241_v21  ;;  %v3240_v1 = vmax.f32 %v3232_v62, %v3233_v19  ;;  %v3086_v23 = vpop.f32.mrf.mxu1  ;;  %v3312_v25 = vld [vmem:[#allocation4 + $0x29] sm:$0xf]  ;;  %5810 = vmatpush3.bf16.msra.mxu0 %v6816_v45  ;;  %v6819_v21 = vld [vmem:[%s8965_s5 + $0xd0] sm:$0xff]  }
 0x3f8   : > { %v3105_v38 = vmax.f32 %v3095_v13, 0.0  ;;  %v3087_v26 = vadd.f32 %v3086_v23, %v3022_v12  ;;  %v3228_v9 = vmul.f32 2.0, %v3102_v27  ;;  %v3238_v56 = vsel %vm3222_vm5, %v3230_v4, 0.0  ;;  %5822 = vmatpush3.bf16.msra.mxu1 %v6812_v14  ;;  %5934 = vmatprep.subr.bf16.mxu0 %v7164_v0  ;;  %v6824_v13 = vld [vmem:[%s8965_s5 + $0x88] sm:$0xff]   ;;  %v6825_v12 = vld [vmem:[%s8965_s5 + $0xc0] sm:$0xff]  }
 0x3f9   : > { %3244 = vst.msk [vmem:[#allocation6] sm:$0xff] %vm2751_vm14, %v3240_v1  ;;  %5823 = vmatprep.subr.bf16.mxu1 %v6813_v37  ;;  %v6823_v37 = vld [vmem:[%s8965_s5 + $0x110] sm:$0xff]  }
 0x3fa   : > { %v3231_v40 = vmul.f32 2.0, %v3105_v38  ;;  %v3103_v48 = vmax.f32 %v3087_v26, 0.0  ;;  %v3236_v44 = vsel %vm8667_vm7, %v3228_v9, 0.0  ;;  %v3322_v38 = vpop.permute.xlu0 %3321  ;;  %v3288_v9 = vld [vmem:[#allocation4 + $0x2] sm:$0xf] }
 0x3fc   : > { %v3239_v63 = vsel %vm3223_vm6, %v3231_v40, 0.0  ;;  %v3229_v57 = vmul.f32 2.0, %v3103_v48  ;;  %5824 = vmatpush3.bf16.msra.mxu1 %v6814_v61 }
 0x3fd   : > { %v3243_v60 = vmax.f32 %v3238_v56, %v3239_v63  ;;  %5825 = vmatprep.subr.bf16.mxu1 %v6817_v22 }
 0x3fe   : > { %v3250_v2 = vld [vmem:[#allocation6 + $0x8] ss:$2 sm:$0xf]  ;;  %v3258_v3 = vld [vmem:[#allocation6 + $0x9] ss:$2 sm:$0xf] }
 0x3ff   : > { %v3264_v58 = vmax.f32 %v3250_v2, %v3258_v3  ;;  %3247 = vst.msk [vmem:[#allocation6 + $0x18] sm:$0xff] %vm2751_vm14, %v3243_v60  ;;  %v3237_v41 = vsel %vm8671_vm8, %v3229_v57, 0.0 }
 0x400   : > { %v3248_v7 = vld [vmem:[#allocation6] ss:$2 sm:$0xf]  ;;  %v3256_v11 = vld [vmem:[#allocation6 + $0x1] ss:$2 sm:$0xf]  ;;  %v3242_v54 = vmax.f32 %v3236_v44, %v3237_v41  ;;  %5826 = vmatpush3.bf16.msra.mxu1 %v6818_v46 }
 0x401   : > { %v3263_v16 = vmax.f32 %v3248_v7, %v3256_v11  ;;  %3277 = vst.msk [vmem:[#allocation4 + $0x11] sm:$0xf] %vm3275_vm9, %v3264_v58  ;;  %5827 = vmatprep.subr.bf16.mxu1 %v6819_v21  ;;  %v3280_v44 = vld [vmem:[#allocation4] sm:$0xf] }
 0x402   : > { %3246 = vst.msk [vmem:[#allocation6 + $0x10] sm:$0xff] %vm2751_vm14, %v3242_v54  ;;  %v3381_v18 = vsel %vm2751_vm14, %v3280_v44, %v3322_v38  ;;  %v6828_v38 = vld [vmem:[%s8965_s5 + $0x100] sm:$0xff]  }
 0x403   : > { %3276 = vst.msk [vmem:[#allocation4 + $0x9] sm:$0xf] %vm3275_vm9, %v3263_v16  ;;  %v6854_v44 = vld [vmem:[#allocation8 + $0x18c] ss:$16 sps:$4 sm:$0xff]  }
 0x404   : > { %5828 = vmatpush3.bf16.msra.mxu1 %v6821_v42 }
 0x405   : > { %5829 = vmatprep.subr.bf16.mxu1 %v6822_v50 }
 0x406   : > { %v3254_v51 = vld [vmem:[#allocation6 + $0x18] ss:$2 sm:$0xf]  ;;  %v3262_v5 = vld [vmem:[#allocation6 + $0x19] ss:$2 sm:$0xf] }
 0x407   : > { %v3266_v39 = vmax.f32 %v3254_v51, %v3262_v5 }
 0x408   : > { %v3293_v59 = vld [vmem:[#allocation4 + $0x10] sm:$0xf]  ;;  %5830 = vmatpush3.bf16.msra.mxu1 %v6824_v13 }
 0x409   : > { %v3286_v28 = vld [vmem:[#allocation4 + $0x11] sm:$0xf]  ;;  %v3252_v35 = vld [vmem:[#allocation6 + $0x10] ss:$2 sm:$0xf]  ;;  %3339 = vrot.lane.b32.xlu1 %v3293_v59, %s8996_s24  ;;  %5831 = vmatprep.subr.bf16.mxu1 %v6825_v12  ;;  %v6820_v59 = vld [vmem:[%s8965_s5 + $0x118] sm:$0xff]  }
 0x40a   : > { %v3260_v10 = vld [vmem:[#allocation6 + $0x11] ss:$2 sm:$0xf]  ;;  %3279 = vst.msk [vmem:[#allocation4 + $0x21] sm:$0xf] %vm3275_vm9, %v3266_v39  ;;  %3325 = vrot.lane.b32.xlu0 %v3286_v28, %s8996_s24 }
 0x40b   : > { %v3265_v20 = vmax.f32 %v3252_v35, %v3260_v10  ;;  %v3309_v33 = vld [vmem:[#allocation4 + $0x11] sm:$0xf]  ;;  %v3285_v6 = vld [vmem:[#allocation4 + $0x9] sm:$0xf] }
 0x40c   : > { %v3292_v15 = vld [vmem:[#allocation4 + $0x8] sm:$0xf]  ;;  %v3301_v27 = vld [vmem:[#allocation4 + $0x12] sm:$0xf]  ;;  %5832 = vmatpush3.bf16.msra.mxu1 %v6827_v53 }
 0x40d   : > { %3278 = vst.msk [vmem:[#allocation4 + $0x19] sm:$0xf] %vm3275_vm9, %v3265_v20  ;;  %3323 = vrot.lane.b32.xlu1 %v3285_v6, %s8996_s24  ;;  %v3300_v1 = vld [vmem:[#allocation4 + $0xa] sm:$0xf]  ;;  %v3290_v47 = vld [vmem:[#allocation4 + $0x12] sm:$0xf] }
 0x40e   : > { %3369 = vrot.lane.b32.xlu0 %v3309_v33, %s8996_s24  ;;  %v3289_v57 = vld [vmem:[#allocation4 + $0xa] sm:$0xf]  ;;  %v3282_v16 = vld [vmem:[#allocation4 + $0x10] sm:$0xf] }
 0x40f   : > { %v3281_v41 = vld [vmem:[#allocation4 + $0x8] sm:$0xf]  ;;  %v3305_v61 = vld [vmem:[#allocation4 + $0x10] sm:$0xf] }
 0x410   : > { %v3308_v20 = vld [vmem:[#allocation4 + $0x28] sm:$0xf]  ;;  %v3297_v21 = vld [vmem:[#allocation4 + $0x11] sm:$0xf] }
 0x411   : > { %v3295_v8 = vld [vmem:[#allocation4 + $0x20] sm:$0xf] }
 0x412   : > { %3337 = vrot.lane.b32.xlu0 %v3292_v15, %s8996_s24  ;;  %3343 = vrot.lane.b32.xlu1 %v3295_v8, %s8996_s24  ;;  %v3311_v62 = vld [vmem:[#allocation4 + $0x21] sm:$0xf] }
 0x413   : > { %v3303_v4 = vld [vmem:[#allocation4 + $0x22] sm:$0xf] }
 0x414   : > { %v3294_v52 = vld [vmem:[#allocation4 + $0x18] sm:$0xf]  ;;  %v3307_v33 = vld [vmem:[#allocation4 + $0x20] sm:$0xf] }
 0x415   : > { %v3287_v19 = vld [vmem:[#allocation4 + $0x19] sm:$0xf]  ;;  %v3299_v12 = vld [vmem:[#allocation4 + $0x21] sm:$0xf] }
 0x416   : > { %3341 = vrot.lane.b32.xlu0 %v3294_v52, %s8996_s24  ;;  %3375 = vrot.lane.b32.xlu1 %v3312_v25, %s8996_s24  ;;  %v3302_v23 = vld [vmem:[#allocation4 + $0x1a] sm:$0xf]  ;;  %v3296_v25 = vld [vmem:[#allocation4 + $0x9] sm:$0xf] }
 0x417   : > { %v3310_v32 = vld [vmem:[#allocation4 + $0x19] sm:$0xf] }
 0x418   : > { %v3291_v24 = vld [vmem:[#allocation4 + $0x1a] sm:$0xf] }
 0x419   : > { %v3283_v49 = vld [vmem:[#allocation4 + $0x18] sm:$0xf] }
 0x41a   : > { %3373 = vrot.lane.b32.xlu0 %v3311_v62, %s8996_s24  ;;  %3327 = vrot.lane.b32.xlu1 %v3287_v19, %s8996_s24  ;;  %v3306_v43 = vld [vmem:[#allocation4 + $0x18] sm:$0xf] }
 0x41b   : > { %v6826_v19 = vld [vmem:[%s8965_s5 + $0x108] sm:$0xff]  }
 0x41c   : > { %v3298_v13 = vld [vmem:[#allocation4 + $0x19] sm:$0xf] }
 0x41e   : > { %3353 = vrot.lane.b32.xlu0 %v3300_v1, %s8996_s24  ;;  %3355 = vrot.lane.b32.xlu1 %v3301_v27, %s8996_s24 }
 0x422   : > { %3357 = vrot.lane.b32.xlu0 %v3302_v23, %s8996_s24  ;;  %3371 = vrot.lane.b32.xlu1 %v3310_v32, %s8996_s24 }
 0x426   : > { %3359 = vrot.lane.b32.xlu1 %v3303_v4, %s8996_s24 }
 0x47b   : > { %v3340_v26 = vpop.permute.xlu1 %3339 }
 0x47c   : > { %v3326_v40 = vpop.permute.xlu0 %3325  ;;  %v3386_v2 = vsel %vm2751_vm14, %v3289_v57, %v3340_v26  ;;  %v6839_v57 = vld [vmem:[#allocation8 + $0x1c4] ss:$16 sps:$4 sm:$0xff]  }
 0x47d   : > { %v3383_v14 = vsel %vm2751_vm14, %v3282_v16, %v3326_v40  ;;  %v6829_v40 = vld [vmem:[#allocation4 + $0x12] ss:$8 sps:$4 sm:$0xff]  }
 0x47e   : > { %v6855_v16 = vld [vmem:[#allocation8 + $0x160] ss:$16 sps:$4 sm:$0xff]  }
 0x47f   : > { %v3324_v34 = vpop.permute.xlu1 %3323 }
 0x480   : > { %v3370_v48 = vpop.permute.xlu0 %3369  ;;  %v3382_v54 = vsel %vm2751_vm14, %v3281_v41, %v3324_v34  ;;  %v6849_v41 = vld [vmem:[#allocation8 + $0x180] ss:$16 sps:$4 sm:$0xff]  }
 0x481   : > { %v5522_v5 = vcombine.low %v3381_v18, %v3382_v54  ;;  %v3393_v22 = vsel %vm2751_vm14, %v3305_v61, %v3370_v48  ;;  %v6830_v48 = vld [vmem:[#allocation4 + $0x22] ss:$8 sps:$4 sm:$0xff]  }
 0x482   : > { %v3449_v34 = vpack.c.bf16 %v6830_v48, %v6829_v40  ;;  %v6860_v54 = vld [vmem:[#allocation8 + $0x16c] ss:$16 sps:$4 sm:$0xff]   ;;  %v6861_v18 = vld [vmem:[#allocation8 + $0x140] ss:$16 sps:$4 sm:$0xff]  }
 0x484   : > { %v3338_v55 = vpop.permute.xlu0 %3337  ;;  %v3344_v56 = vpop.permute.xlu1 %3343 }
 0x485   : > { %v3385_v63 = vsel %vm2751_vm14, %v3288_v9, %v3338_v55  ;;  %v3388_v3 = vsel %vm2751_vm14, %v3291_v24, %v3344_v56  ;;  %v6833_v9 = vld [vmem:[#allocation8 + $0x1e4] ss:$16 sps:$4 sm:$0xff]   ;;  %v6836_v55 = vld [vmem:[#allocation8 + $0x1ec] ss:$16 sps:$4 sm:$0xff]   ;;  %v6831_v56 = vld [vmem:[#allocation8 + $0x1e0] ss:$16 sps:$4 sm:$0xff]  }
 0x486   : > { %v5523_v7 = vcombine.low %v3385_v63, %v3386_v2  ;;  %v6834_v63 = vld [vmem:[#allocation8 + $0x1e8] ss:$16 sps:$4 sm:$0xff]   ;;  %4174 = vmatprep.subr.bf16.mxu1 %v6836_v55  ;;  %v6842_v24 = vld [vmem:[#allocation8 + $0x1cc] ss:$16 sps:$4 sm:$0xff]   ;;  %v7179_v55 = vmov 1983009808  }
 0x487   : > { %v6846_v2 = vld [vmem:[#allocation8 + $0x1a8] ss:$16 sps:$4 sm:$0xff]  }
 0x488   : > { %v3342_v29 = vpop.permute.xlu0 %3341  ;;  %v3376_v60 = vpop.permute.xlu1 %3375 }
 0x489   : > { %v3387_v58 = vsel %vm2751_vm14, %v3290_v47, %v3342_v29  ;;  %v3396_v15 = vsel %vm2751_vm14, %v3308_v20, %v3376_v60  ;;  %v6837_v47 = vld [vmem:[#allocation8 + $0x1c0] ss:$16 sps:$4 sm:$0xff]   ;;  %v6840_v29 = vld [vmem:[#allocation8 + $0x1c8] ss:$16 sps:$4 sm:$0xff]   ;;  %v6845_v60 = vld [vmem:[#allocation8 + $0x1a4] ss:$16 sps:$4 sm:$0xff]  }
 0x48a   : > { %v5527_v11 = vcombine.low %v3387_v58, %v3388_v3  ;;  %v6848_v3 = vld [vmem:[#allocation8 + $0x1ac] ss:$16 sps:$4 sm:$0xff]   ;;  %v6851_v58 = vld [vmem:[#allocation8 + $0x184] ss:$16 sps:$4 sm:$0xff]   ;;  %v6876_v20 = vld [vmem:[#allocation8 + $0x108] ss:$16 sps:$4 sm:$0xff]  }
 0x48c   : > { %v3374_v36 = vpop.permute.xlu0 %3373  ;;  %v3328_v31 = vpop.permute.xlu1 %3327  ;;  %v3446_v17 = vpack.c.bf16 %v5527_v11, %v5523_v7  ;;  %v6852_v7 = vld [vmem:[#allocation8 + $0x188] ss:$16 sps:$4 sm:$0xff]   ;;  %v6857_v11 = vld [vmem:[#allocation8 + $0x164] ss:$16 sps:$4 sm:$0xff]  }
 0x48d   : > { %v3384_v51 = vsel %vm2751_vm14, %v3283_v49, %v3328_v31  ;;  %v3395_v6 = vsel %vm2751_vm14, %v3307_v33, %v3374_v36  ;;  %v6858_v36 = vld [vmem:[#allocation8 + $0x168] ss:$16 sps:$4 sm:$0xff]   ;;  %v6863_v49 = vld [vmem:[#allocation8 + $0x144] ss:$16 sps:$4 sm:$0xff]   ;;  %v6866_v31 = vld [vmem:[#allocation8 + $0x14c] ss:$16 sps:$4 sm:$0xff]  }
 0x48e   : > { %v5526_v39 = vcombine.low %v3383_v14, %v3384_v51  ;;  %3780 = vmatprep.mubr.bf16.mxu0 %v3446_v17  ;;  %v5529_v46 = vcombine.low %v3395_v6, %v3396_v15  ;;  %v7178_v17 = vmov 0   ;;  %v6864_v14 = vld [vmem:[#allocation8 + $0x148] ss:$16 sps:$4 sm:$0xff]   ;;  %v6869_v51 = vld [vmem:[#allocation8 + $0x124] ss:$16 sps:$4 sm:$0xff]  }
 0x48f   : > { %v6881_v33 = vld [vmem:[#allocation8 + $0xe4] ss:$16 sps:$4 sm:$0xff]   ;;  %v6884_v6 = vld [vmem:[#allocation8 + $0xec] ss:$16 sps:$4 sm:$0xff]  }
 0x490   : > { %v3445_v28 = vpack.c.bf16 %v5526_v39, %v5522_v5  ;;  %v3354_v35 = vpop.permute.xlu0 %3353  ;;  %v3356_v10 = vpop.permute.xlu1 %3355  ;;  %v6872_v5 = vld [vmem:[#allocation8 + $0x12c] ss:$16 sps:$4 sm:$0xff]   ;;  %v6867_v39 = vld [vmem:[#allocation8 + $0x120] ss:$16 sps:$4 sm:$0xff]  }
 0x491   : > { %v3389_v50 = vsel %vm2751_vm14, %v3296_v25, %v3354_v35  ;;  %v3390_v62 = vsel %vm2751_vm14, %v3297_v21, %v3356_v10  ;;  %v6878_v35 = vld [vmem:[#allocation8 + $0x10c] ss:$16 sps:$4 sm:$0xff]   ;;  %v6873_v10 = vld [vmem:[#allocation8 + $0x100] ss:$16 sps:$4 sm:$0xff]  }
 0x492   : > { %3781 = vmatmul.mubr.bf16.vlgmr.msra.gmra.mxu0 %v3445_v28  ;;  %v5524_v32 = vcombine.low %v3389_v50, %v3390_v62  ;;  %v6875_v28 = vld [vmem:[#allocation8 + $0x104] ss:$16 sps:$4 sm:$0xff]  }
 0x493   : > { %5935 = vmatpush3.bf16.msra.mxu0 %v6820_v59  ;;  %5942 = vmatprep.mubr.msk.bf16.mxu0 %vm7177_vm10, %v7164_v0  ;;  %v6870_v59 = vld [vmem:[#allocation8 + $0x128] ss:$16 sps:$4 sm:$0xff]  }
 0x494   : > { %v3372_v45 = vpop.permute.xlu1 %3371  ;;  %5936 = vmatprep.subr.bf16.mxu0 %v7164_v0  ;;  %v3358_v52 = vpop.permute.xlu0 %3357 }
 0x495   : > { %v3394_v8 = vsel %vm2751_vm14, %v3306_v43, %v3372_v45  ;;  %v3391_v53 = vsel %vm2751_vm14, %v3298_v13, %v3358_v52 }
 0x496   : > { %v5525_v42 = vcombine.low %v3393_v22, %v3394_v8  ;;  %v5530_v22 = vld [vmem:[%s8966_s6] ss:$0 sm:$0xff] }
 0x497   : > { %5937 = vmatpush3.bf16.msra.mxu0 %v6823_v37 }
 0x498   : > { %v3360_v1 = vpop.permute.xlu1 %3359  ;;  %5938 = vmatprep.subr.bf16.mxu0 %v7164_v0  ;;  %v3448_v27 = vpack.c.bf16 %v5529_v46, %v5525_v42 }
 0x499   : > { %v3392_v23 = vsel %vm2751_vm14, %v3299_v12, %v3360_v1 }
 0x49a   : > { %v5528_v4 = vcombine.low %v3391_v53, %v3392_v23  ;;  %3821 = vmatprep.mubr.bf16.mxu1 %v3448_v27 }
 0x49b   : > { %5939 = vmatpush3.bf16.msra.mxu0 %v6826_v19 }
 0x49c   : > { %v3447_v26 = vpack.c.bf16 %v5528_v4, %v5524_v32  ;;  %5940 = vmatprep.subr.bf16.mxu0 %v7164_v0  ;;  %v6843_v0 = vld [vmem:[#allocation8 + $0x1a0] ss:$16 sps:$4 sm:$0xff]  }
 0x49e   : > { %3822 = vmatmul.mubr.bf16.vlgmr.msra.gmra.mxu1 %v3447_v26 }
 0x49f   : > { %5941 = vmatpush3.bf16.msra.mxu0 %v6828_v38  ;;  %4175 = vmatpush1.bf16.msra.mxu1 %v6834_v63 }
 0x4a0   : > { %4133 = vmatprep.subr.bf16.mxu0 %v6833_v9  ;;  %4176 = vmatprep.subr.bf16.mxu1 %v6842_v24 }
 0x4a1   : > { %4206 = vmatprep.mubr.bf16.mxu1 %v7178_v17 }
 0x4a2   : > { %5943 = vmatmul.mubr.msk.bf16.vlgmr.msra.gmra.mxu0 %vm2751_vm14, %v3449_v34 }
 0x4a3   : > { %4134 = vmatpush1.bf16.msra.mxu0 %v6831_v56  ;;  %4177 = vmatpush1.bf16.msra.mxu1 %v6840_v29  ;;  %v3896_v56 = vunpack.c.l.s4 %v7179_v55  ;;  %v6951_v55 = vld [vmem:[#allocation8 + $0x260] ss:$16 sps:$4 sm:$0xff]  }
 0x4a4   : > { %4135 = vmatprep.subr.bf16.mxu0 %v6839_v57  ;;  %4178 = vmatprep.subr.bf16.mxu1 %v6848_v3 }
 0x4a5   : > { %4165 = vmatprep.mubr.bf16.mxu0 %v7178_v17  ;;  %v3897_v63 = vunpack.c.0.s8 %v3896_v56  ;;  %v6954_v56 = vld [vmem:[#allocation8 + $0x268] ss:$16 sps:$4 sm:$0xff]  }
 0x4a7   : > { %4136 = vmatpush1.bf16.msra.mxu0 %v6837_v47  ;;  %4179 = vmatpush1.bf16.msra.mxu1 %v6846_v2  ;;  %v3900_v2 = vsub.s32 %v3897_v63, %v8581_v30  ;;  %v6959_v63 = vld [vmem:[#allocation8 + $0x244] ss:$16 sps:$4 sm:$0xff]  }
 0x4a8   : > { %4137 = vmatprep.subr.bf16.mxu0 %v6845_v60  ;;  %4180 = vmatprep.subr.bf16.mxu1 %v6854_v44 }
 0x4ab   : > { %4138 = vmatpush1.bf16.msra.mxu0 %v6843_v0  ;;  %4181 = vmatpush1.bf16.msra.mxu1 %v6852_v7  ;;  %v6882_v7 = vld [vmem:[#allocation8 + $0xe8] ss:$16 sps:$4 sm:$0xff]  }
 0x4ac   : > { %4139 = vmatprep.subr.bf16.mxu0 %v6851_v58  ;;  %4182 = vmatprep.subr.bf16.mxu1 %v6860_v54  ;;  %v6887_v54 = vld [vmem:[#allocation8 + $0xc4] ss:$16 sps:$4 sm:$0xff]  }
 0x4af   : > { %4140 = vmatpush1.bf16.msra.mxu0 %v6849_v41  ;;  %4183 = vmatpush1.bf16.msra.mxu1 %v6858_v36  ;;  %v6879_v41 = vld [vmem:[#allocation8 + $0xe0] ss:$16 sps:$4 sm:$0xff]  }
 0x4b0   : > { %4141 = vmatprep.subr.bf16.mxu0 %v6857_v11  ;;  %4184 = vmatprep.subr.bf16.mxu1 %v6866_v31  ;;  %v6885_v36 = vld [vmem:[#allocation8 + $0xc0] ss:$16 sps:$4 sm:$0xff]   ;;  %v6893_v31 = vld [vmem:[#allocation8 + $0xa4] ss:$16 sps:$4 sm:$0xff]  }
 0x4b3   : > { %4142 = vmatpush1.bf16.msra.mxu0 %v6855_v16  ;;  %4185 = vmatpush1.bf16.msra.mxu1 %v6864_v14  ;;  %v6890_v16 = vld [vmem:[#allocation8 + $0xcc] ss:$16 sps:$4 sm:$0xff]   ;;  %v6891_v14 = vld [vmem:[#allocation8 + $0xa0] ss:$16 sps:$4 sm:$0xff]  }
 0x4b4   : > { %4143 = vmatprep.subr.bf16.mxu0 %v6863_v49  ;;  %4186 = vmatprep.subr.bf16.mxu1 %v6872_v5  ;;  %v6888_v49 = vld [vmem:[#allocation8 + $0xc8] ss:$16 sps:$4 sm:$0xff]   ;;  %v6899_v5 = vld [vmem:[#allocation8 + $0x84] ss:$16 sps:$4 sm:$0xff]  }
 0x4b7   : > { %4144 = vmatpush1.bf16.msra.mxu0 %v6861_v18  ;;  %4187 = vmatpush1.bf16.msra.mxu1 %v6870_v59  ;;  %v6896_v18 = vld [vmem:[#allocation8 + $0xac] ss:$16 sps:$4 sm:$0xff]   ;;  %v6897_v59 = vld [vmem:[#allocation8 + $0x80] ss:$16 sps:$4 sm:$0xff]  }
 0x4b8   : > { %4145 = vmatprep.subr.bf16.mxu0 %v6869_v51  ;;  %4188 = vmatprep.subr.bf16.mxu1 %v6878_v35  ;;  %v6894_v51 = vld [vmem:[#allocation8 + $0xa8] ss:$16 sps:$4 sm:$0xff]   ;;  %v6905_v35 = vld [vmem:[#allocation8 + $0x64] ss:$16 sps:$4 sm:$0xff]  }
 0x4bb   : > { %4146 = vmatpush1.bf16.msra.mxu0 %v6867_v39  ;;  %4189 = vmatpush1.bf16.msra.mxu1 %v6876_v20  ;;  %v6902_v39 = vld [vmem:[#allocation8 + $0x8c] ss:$16 sps:$4 sm:$0xff]   ;;  %v6903_v20 = vld [vmem:[#allocation8 + $0x60] ss:$16 sps:$4 sm:$0xff]  }
 0x4bc   : > { %4147 = vmatprep.subr.bf16.mxu0 %v6875_v28  ;;  %4416 = vmatprep.subr.bf16.mxu1 %v6884_v6  ;;  %v6900_v28 = vld [vmem:[#allocation8 + $0x88] ss:$16 sps:$4 sm:$0xff]   ;;  %v6911_v6 = vld [vmem:[#allocation8 + $0x44] ss:$16 sps:$4 sm:$0xff]  }
 0x4bf   : > { %4148 = vmatpush1.bf16.msra.mxu0 %v6873_v10  ;;  %v6908_v10 = vld [vmem:[#allocation8 + $0x6c] ss:$16 sps:$4 sm:$0xff]  }
 0x4c0   : > { %4375 = vmatprep.subr.bf16.mxu0 %v6881_v33  ;;  %v6906_v33 = vld [vmem:[#allocation8 + $0x68] ss:$16 sps:$4 sm:$0xff]  }
 0x552   : > { %v5811_v37 = vpop.f32.mrf.mxu0 }
 0x554   : > { %v5812_v61 = vpop.f32.mrf.mxu0 }
 0x555   : > { %v5813_v45 = vadd.f32 %v5812_v61, %v5811_v37  ;;  %v6914_v37 = vld [vmem:[#allocation8 + $0x4c] ss:$16 sps:$4 sm:$0xff]   ;;  %v6909_v61 = vld [vmem:[#allocation8 + $0x40] ss:$16 sps:$4 sm:$0xff]  }
 0x556   : > { %v5814_v43 = vpop.f32.mrf.mxu0 }
 0x557   : > { %v3783_v25 = vadd.f32 %v5813_v45, %v5530_v22  ;;  %v6917_v45 = vld [vmem:[#allocation8 + $0x24] ss:$16 sps:$4 sm:$0xff]  }
 0x558   : > { %v5815_v15 = vpop.f32.mrf.mxu0 }
 0x559   : > { %v5816_v21 = vadd.f32 %v5815_v15, %v5814_v43  ;;  %v6912_v43 = vld [vmem:[#allocation8 + $0x48] ss:$16 sps:$4 sm:$0xff]   ;;  %v6915_v15 = vld [vmem:[#allocation8 + $0x20] ss:$16 sps:$4 sm:$0xff]  }
 0x55b   : > { %v3786_v12 = vadd.f32 %v5816_v21, %v5530_v22  ;;  %v6920_v22 = vld [vmem:[#allocation8 + $0x2c] ss:$16 sps:$4 sm:$0xff]   ;;  %v6921_v21 = vld [vmem:[#allocation8] ss:$16 sps:$4 sm:$0xff]  }
 0x55e   : > { %v5833_v8 = vpop.f32.mrf.mxu1 }
 0x560   : > { %v5834_v46 = vpop.f32.mrf.mxu1 }
 0x561   : > { %v5835_v52 = vadd.f32 %v5834_v46, %v5833_v8  ;;  %v6918_v8 = vld [vmem:[#allocation8 + $0x28] ss:$16 sps:$4 sm:$0xff]   ;;  %v6923_v46 = vld [vmem:[#allocation8 + $0x4] ss:$16 sps:$4 sm:$0xff]  }
 0x562   : > { %v3864_v42 = vpop.f32.mrf.mxu0  ;;  %v5836_v50 = vpop.f32.mrf.mxu1 }
 0x563   : > { %v3824_v62 = vadd.f32 %v5835_v52, %v3783_v25  ;;  %v6926_v25 = vld [vmem:[#allocation8 + $0xc] ss:$16 sps:$4 sm:$0xff]   ;;  %v6924_v52 = vld [vmem:[#allocation8 + $0x8] ss:$16 sps:$4 sm:$0xff]  }
 0x564   : > { %v5944_v19 = vpop.f32.mrf.mxu0  ;;  %v5837_v13 = vpop.f32.mrf.mxu1 }
 0x565   : > { %v3865_v1 = vadd.f32 %v3864_v42, %v3824_v62  ;;  %v5838_v27 = vadd.f32 %v5837_v13, %v5836_v50  ;;  %v6929_v42 = vld [vmem:[#allocation8 + $0x2e4] ss:$16 sps:$4 sm:$0xff]   ;;  %v6932_v50 = vld [vmem:[#allocation8 + $0x2ec] ss:$16 sps:$4 sm:$0xff]   ;;  %v6927_v62 = vld [vmem:[#allocation8 + $0x2e0] ss:$16 sps:$4 sm:$0xff]  }
 0x566   : > { %v3867_v53 = vpop.f32.mrf.mxu0  ;;  %v6930_v19 = vld [vmem:[#allocation8 + $0x2e8] ss:$16 sps:$4 sm:$0xff]   ;;  %v6935_v13 = vld [vmem:[#allocation8 + $0x2c4] ss:$16 sps:$4 sm:$0xff]  }
 0x567   : > { %v3871_v23 = vmax.f32 %v3865_v1, 0.0  ;;  %v3827_v32 = vadd.f32 %v5838_v27, %v3786_v12  ;;  %v6938_v12 = vld [vmem:[#allocation8 + $0x2cc] ss:$16 sps:$4 sm:$0xff]   ;;  %v6933_v1 = vld [vmem:[#allocation8 + $0x2c0] ss:$16 sps:$4 sm:$0xff]  }
 0x568   : > { %v5945_v4 = vpop.f32.mrf.mxu0  ;;  %v6936_v27 = vld [vmem:[#allocation8 + $0x2c8] ss:$16 sps:$4 sm:$0xff]  }
 0x569   : > { %v3875_v38 = vcombine.high %v3871_v23, %v3871_v23  ;;  %v3868_v26 = vadd.f32 %v3867_v53, %v3827_v32  ;;  %v6941_v53 = vld [vmem:[#allocation8 + $0x2a4] ss:$16 sps:$4 sm:$0xff]   ;;  %v6939_v32 = vld [vmem:[#allocation8 + $0x2a0] ss:$16 sps:$4 sm:$0xff]   ;;  %v6942_v4 = vld [vmem:[#allocation8 + $0x2a8] ss:$16 sps:$4 sm:$0xff]  }
 0x56b   : > { %v3879_v40 = vmax.f32 %v3871_v23, %v3875_v38  ;;  %v3872_v48 = vmax.f32 %v3868_v26, 0.0  ;;  %v6944_v23 = vld [vmem:[#allocation8 + $0x2ac] ss:$16 sps:$4 sm:$0xff]   ;;  %v6947_v38 = vld [vmem:[#allocation8 + $0x284] ss:$16 sps:$4 sm:$0xff]  }
 0x56c   : > { %v6950_v26 = vld [vmem:[#allocation8 + $0x28c] ss:$16 sps:$4 sm:$0xff]  }
 0x56d   : > { %3881 = vst [vmem:[#allocation7] sm:$0xf] %v3879_v40  ;;  %v3876_v34 = vcombine.high %v3872_v48, %v3872_v48  ;;  %v6945_v40 = vld [vmem:[#allocation8 + $0x280] ss:$16 sps:$4 sm:$0xff]  }
 0x56f   : > { %v3880_v9 = vmax.f32 %v3872_v48, %v3876_v34  ;;  %v6948_v48 = vld [vmem:[#allocation8 + $0x288] ss:$16 sps:$4 sm:$0xff]   ;;  %v6953_v34 = vld [vmem:[#allocation8 + $0x264] ss:$16 sps:$4 sm:$0xff]  }
 0x571   : > { %3882 = vst [vmem:[#allocation7 + $0x4] sm:$0xf] %v3880_v9  ;;  %v6956_v9 = vld [vmem:[#allocation8 + $0x26c] ss:$16 sps:$4 sm:$0xff]  }
 0x574   : > { %v3883_v57 = vld [vmem:[#allocation7] ss:$2 sm:$0x3]  ;;  %v3887_v24 = vld [vmem:[#allocation7 + $0x1] ss:$2 sm:$0x3] }
 0x575   : > { %v3890_v0 = vmax.f32 %v3883_v57, %v3887_v24  ;;  %v6962_v57 = vld [vmem:[#allocation8 + $0x24c] ss:$16 sps:$4 sm:$0xff]   ;;  %v6957_v24 = vld [vmem:[#allocation8 + $0x240] ss:$16 sps:$4 sm:$0xff]  }
 0x578   : > { %v3885_v47 = vld [vmem:[#allocation7 + $0x4] ss:$2 sm:$0x3]  ;;  %v3889_v29 = vld [vmem:[#allocation7 + $0x5] ss:$2 sm:$0x3] }
 0x579   : > { %v3891_v60 = vmax.f32 %v3885_v47, %v3889_v29  ;;  %v6960_v47 = vld [vmem:[#allocation8 + $0x248] ss:$16 sps:$4 sm:$0xff]   ;;  %v6965_v29 = vld [vmem:[#allocation8 + $0x224] ss:$16 sps:$4 sm:$0xff]  }
 0x57b   : > { %v3894_v3 = vcombine.low %v3890_v0, %v3891_v60  ;;  %v6968_v0 = vld [vmem:[#allocation8 + $0x22c] ss:$16 sps:$4 sm:$0xff]   ;;  %v6963_v60 = vld [vmem:[#allocation8 + $0x220] ss:$16 sps:$4 sm:$0xff]  }
 0x57d   : > { %v3901_v58 = vrot.slane %v3894_v3, %v3900_v2  ;;  %v6966_v2 = vld [vmem:[#allocation8 + $0x228] ss:$16 sps:$4 sm:$0xff]   ;;  %v6971_v3 = vld [vmem:[#allocation8 + $0x204] ss:$16 sps:$4 sm:$0xff]  }
 0x57f   : > { %v8803_v44 = vpack.c.bf16 %v3901_v58, %v3901_v58  ;;  %v6974_v58 = vld [vmem:[#allocation8 + $0x20c] ss:$16 sps:$4 sm:$0xff]  }
 0x581   : > { %v8806_v11 = vshrl.u32 %v8803_v44, 16 }
 0x583   : > { %4166 = vmatmul.mubr.bf16.vlgmr.msra.gmra.mxu0 %v8806_v11  ;;  %4207 = vmatmul.mubr.bf16.vlgmr.msra.gmra.mxu1 %v8806_v11 }
 0x584   : > { %4376 = vmatpush1.bf16.msra.mxu0 %v6879_v41  ;;  %4417 = vmatpush1.bf16.msra.mxu1 %v6882_v7  ;;  %v6969_v41 = vld [vmem:[#allocation8 + $0x200] ss:$16 sps:$4 sm:$0xff]   ;;  %v6972_v7 = vld [vmem:[#allocation8 + $0x208] ss:$16 sps:$4 sm:$0xff]  }
 0x585   : > { %4377 = vmatprep.subr.bf16.mxu0 %v6887_v54  ;;  %4418 = vmatprep.subr.bf16.mxu1 %v6890_v16  ;;  %v6977_v54 = vld [vmem:[#allocation8 + $0x3e4] ss:$16 sps:$4 sm:$0xff]   ;;  %v6980_v16 = vld [vmem:[#allocation8 + $0x3ec] ss:$16 sps:$4 sm:$0xff]  }
 0x586   : > { %4407 = vmatprep.mubr.bf16.mxu0 %v7178_v17  ;;  %4448 = vmatprep.mubr.bf16.mxu1 %v7178_v17 }
 0x588   : > { %4378 = vmatpush1.bf16.msra.mxu0 %v6885_v36  ;;  %4419 = vmatpush1.bf16.msra.mxu1 %v6888_v49  ;;  %v6975_v36 = vld [vmem:[#allocation8 + $0x3e0] ss:$16 sps:$4 sm:$0xff]   ;;  %v6978_v49 = vld [vmem:[#allocation8 + $0x3e8] ss:$16 sps:$4 sm:$0xff]  }
 0x589   : > { %4379 = vmatprep.subr.bf16.mxu0 %v6893_v31  ;;  %4420 = vmatprep.subr.bf16.mxu1 %v6896_v18  ;;  %v4491_v31 = vrot.slane %v8803_v44, 1  ;;  %v6983_v18 = vld [vmem:[#allocation8 + $0x3c4] ss:$16 sps:$4 sm:$0xff]  }
 0x58c   : > { %4380 = vmatpush1.bf16.msra.mxu0 %v6891_v14  ;;  %4421 = vmatpush1.bf16.msra.mxu1 %v6894_v51  ;;  %v6986_v14 = vld [vmem:[#allocation8 + $0x3cc] ss:$16 sps:$4 sm:$0xff]   ;;  %v6981_v51 = vld [vmem:[#allocation8 + $0x3c0] ss:$16 sps:$4 sm:$0xff]  }
 0x58d   : > { %4381 = vmatprep.subr.bf16.mxu0 %v6899_v5  ;;  %4422 = vmatprep.subr.bf16.mxu1 %v6902_v39  ;;  %v6984_v5 = vld [vmem:[#allocation8 + $0x3c8] ss:$16 sps:$4 sm:$0xff]   ;;  %v6989_v39 = vld [vmem:[#allocation8 + $0x3a4] ss:$16 sps:$4 sm:$0xff]  }
 0x590   : > { %4382 = vmatpush1.bf16.msra.mxu0 %v6897_v59  ;;  %4423 = vmatpush1.bf16.msra.mxu1 %v6900_v28  ;;  %v6992_v59 = vld [vmem:[#allocation8 + $0x3ac] ss:$16 sps:$4 sm:$0xff]   ;;  %v6990_v28 = vld [vmem:[#allocation8 + $0x3a8] ss:$16 sps:$4 sm:$0xff]  }
 0x591   : > { %4383 = vmatprep.subr.bf16.mxu0 %v6905_v35  ;;  %4424 = vmatprep.subr.bf16.mxu1 %v6908_v10  ;;  %v6995_v35 = vld [vmem:[#allocation8 + $0x384] ss:$16 sps:$4 sm:$0xff]   ;;  %v6998_v10 = vld [vmem:[#allocation8 + $0x38c] ss:$16 sps:$4 sm:$0xff]  }
 0x594   : > { %4384 = vmatpush1.bf16.msra.mxu0 %v6903_v20  ;;  %4425 = vmatpush1.bf16.msra.mxu1 %v6906_v33  ;;  %v6993_v20 = vld [vmem:[#allocation8 + $0x380] ss:$16 sps:$4 sm:$0xff]   ;;  %v6996_v33 = vld [vmem:[#allocation8 + $0x388] ss:$16 sps:$4 sm:$0xff]  }
 0x595   : > { %4385 = vmatprep.subr.bf16.mxu0 %v6911_v6  ;;  %4426 = vmatprep.subr.bf16.mxu1 %v6914_v37  ;;  %v7001_v6 = vld [vmem:[#allocation8 + $0x364] ss:$16 sps:$4 sm:$0xff]   ;;  %v7004_v37 = vld [vmem:[#allocation8 + $0x36c] ss:$16 sps:$4 sm:$0xff]  }
 0x598   : > { %4386 = vmatpush1.bf16.msra.mxu0 %v6909_v61  ;;  %4427 = vmatpush1.bf16.msra.mxu1 %v6912_v43  ;;  %v6999_v61 = vld [vmem:[#allocation8 + $0x360] ss:$16 sps:$4 sm:$0xff]   ;;  %v7007_v43 = vld [vmem:[#allocation8 + $0x344] ss:$16 sps:$4 sm:$0xff]  }
 0x599   : > { %4387 = vmatprep.subr.bf16.mxu0 %v6917_v45  ;;  %4428 = vmatprep.subr.bf16.mxu1 %v6920_v22  ;;  %v7010_v45 = vld [vmem:[#allocation8 + $0x34c] ss:$16 sps:$4 sm:$0xff]   ;;  %v7005_v22 = vld [vmem:[#allocation8 + $0x340] ss:$16 sps:$4 sm:$0xff]  }
 0x59c   : > { %4388 = vmatpush1.bf16.msra.mxu0 %v6915_v15  ;;  %4429 = vmatpush1.bf16.msra.mxu1 %v6918_v8  ;;  %v7008_v15 = vld [vmem:[#allocation8 + $0x348] ss:$16 sps:$4 sm:$0xff]   ;;  %v7013_v8 = vld [vmem:[#allocation8 + $0x324] ss:$16 sps:$4 sm:$0xff]  }
 0x59d   : > { %4389 = vmatprep.subr.bf16.mxu0 %v6923_v46  ;;  %4430 = vmatprep.subr.bf16.mxu1 %v6926_v25  ;;  %v7016_v46 = vld [vmem:[#allocation8 + $0x32c] ss:$16 sps:$4 sm:$0xff]   ;;  %v7011_v25 = vld [vmem:[#allocation8 + $0x320] ss:$16 sps:$4 sm:$0xff]  }
 0x5a0   : > { %4390 = vmatpush1.bf16.msra.mxu0 %v6921_v21  ;;  %4431 = vmatpush1.bf16.msra.mxu1 %v6924_v52  ;;  %v7014_v21 = vld [vmem:[#allocation8 + $0x328] ss:$16 sps:$4 sm:$0xff]   ;;  %v7019_v52 = vld [vmem:[#allocation8 + $0x304] ss:$16 sps:$4 sm:$0xff]  }
 0x5a1   : > { %4653 = vmatprep.subr.bf16.mxu0 %v6929_v42  ;;  %4694 = vmatprep.subr.bf16.mxu1 %v6932_v50  ;;  %v7022_v42 = vld [vmem:[#allocation8 + $0x30c] ss:$16 sps:$4 sm:$0xff]   ;;  %v7017_v50 = vld [vmem:[#allocation8 + $0x300] ss:$16 sps:$4 sm:$0xff]  }
 0x5a3   : > { %4408 = vmatmul.mubr.bf16.vlgmr.msra.gmra.mxu0 %v8803_v44  ;;  %4449 = vmatmul.mubr.bf16.vlgmr.msra.gmra.mxu1 %v8803_v44  ;;  %v6987_v44 = vld [vmem:[#allocation8 + $0x3a0] ss:$16 sps:$4 sm:$0xff]  }
 0x5a4   : > { %4654 = vmatpush1.bf16.msra.mxu0 %v6927_v62  ;;  %4695 = vmatpush1.bf16.msra.mxu1 %v6930_v19  ;;  %v7020_v62 = vld [vmem:[#allocation8 + $0x308] ss:$16 sps:$4 sm:$0xff]   ;;  %v4772_v19 = vrot.slane %v8806_v11, 1 }
 0x5a5   : > { %4655 = vmatprep.subr.bf16.mxu0 %v6935_v13  ;;  %4696 = vmatprep.subr.bf16.mxu1 %v6938_v12  ;;  %v7023_v13 = vld [vmem:[%s8969_s9 + $0x78] sm:$0xff]   ;;  %v7027_v11 = vld [vmem:[%s8969_s9 + $0x70] sm:$0xff]  }
 0x5a6   : > { %4685 = vmatprep.mubr.bf16.mxu0 %v7178_v17  ;;  %4726 = vmatprep.mubr.bf16.mxu1 %v7178_v17  ;;  %v7024_v12 = vld [vmem:[%s8969_s9 + $0xf8] sm:$0xff]  }
 0x5a8   : > { %4656 = vmatpush1.bf16.msra.mxu0 %v6933_v1  ;;  %4697 = vmatpush1.bf16.msra.mxu1 %v6936_v27  ;;  %v7025_v1 = vld [vmem:[%s8969_s9 + $0x38] sm:$0xff]  }
 0x5a9   : > { %4657 = vmatprep.subr.bf16.mxu0 %v6941_v53  ;;  %4698 = vmatprep.subr.bf16.mxu1 %v6944_v23  ;;  %v7026_v27 = vld [vmem:[%s8969_s9 + $0xb8] sm:$0xff]   ;;  %v7028_v53 = vld [vmem:[%s8969_s9 + $0xf0] sm:$0xff]  }
 0x5aa   : > { %v7029_v23 = vld [vmem:[%s8969_s9 + $0x30] sm:$0xff]  }
 0x5ac   : > { %4658 = vmatpush1.bf16.msra.mxu0 %v6939_v32  ;;  %4699 = vmatpush1.bf16.msra.mxu1 %v6942_v4  ;;  %v7030_v32 = vld [vmem:[%s8969_s9 + $0xb0] sm:$0xff]   ;;  %v7031_v4 = vld [vmem:[%s8969_s9 + $0x68] sm:$0xff]  }
 0x5ad   : > { %4659 = vmatprep.subr.bf16.mxu0 %v6947_v38  ;;  %4700 = vmatprep.subr.bf16.mxu1 %v6950_v26  ;;  %v7032_v38 = vld [vmem:[%s8969_s9 + $0xe8] sm:$0xff]  }
 0x5ae   : > { %v7033_v26 = vld [vmem:[%s8969_s9 + $0x28] sm:$0xff]  }
 0x5b0   : > { %4660 = vmatpush1.bf16.msra.mxu0 %v6945_v40  ;;  %4701 = vmatpush1.bf16.msra.mxu1 %v6948_v48  ;;  %v7034_v40 = vld [vmem:[%s8969_s9 + $0xa8] sm:$0xff]   ;;  %v7035_v48 = vld [vmem:[%s8969_s9 + $0x60] sm:$0xff]  }
 0x5b1   : > { %4661 = vmatprep.subr.bf16.mxu0 %v6953_v34  ;;  %4702 = vmatprep.subr.bf16.mxu1 %v6956_v9  ;;  %v7036_v34 = vld [vmem:[%s8969_s9 + $0xe0] sm:$0xff]  }
 0x5b2   : > { %v7037_v9 = vld [vmem:[%s8969_s9 + $0x20] sm:$0xff]  }
 0x5b4   : > { %4662 = vmatpush1.bf16.msra.mxu0 %v6951_v55  ;;  %4703 = vmatpush1.bf16.msra.mxu1 %v6954_v56  ;;  %v7038_v55 = vld [vmem:[%s8969_s9 + $0xa0] sm:$0xff]   ;;  %v7039_v56 = vld [vmem:[%s8969_s9 + $0x58] sm:$0xff]  }
 0x5b5   : > { %4663 = vmatprep.subr.bf16.mxu0 %v6959_v63  ;;  %4704 = vmatprep.subr.bf16.mxu1 %v6962_v57  ;;  %v7040_v63 = vld [vmem:[%s8969_s9 + $0xd8] sm:$0xff]  }
 0x5b6   : > { %v7041_v57 = vld [vmem:[%s8969_s9 + $0x18] sm:$0xff]  }
 0x5b8   : > { %4664 = vmatpush1.bf16.msra.mxu0 %v6957_v24  ;;  %4705 = vmatpush1.bf16.msra.mxu1 %v6960_v47  ;;  %v7042_v24 = vld [vmem:[%s8969_s9 + $0x98] sm:$0xff]   ;;  %v7043_v47 = vld [vmem:[%s8969_s9 + $0x50] sm:$0xff]  }
 0x5b9   : > { %4665 = vmatprep.subr.bf16.mxu0 %v6965_v29  ;;  %4706 = vmatprep.subr.bf16.mxu1 %v6968_v0  ;;  %v7044_v29 = vld [vmem:[%s8969_s9 + $0xd0] sm:$0xff]  }
 0x5ba   : > { %v7045_v0 = vld [vmem:[%s8969_s9 + $0x10] sm:$0xff]  }
 0x5bc   : > { %4666 = vmatpush1.bf16.msra.mxu0 %v6963_v60  ;;  %4707 = vmatpush1.bf16.msra.mxu1 %v6966_v2  ;;  %v7046_v60 = vld [vmem:[%s8969_s9 + $0x90] sm:$0xff]   ;;  %v7047_v2 = vld [vmem:[%s8969_s9 + $0x48] sm:$0xff]  }
 0x5bd   : > { %4667 = vmatprep.subr.bf16.mxu0 %v6971_v3  ;;  %4708 = vmatprep.subr.bf16.mxu1 %v6974_v58  ;;  %v7048_v3 = vld [vmem:[%s8969_s9 + $0xc8] sm:$0xff]  }
 0x5be   : > { %v7049_v58 = vld [vmem:[%s8969_s9 + $0x8] sm:$0xff]  }
 0x5c0   : > { %4668 = vmatpush1.bf16.msra.mxu0 %v6969_v41  ;;  %4709 = vmatpush1.bf16.msra.mxu1 %v6972_v7  ;;  %v7050_v41 = vld [vmem:[%s8969_s9 + $0x88] sm:$0xff]   ;;  %v7051_v7 = vld [vmem:[%s8969_s9 + $0x40] sm:$0xff]  }
 0x5c1   : > { %4934 = vmatprep.subr.bf16.mxu0 %v6977_v54  ;;  %4975 = vmatprep.subr.bf16.mxu1 %v6980_v16  ;;  %v7052_v54 = vld [vmem:[%s8969_s9 + $0xc0] sm:$0xff]  }
 0x5c2   : > { %v7053_v16 = vld [vmem:[%s8969_s9] sm:$0xff]  }
 0x5c3   : > { %4686 = vmatmul.mubr.bf16.vlgmr.msra.gmra.mxu0 %v4491_v31  ;;  %4727 = vmatmul.mubr.bf16.vlgmr.msra.gmra.mxu1 %v4491_v31 }
 0x5c4   : > { %4935 = vmatpush1.bf16.msra.mxu0 %v6975_v36  ;;  %4976 = vmatpush1.bf16.msra.mxu1 %v6978_v49  ;;  %v7054_v36 = vld [vmem:[%s8969_s9 + $0x80] sm:$0xff]  }
 0x5c5   : > { %4936 = vmatprep.subr.bf16.mxu0 %v6983_v18  ;;  %4977 = vmatprep.subr.bf16.mxu1 %v6986_v14 }
 0x5c6   : > { %4966 = vmatprep.mubr.bf16.mxu0 %v7178_v17  ;;  %5007 = vmatprep.mubr.bf16.mxu1 %v7178_v17  ;;  %v7002_v17 = vld [vmem:[#allocation8 + $0x368] ss:$16 sps:$4 sm:$0xff]  }
 0x5c8   : > { %4937 = vmatpush1.bf16.msra.mxu0 %v6981_v51  ;;  %4978 = vmatpush1.bf16.msra.mxu1 %v6984_v5 }
 0x5c9   : > { %4938 = vmatprep.subr.bf16.mxu0 %v6989_v39  ;;  %4979 = vmatprep.subr.bf16.mxu1 %v6992_v59 }
 0x5cc   : > { %4939 = vmatpush1.bf16.msra.mxu0 %v6987_v44  ;;  %4980 = vmatpush1.bf16.msra.mxu1 %v6990_v28 }
 0x5cd   : > { %4940 = vmatprep.subr.bf16.mxu0 %v6995_v35  ;;  %4981 = vmatprep.subr.bf16.mxu1 %v6998_v10 }
 0x5d0   : > { %4941 = vmatpush1.bf16.msra.mxu0 %v6993_v20  ;;  %4982 = vmatpush1.bf16.msra.mxu1 %v6996_v33 }
 0x5d1   : > { %4942 = vmatprep.subr.bf16.mxu0 %v7001_v6  ;;  %4983 = vmatprep.subr.bf16.mxu1 %v7004_v37 }
 0x5d4   : > { %4943 = vmatpush1.bf16.msra.mxu0 %v6999_v61  ;;  %4984 = vmatpush1.bf16.msra.mxu1 %v7002_v17 }
 0x5d5   : > { %4944 = vmatprep.subr.bf16.mxu0 %v7007_v43  ;;  %4985 = vmatprep.subr.bf16.mxu1 %v7010_v45 }
 0x5d8   : > { %4945 = vmatpush1.bf16.msra.mxu0 %v7005_v22  ;;  %4986 = vmatpush1.bf16.msra.mxu1 %v7008_v15 }
 0x5d9   : > { %4946 = vmatprep.subr.bf16.mxu0 %v7013_v8  ;;  %4987 = vmatprep.subr.bf16.mxu1 %v7016_v46 }
 0x5dc   : > { %4947 = vmatpush1.bf16.msra.mxu0 %v7011_v25  ;;  %4988 = vmatpush1.bf16.msra.mxu1 %v7014_v21  ;;  %v5024_v25 = vsub.s32 0, %v8581_v30  ;;  %v5032_v21 = vsub.s32 2, %v8581_v30 }
 0x5dd   : > { %4948 = vmatprep.subr.bf16.mxu0 %v7019_v52  ;;  %4989 = vmatprep.subr.bf16.mxu1 %v7022_v42  ;;  %v5020_v52 = vld [vmem:[%s8968_s8] sm:$0xf]  ;;  %v5028_v42 = vsub.s32 1, %v8581_v30 }
 0x5e0   : > { %4949 = vmatpush1.bf16.msra.mxu0 %v7017_v50  ;;  %4990 = vmatpush1.bf16.msra.mxu1 %v7020_v62  ;;  %v5036_v50 = vsub.s32 3, %v8581_v30 }
 0x5e1   : > { %5844 = vmatprep.subr.bf16.mxu0 %v7023_v13  ;;  %5866 = vmatprep.subr.bf16.mxu1 %v7024_v12  ;;  %v5025_v13 = vrot.slane %v5020_v52, %v5024_v25  ;;  %v5033_v12 = vrot.slane %v5020_v52, %v5032_v21 }
 0x5e3   : > { %4967 = vmatmul.mubr.bf16.vlgmr.msra.gmra.mxu0 %v4772_v19  ;;  %5008 = vmatmul.mubr.bf16.vlgmr.msra.gmra.mxu1 %v4772_v19 }
 0x5e4   : > { %5845 = vmatpush3.bf16.msra.mxu0 %v7025_v1  ;;  %5867 = vmatpush3.bf16.msra.mxu1 %v7026_v27 }
 0x5e5   : > { %5846 = vmatprep.subr.bf16.mxu0 %v7027_v11  ;;  %5868 = vmatprep.subr.bf16.mxu1 %v7028_v53 }
 0x5e8   : > { %5847 = vmatpush3.bf16.msra.mxu0 %v7029_v23  ;;  %5869 = vmatpush3.bf16.msra.mxu1 %v7030_v32 }
 0x5e9   : > { %5848 = vmatprep.subr.bf16.mxu0 %v7031_v4  ;;  %5870 = vmatprep.subr.bf16.mxu1 %v7032_v38  ;;  %v5029_v4 = vrot.slane %v5020_v52, %v5028_v42  ;;  %v5037_v38 = vrot.slane %v5020_v52, %v5036_v50 }
 0x5ec   : > { %5849 = vmatpush3.bf16.msra.mxu0 %v7033_v26  ;;  %5871 = vmatpush3.bf16.msra.mxu1 %v7034_v40 }
 0x5ed   : > { %5850 = vmatprep.subr.bf16.mxu0 %v7035_v48  ;;  %5872 = vmatprep.subr.bf16.mxu1 %v7036_v34 }
 0x5f0   : > { %5851 = vmatpush3.bf16.msra.mxu0 %v7037_v9  ;;  %5873 = vmatpush3.bf16.msra.mxu1 %v7038_v55 }
 0x5f1   : > { %5852 = vmatprep.subr.bf16.mxu0 %v7039_v56  ;;  %5874 = vmatprep.subr.bf16.mxu1 %v7040_v63 }
 0x5f4   : > { %5853 = vmatpush3.bf16.msra.mxu0 %v7041_v57  ;;  %5875 = vmatpush3.bf16.msra.mxu1 %v7042_v24 }
 0x5f5   : > { %5854 = vmatprep.subr.bf16.mxu0 %v7043_v47  ;;  %5876 = vmatprep.subr.bf16.mxu1 %v7044_v29 }
 0x5f8   : > { %5855 = vmatpush3.bf16.msra.mxu0 %v7045_v0  ;;  %5877 = vmatpush3.bf16.msra.mxu1 %v7046_v60 }
 0x5f9   : > { %5856 = vmatprep.subr.bf16.mxu0 %v7047_v2  ;;  %5878 = vmatprep.subr.bf16.mxu1 %v7048_v3 }
 0x5fc   : > { %5857 = vmatpush3.bf16.msra.mxu0 %v7049_v58  ;;  %5879 = vmatpush3.bf16.msra.mxu1 %v7050_v41 }
 0x5fd   : > { %5858 = vmatprep.subr.bf16.mxu0 %v7051_v7  ;;  %5880 = vmatprep.subr.bf16.mxu1 %v7052_v54 }
 0x600   : > { %5859 = vmatpush3.bf16.msra.mxu0 %v7053_v16  ;;  %5881 = vmatpush3.bf16.msra.mxu1 %v7054_v36 }
 0x643   : > { %v4167_v49 = vpop.f32.mrf.mxu0  ;;  %v4208_v31 = vpop.f32.mrf.mxu1 }
 0x645   : > { %v4169_v18 = vpop.f32.mrf.mxu0  ;;  %v4210_v14 = vpop.f32.mrf.mxu1 }
 0x647   : > { %v4171_v51 = vpop.f32.mrf.mxu0  ;;  %v4212_v5 = vpop.f32.mrf.mxu1 }
 0x649   : > { %v4172_v39 = vpop.f32.mrf.mxu0  ;;  %v4213_v59 = vpop.f32.mrf.mxu1 }
 0x663   : > { %v4409_v44 = vpop.f32.mrf.mxu0  ;;  %v4450_v28 = vpop.f32.mrf.mxu1 }
 0x664   : > { %v4410_v62 = vadd.f32 %v4409_v44, %v4167_v49  ;;  %v4451_v19 = vadd.f32 %v4450_v28, %v4208_v31 }
 0x665   : > { %v4411_v35 = vpop.f32.mrf.mxu0  ;;  %v4452_v10 = vpop.f32.mrf.mxu1 }
 0x666   : > { %v4412_v1 = vadd.f32 %v4411_v35, %v4169_v18  ;;  %v4453_v27 = vadd.f32 %v4452_v10, %v4210_v14  ;;  %v5118_v14 = vld [vmem:[%s8970_s10] sm:$0x1] }
 0x667   : > { %v4413_v20 = vpop.f32.mrf.mxu0  ;;  %v4454_v33 = vpop.f32.mrf.mxu1 }
 0x669   : > { %v4414_v6 = vpop.f32.mrf.mxu0  ;;  %v4455_v37 = vpop.f32.mrf.mxu1 }
 0x683   : > { %v4687_v61 = vpop.f32.mrf.mxu0  ;;  %v4728_v17 = vpop.f32.mrf.mxu1 }
 0x684   : > { %v4735_v11 = vadd.f32 %v4687_v61, %v4410_v62  ;;  %v4737_v53 = vadd.f32 %v4728_v17, %v4451_v19 }
 0x685   : > { %v4689_v43 = vpop.f32.mrf.mxu0  ;;  %v4730_v45 = vpop.f32.mrf.mxu1 }
 0x686   : > { %v4736_v26 = vadd.f32 %v4689_v43, %v4412_v1  ;;  %v4738_v40 = vadd.f32 %v4730_v45, %v4453_v27 }
 0x687   : > { %v4691_v22 = vpop.f32.mrf.mxu0  ;;  %v4732_v15 = vpop.f32.mrf.mxu1 }
 0x689   : > { %v4692_v8 = vpop.f32.mrf.mxu0  ;;  %v4733_v46 = vpop.f32.mrf.mxu1 }
 0x6a3   : > { %v4968_v23 = vpop.f32.mrf.mxu0  ;;  %v5009_v32 = vpop.f32.mrf.mxu1 }
 0x6a4   : > { %v5016_v48 = vadd.f32 %v4968_v23, %v4735_v11  ;;  %v5018_v34 = vadd.f32 %v5009_v32, %v4737_v53 }
 0x6a5   : > { %v4970_v9 = vpop.f32.mrf.mxu0  ;;  %v5011_v55 = vpop.f32.mrf.mxu1 }
 0x6a6   : > { %v5042_v56 = vadd.f32 %v5025_v13, %v5016_v48  ;;  %v5044_v30 = vadd.f32 %v5033_v12, %v5018_v34  ;;  %v5017_v63 = vadd.f32 %v4970_v9, %v4736_v26  ;;  %v5019_v57 = vadd.f32 %v5011_v55, %v4738_v40 }
 0x6a7   : > { %v4972_v24 = vpop.f32.mrf.mxu0  ;;  %v5013_v47 = vpop.f32.mrf.mxu1 }
 0x6a8   : > { %v5043_v29 = vadd.f32 %v5029_v4, %v5017_v63  ;;  %v5045_v0 = vadd.f32 %v5037_v38, %v5019_v57  ;;  %v5046_v60 = vmax.f32 %v5042_v56, 0.0  ;;  %v5048_v2 = vmax.f32 %v5044_v30, 0.0 }
 0x6a9   : > { %v4973_v3 = vpop.f32.mrf.mxu0  ;;  %v5014_v58 = vpop.f32.mrf.mxu1 }
 0x6aa   : > { %v5047_v41 = vmax.f32 %v5043_v29, 0.0  ;;  %v5049_v7 = vmax.f32 %v5045_v0, 0.0  ;;  %v5050_v36 = vpack.c.bf16 %v5046_v60, %v5046_v60  ;;  %v5052_v49 = vpack.c.bf16 %v5048_v2, %v5048_v2 }
 0x6ac   : > { %v5051_v54 = vpack.c.bf16 %v5047_v41, %v5047_v41  ;;  %v5053_v16 = vpack.c.bf16 %v5049_v7, %v5049_v7 }
 0x6ae   : > { %5343 = vmatprep.mubr.bf16.mxu0 %v5051_v54  ;;  %5383 = vmatprep.mubr.bf16.mxu1 %v5053_v16 }
 0x6af   : > { %5344 = vmatmul.mubr.bf16.vlgmr.msra.gmra.mxu0 %v5050_v36  ;;  %5384 = vmatmul.mubr.bf16.vlgmr.msra.gmra.mxu1 %v5052_v49 }
 0x76f   : > { %v5860_v31 = vpop.f32.mrf.mxu0  ;;  %v5882_v18 = vpop.f32.mrf.mxu1 }
 0x771   : > { %v5861_v51 = vpop.f32.mrf.mxu0  ;;  %v5883_v5 = vpop.f32.mrf.mxu1 }
 0x772   : > { %v5862_v39 = vadd.f32 %v5861_v51, %v5860_v31  ;;  %v5884_v35 = vadd.f32 %v5883_v5, %v5882_v18 }
 0x773   : > { %v5863_v59 = vpop.f32.mrf.mxu0  ;;  %v5885_v44 = vpop.f32.mrf.mxu1 }
 0x774   : > { %v5346_v28 = vadd.f32 %v5862_v39, %v5118_v14 }
 0x775   : > { %v5864_v10 = vpop.f32.mrf.mxu0  ;;  %v5886_v20 = vpop.f32.mrf.mxu1 }
 0x776   : > { %v5386_v33 = vadd.f32 %v5884_v35, %v5346_v28 }
 0x778   : > { %5391 = vst [vmem:[%s393_s15] sm:$0x1] %v5386_v33 }
 0x779   : > { %7108 = shalt.err (!%p7105_p0)
}
 0x77a   : > { %s7109_s22 = scalar_lea.hbm %s5403_s0, 16  ;;  %s7113_s15 = scalar_lea.hbm %s8971_s11, 32 }
 0x77b   : > { %p7110_p1 = scmp.ne.s32.totalorder %s5403_s0, %s7109_s22  ;;  %p7114_p4 = scmp.lt.s32.totalorder %s5403_s0, %s8971_s11 }
 0x77c   : > { %p7115_p7 = scmp.lt.s32.totalorder %s7113_s15, %s7109_s22 }
 0x77d   : > { %p7111_p2 = pnand %p7110_p1, %p7279_p5 }
 0x77e   : > { %p7116_p6 = por %p7115_p7, %p7114_p4 }
 0x77f   : > { %p7112_p3 = pneg %p7111_p2 }
 0x781   : > { %p7117_p8 = pnand %p7116_p6, %p7112_p3 }
 0x783   : > { %7120 = shalt.err (!%p7117_p8)
}
 0x784   : > { %5950 = dma.vmem_to_hbm [thread:$0]  (%p7279_p5), %s5406_s30, 16, %s5403_s0, %s5393_s12  }
 0x785 PF: > { %p5962_p9 = scmp.ge.s32.totalorder %s7159_s20, 2  ;;  %s5417_s14 = sand.u32 1, %s7147_s17  }
 0x786   : > { %p8997_p10 = scmp.ne.s32.totalorder %s8979_s28, 0  ;;  %s5418_s21 = scalar_lea.sflag [#allocation10], %s5417_s14 }
 0x788   : > { %p5957_p11 = pnand %p5962_p9, %p8997_p10 }
 0x78a   : > { %p5958_p12 = pneg %p5957_p11 }
 0x78c   : > { %7142 = dma.done.wait (%p5958_p12), %s5418_s21, 16  }
 0x78d   : > { %7144 = vsyncadd (%p5958_p12), %s5418_s21, 4294967280  ;;  %p22_p13 = scmp.ge.s32.totalorder %s7266_s23, 4   ;;  %s8998_s17 = smov %s7151_s18 }
 0x78e   : > { %s8999_s18 = smov %s7155_s19  ;;  %s9000_s19 = smov %s7277_s26 }
 0x78f   : > { %s9001_s20 = smov %s7266_s23  ;;  %24 = sbr.rel (!%p22_p13) target bundleno = 7 (0x7), region = 138 }
 0x794   :  { %5422 = vsyncpa [#allocation9], 1 }
 0x795   :  { %5424 = vsyncpa [#allocation9 + $0x1], 1 }
 0x796   :  { %5425 = vsyncpa [#allocation10], 1 }
 0x797   :  { %5427 = vsyncpa [#allocation10 + $0x1], 1 }

</bundles_post_ra>
